<compile_context>
chip_gen: v6e
topology: v6e:2x2x1
jax: 0.10.0
libtpu: 0.0.40
codegen_flags: <defaults>
</compile_context>

<pallas_src>
import jax
import jax.numpy as jnp
from jax.experimental import pallas as pl
from jax.experimental.pallas import tpu as pltpu

BN_EPS = 1e-5
COUT = 32                  # conv output channels (module spec); residual needs Cin == 32
GROUP = 4                  # spatial positions packed per lane-dense row
LANES = GROUP * COUT       # 128 lanes per output row
T1 = 256                   # pass-1 lane-dense rows per grid step (= 1024 positions)
T2 = 512                   # pass-2 lane-dense rows per grid step
VMEM_LIMIT = 32 * 1024 * 1024   # fits v7x (64 MiB phys) and v5e/v6e comfortably


def bn_resid_relu_kernel(affine_ref, conv_ref, resid_ref, out_ref):
    # affine_ref: (2, 128) f32 -- row 0 = gamma*inv_std (tiled x4), row 1 = beta - mean*scale
    # conv_ref  : (T2, 128) bf16, resid_ref: (T2, 128) f32
    scale = affine_ref[0:1, :]
    shift = affine_ref[1:2, :]
    y = conv_ref[...].astype(jnp.float32) * scale + shift + resid_ref[...]
    out_ref[...] = jnp.maximum(y, 0.0)


def residual_block(x_nchw, w_oihw, b, gamma, beta):
    """Forward of ResidualBlock. x_nchw: (N, 32, H, W) f32. `b` (conv bias) is
    accepted for interface fidelity but mathematically cancelled by training-mode BN."""
    n, cin, h, w = x_nchw.shape
    cout = w_oihw.shape[0]
    assert cout == COUT and cin == COUT, "residual add requires Cin == Cout == 32"
    assert w % GROUP == 0, "W must be a multiple of 4 for lane-dense packing"
    wg = w // GROUP                      # lane-dense rows per padded image row
    hp = h + 2                           # padded image rows (output grid runs over hp)
    kd = GROUP * 3 * cin                 # 384: 4 positions x (3 dx taps x Cin) per slab row
    halo = ((2 * wg + 7) // 8) * 8       # >= 2*wg rows of dy halo, rounded to sublanes

    # ---- layout prep (XLA; production path would keep NHWC + prebuilt weights) ----
    x_nhwc = jnp.transpose(x_nchw, (0, 2, 3, 1))                         # (N,H,W,C)
    xpad = jnp.pad(x_nhwc, ((0, 0), (1, 1), (1, 1), (0, 0)))             # (N,H+2,W+2,C)
    # dx-only im2col: 3x inflation (vs 9x before). hrow[n,y,x, dx*C+ci] = xpad[n,y,x+dx,ci]
    hrow = jnp.concatenate([xpad[:, :, dx:dx + w, :] for dx in range(3)], axis=-1)
    rp = n * hp * wg                                                     # padded-grid rows
    slab = hrow.reshape(rp, kd).astype(jnp.bfloat16)                     # (rp, 384)

    rows_pad = ((rp + T2 - 1) // T2) * T2          # multiple of T2 (and of T1)
    n_tiles1 = rows_pad // T1
    n_tiles2 = rows_pad // T2

    # Per-tile halo'd windows (overlap = halo rows per T1 rows, ~3%): expressible
    # with plain Blocked specs, so the dy shift never needs element-level index maps.
    slab_p = jnp.pad(slab, ((0, rows_pad - rp + halo), (0, 0)))
    idx = jnp.arange(n_tiles1)[:, None] * T1 + jnp.arange(T1 + halo)[None, :]
    slab_tiles = slab_p[idx]                                             # (n_tiles1, T1+halo, 384)

    # weights: OIHW -> (dy,dx,ci,co); per dy flatten (dx,ci) and kron-expand block-diagonal
    # so each matmul emits 4 spatial positions per 128-lane row.
    w_t = jnp.transpose(w_oihw, (2, 3, 1, 0))                            # (3,3,Cin,Cout)
    eye = jnp.eye(GROUP, dtype=w_t.dtype)
    w_dense = jnp.stack(
        [jnp.kron(eye, w_t[dy].reshape(3 * cin, cout)) for dy in range(3)],
        axis=0).astype(jnp.bfloat16)                                     # (3, 384, 128)
    # NOTE: conv bias `b` intentionally unused -- training-mode BN mean-subtraction
    # cancels any per-channel constant shift and leaves the variance unchanged.

    # validity mask over the padded output grid (rows with ypad >= H, plus tile padding,
    # are computed but excluded from BN statistics and discarded at the end).
    valid = (jnp.arange(hp) < h).astype(jnp.float32)                     # (H+2,)
    mask = jnp.broadcast_to(valid[None, :, None], (n, hp, wg)).reshape(rp)
    mask = jnp.pad(mask, (0, rows_pad - rp)).reshape(rows_pad, 1)        # (rows_pad, 1)

    # residual on the padded output grid (extra rows are don't-care zeros), lane-dense
    resid = jnp.pad(x_nhwc, ((0, 0), (0, 2), (0, 0), (0, 0))).reshape(rp, LANES)
    resid = jnp.pad(resid, ((0, rows_pad - rp), (0, 0)))                 # f32 (rows_pad, 128)

    # ---- pass 1: conv (3 bf16 MXU matmuls / tile, dy taps = halo slices) + masked stats ----
    def conv_stats_kernel(p_ref, w_ref, mask_ref, conv_ref, stats_ref):
        # p_ref: (T1+halo, 384) bf16; w_ref: (3, 384, 128) bf16; mask_ref: (T1, 1) f32
        acc = jnp.dot(p_ref[0:T1, :], w_ref[0],
                      preferred_element_type=jnp.float32)
        acc = acc + jnp.dot(p_ref[wg:wg + T1, :], w_ref[1],
                            preferred_element_type=jnp.float32)
        acc = acc + jnp.dot(p_ref[2 * wg:2 * wg + T1, :], w_ref[2],
                            preferred_element_type=jnp.float32)
        masked = acc * mask_ref[...]
        # TODO(synk): one-pass E[x^2]-mean^2 variance can cancel badly if |mean|>>std.
        stats_ref[0:1, :] = jnp.sum(masked, axis=0, keepdims=True)
        stats_ref[1:2, :] = jnp.sum(masked * acc, axis=0, keepdims=True)
        conv_ref[...] = acc.astype(conv_ref.dtype)

    conv_dense, stats = pl.pallas_call(
        conv_stats_kernel,
        out_shape=(jax.ShapeDtypeStruct((rows_pad, LANES), jnp.bfloat16),
                   jax.ShapeDtypeStruct((n_tiles1, 2, LANES), jnp.float32)),
        grid=(n_tiles1,),
        in_specs=[
            pl.BlockSpec((None, T1 + halo, kd), lambda i: (i, 0, 0)),
            pl.BlockSpec((3, kd, LANES), lambda i: (0, 0, 0)),
            pl.BlockSpec((T1, 1), lambda i: (i, 0)),
        ],
        out_specs=(
            pl.BlockSpec((T1, LANES), lambda i: (i, 0)),
            pl.BlockSpec((None, 2, LANES), lambda i: (i, 0, 0)),
        ),
        compiler_params=pltpu.CompilerParams(
            dimension_semantics=("parallel",),
            vmem_limit_bytes=VMEM_LIMIT),
    )(slab_tiles, w_dense, mask)

    # ---- finalize BN stats (32 channels; negligible) and fold into scale/shift ----
    m = n * h * w
    tot = stats.sum(axis=0)                                  # (2, 128)
    per_ch = tot.reshape(2, GROUP, cout).sum(axis=1)         # (2, 32)
    mean = per_ch[0] / m
    var = per_ch[1] / m - mean * mean                        # biased (training-mode) variance
    scale = gamma * jax.lax.rsqrt(var + BN_EPS)
    shift = beta - mean * scale
    affine = jnp.stack([jnp.tile(scale, GROUP), jnp.tile(shift, GROUP)], axis=0)  # (2, 128)

    # ---- pass 2: BN affine + residual + ReLU, lane-dense, 512-row tiles ----
    out_dense = pl.pallas_call(
        bn_resid_relu_kernel,
        out_shape=jax.ShapeDtypeStruct((rows_pad, LANES), jnp.float32),
        grid=(n_tiles2,),
        in_specs=[
            pl.BlockSpec((2, LANES), lambda i: (0, 0)),
            pl.BlockSpec((T2, LANES), lambda i: (i, 0)),
            pl.BlockSpec((T2, LANES), lambda i: (i, 0)),
        ],
        out_specs=pl.BlockSpec((T2, LANES), lambda i: (i, 0)),
        compiler_params=pltpu.CompilerParams(
            dimension_semantics=("parallel",),
            vmem_limit_bytes=VMEM_LIMIT),
    )(affine, conv_dense, resid)

    # drop tile padding and the invalid padded-grid rows, back to NCHW
    out = out_dense[:rp].reshape(n, hp, w, cout)[:, :h]
    return jnp.transpose(out.reshape(n, h, w, cout), (0, 3, 1, 2))


def ref_forward(x, w, b, gamma, beta):
    """Pure-JAX reference (f32, HIGHEST precision), mirrors PyTorch training-mode forward."""
    conv = jax.lax.conv_general_dilated(
        x, w, window_strides=(1, 1), padding=((1, 1), (1, 1)),
        dimension_numbers=("NCHW", "OIHW", "NCHW"),
        precision=jax.lax.Precision.HIGHEST,
    ) + b[None, :, None, None]
    mean = conv.mean(axis=(0, 2, 3), keepdims=True)
    var = ((conv - mean) ** 2).mean(axis=(0, 2, 3), keepdims=True)
    bn = (conv - mean) * jax.lax.rsqrt(var + BN_EPS)
    bn = bn * gamma[None, :, None, None] + beta[None, :, None, None]
    return jnp.maximum(bn + x, 0.0)


if __name__ == "__main__":
    # Residual add requires in_channels == 32 (same as the PyTorch module).
    N, C, H, W = 4, 32, 16, 16

    key = jax.random.PRNGKey(0)
    kx, kw, kb, kgam, kbet = jax.random.split(key, 5)
    x = jax.random.normal(kx, (N, C, H, W), jnp.float32)
    wgt = jax.random.normal(kw, (COUT, C, 3, 3), jnp.float32) * 0.1      # Conv2d weight
    b = jax.random.normal(kb, (COUT,), jnp.float32) * 0.1                # Conv2d bias
    gamma = 1.0 + 0.1 * jax.random.normal(kgam, (COUT,), jnp.float32)    # BN weight
    beta = 0.1 * jax.random.normal(kbet, (COUT,), jnp.float32)           # BN bias

    fwd = jax.jit(residual_block)
    out = jax.block_until_ready(fwd(x, wgt, b, gamma, beta))
    ref = jax.block_until_ready(ref_forward(x, wgt, b, gamma, beta))

    assert out.shape == (N, COUT, H, W)
    max_err = float(jnp.abs(out - ref).max())
    # Tolerance reflects the bf16 MXU fast path plus the bf16 conv_dense intermediate;
    # observed error stays well inside this bound after BN normalization.
    assert jnp.allclose(out, ref, atol=2e-2, rtol=2e-2), max_err
    print("KERNEL_OK")
</pallas_src>

<mosaic_0001>
module attributes {stable_mosaic.version = 11 : i64} {
  func.func @conv_stats_kernel(%arg0: i32, %arg1: memref<1x264x384xbf16, #tpu.memory_space<vmem>>, %arg2: memref<3x384x128xbf16, #tpu.memory_space<vmem>>, %arg3: memref<256x1xf32, #tpu.memory_space<vmem>>, %arg4: memref<256x128xbf16, #tpu.memory_space<vmem>>, %arg5: memref<1x2x128xf32, #tpu.memory_space<vmem>>) attributes {dimension_semantics = [#tpu.dimension_semantics<parallel>], iteration_bounds = array<i64: 2>, scalar_prefetch = 0 : i64, scratch_operands = 0 : i64, tpu.core_type = #tpu.core_type<tc>, window_params = [{transform_indices = @transform_0, window_bounds = array<i64: 1, 264, 384>}, {pipeline_mode = #tpu.pipeline_mode<synchronous>, transform_indices = @transform_1, window_bounds = array<i64: 3, 384, 128>}, {transform_indices = @transform_2, window_bounds = array<i64: 256, 1>}, {transform_indices = @transform_3, window_bounds = array<i64: 256, 128>}, {transform_indices = @transform_4, window_bounds = array<i64: 1, 2, 128>}]} {
    %c0 = arith.constant 0 : index
    %c0_0 = arith.constant 0 : index
    %c0_1 = arith.constant 0 : index
    %0 = vector.load %arg1[%c0, %c0_0, %c0_1] : memref<1x264x384xbf16, #tpu.memory_space<vmem>>, vector<1x256x384xbf16>
    %1 = vector.shape_cast %0 : vector<1x256x384xbf16> to vector<256x384xbf16>
    %c0_2 = arith.constant 0 : index
    %c0_3 = arith.constant 0 : index
    %c0_4 = arith.constant 0 : index
    %2 = vector.load %arg2[%c0_2, %c0_3, %c0_4] : memref<3x384x128xbf16, #tpu.memory_space<vmem>>, vector<1x384x128xbf16>
    %3 = vector.shape_cast %2 : vector<1x384x128xbf16> to vector<384x128xbf16>
    %cst = arith.constant dense<0.000000e+00> : vector<256x128xf32>
    %4 = tpu.matmul %1, %3, %cst {dimension_numbers = #tpu.dot_dimension_numbers<[1], [0], [0], [1], [0, 0, 1, 1], [], []>} : vector<256x384xbf16>, vector<384x128xbf16>, vector<256x128xf32> -> vector<256x128xf32>
    %c0_5 = arith.constant 0 : index
    %c4 = arith.constant 4 : index
    %c0_6 = arith.constant 0 : index
    %5 = vector.load %arg1[%c0_5, %c4, %c0_6] : memref<1x264x384xbf16, #tpu.memory_space<vmem>>, vector<1x256x384xbf16>
    %6 = vector.shape_cast %5 : vector<1x256x384xbf16> to vector<256x384xbf16>
    %c1 = arith.constant 1 : index
    %c0_7 = arith.constant 0 : index
    %c0_8 = arith.constant 0 : index
    %7 = vector.load %arg2[%c1, %c0_7, %c0_8] : memref<3x384x128xbf16, #tpu.memory_space<vmem>>, vector<1x384x128xbf16>
    %8 = vector.shape_cast %7 : vector<1x384x128xbf16> to vector<384x128xbf16>
    %cst_9 = arith.constant dense<0.000000e+00> : vector<256x128xf32>
    %9 = tpu.matmul %6, %8, %cst_9 {dimension_numbers = #tpu.dot_dimension_numbers<[1], [0], [0], [1], [0, 0, 1, 1], [], []>} : vector<256x384xbf16>, vector<384x128xbf16>, vector<256x128xf32> -> vector<256x128xf32>
    %10 = arith.addf %4, %9 : vector<256x128xf32>
    %c0_10 = arith.constant 0 : index
    %c8 = arith.constant 8 : index
    %c0_11 = arith.constant 0 : index
    %11 = vector.load %arg1[%c0_10, %c8, %c0_11] : memref<1x264x384xbf16, #tpu.memory_space<vmem>>, vector<1x256x384xbf16>
    %12 = vector.shape_cast %11 : vector<1x256x384xbf16> to vector<256x384xbf16>
    %c2 = arith.constant 2 : index
    %c0_12 = arith.constant 0 : index
    %c0_13 = arith.constant 0 : index
    %13 = vector.load %arg2[%c2, %c0_12, %c0_13] : memref<3x384x128xbf16, #tpu.memory_space<vmem>>, vector<1x384x128xbf16>
    %14 = vector.shape_cast %13 : vector<1x384x128xbf16> to vector<384x128xbf16>
    %cst_14 = arith.constant dense<0.000000e+00> : vector<256x128xf32>
    %15 = tpu.matmul %12, %14, %cst_14 {dimension_numbers = #tpu.dot_dimension_numbers<[1], [0], [0], [1], [0, 0, 1, 1], [], []>} : vector<256x384xbf16>, vector<384x128xbf16>, vector<256x128xf32> -> vector<256x128xf32>
    %16 = arith.addf %10, %15 : vector<256x128xf32>
    %c0_15 = arith.constant 0 : index
    %c0_16 = arith.constant 0 : index
    %17 = vector.load %arg3[%c0_15, %c0_16] : memref<256x1xf32, #tpu.memory_space<vmem>>, vector<256x1xf32>
    %18 = vector.broadcast %17 : vector<256x1xf32> to vector<256x128xf32>
    %19 = arith.mulf %16, %18 : vector<256x128xf32>
    %cst_17 = arith.constant dense<0.000000e+00> : vector<128xf32>
    %20 = vector.multi_reduction <add>, %19, %cst_17 [0] : vector<256x128xf32> to vector<128xf32>
    %21 = vector.shape_cast %20 : vector<128xf32> to vector<1x128xf32>
    %c0_18 = arith.constant 0 : index
    %c0_19 = arith.constant 0 : index
    %c0_20 = arith.constant 0 : index
    %22 = vector.load %arg5[%c0_18, %c0_19, %c0_20] : memref<1x2x128xf32, #tpu.memory_space<vmem>>, vector<1x1x128xf32>
    %23 = vector.shape_cast %22 : vector<1x1x128xf32> to vector<1x128xf32>
    %24 = vector.shape_cast %21 : vector<1x128xf32> to vector<1x1x128xf32>
    tpu.vector_store %arg5[%c0_18, %c0_19, %c0_20], %24 {strides = array<i32>} : memref<1x2x128xf32, #tpu.memory_space<vmem>>, vector<1x1x128xf32>,
    %25 = arith.mulf %19, %16 : vector<256x128xf32>
    %cst_21 = arith.constant dense<0.000000e+00> : vector<128xf32>
    %26 = vector.multi_reduction <add>, %25, %cst_21 [0] : vector<256x128xf32> to vector<128xf32>
    %27 = vector.shape_cast %26 : vector<128xf32> to vector<1x128xf32>
    %c0_22 = arith.constant 0 : index
    %c1_23 = arith.constant 1 : index
    %c0_24 = arith.constant 0 : index
    %28 = vector.load %arg5[%c0_22, %c1_23, %c0_24] : memref<1x2x128xf32, #tpu.memory_space<vmem>>, vector<1x1x128xf32>
    %29 = vector.shape_cast %28 : vector<1x1x128xf32> to vector<1x128xf32>
    %30 = vector.shape_cast %27 : vector<1x128xf32> to vector<1x1x128xf32>
    tpu.vector_store %arg5[%c0_22, %c1_23, %c0_24], %30 {strides = array<i32>} : memref<1x2x128xf32, #tpu.memory_space<vmem>>, vector<1x1x128xf32>,
    %31 = arith.truncf %16 : vector<256x128xf32> to vector<256x128xbf16>
    %c0_25 = arith.constant 0 : index
    %c0_26 = arith.constant 0 : index
    %32 = vector.load %arg4[%c0_25, %c0_26] : memref<256x128xbf16, #tpu.memory_space<vmem>>, vector<256x128xbf16>
    tpu.vector_store %arg4[%c0_25, %c0_26], %31 {strides = array<i32>} : memref<256x128xbf16, #tpu.memory_space<vmem>>, vector<256x128xbf16>,
    return
  }
  func.func @transform_0(%arg0: i32) -> (i32, i32, i32) {
    %c0_i32 = arith.constant 0 : i32
    %c0_i32_0 = arith.constant 0 : i32
    %c0_i32_1 = arith.constant 0 : i32
    return %arg0, %c0_i32, %c0_i32_0 : i32, i32, i32
  }
  func.func @transform_1(%arg0: i32) -> (i32, i32, i32) {
    %c0_i32 = arith.constant 0 : i32
    %c0_i32_0 = arith.constant 0 : i32
    %c0_i32_1 = arith.constant 0 : i32
    %c0_i32_2 = arith.constant 0 : i32
    return %c0_i32, %c0_i32_0, %c0_i32_1 : i32, i32, i32
  }
  func.func @transform_2(%arg0: i32) -> (i32, i32) {
    %c0_i32 = arith.constant 0 : i32
    %c0_i32_0 = arith.constant 0 : i32
    return %arg0, %c0_i32 : i32, i32
  }
  func.func @transform_3(%arg0: i32) -> (i32, i32) {
    %c0_i32 = arith.constant 0 : i32
    %c0_i32_0 = arith.constant 0 : i32
    return %arg0, %c0_i32 : i32, i32
  }
  func.func @transform_4(%arg0: i32) -> (i32, i32, i32) {
    %c0_i32 = arith.constant 0 : i32
    %c0_i32_0 = arith.constant 0 : i32
    %c0_i32_1 = arith.constant 0 : i32
    return %arg0, %c0_i32, %c0_i32_0 : i32, i32, i32
  }
}

module attributes {stable_mosaic.version = 11 : i64} {
  func.func @bn_resid_relu_kernel(%arg0: i32, %arg1: memref<2x128xf32, #tpu.memory_space<vmem>>, %arg2: memref<512x128xbf16, #tpu.memory_space<vmem>>, %arg3: memref<512x128xf32, #tpu.memory_space<vmem>>, %arg4: memref<512x128xf32, #tpu.memory_space<vmem>>) attributes {dimension_semantics = [#tpu.dimension_semantics<parallel>], iteration_bounds = array<i64: 1>, scalar_prefetch = 0 : i64, scratch_operands = 0 : i64, tpu.core_type = #tpu.core_type<tc>, window_params = [{pipeline_mode = #tpu.pipeline_mode<synchronous>, transform_indices = @transform_0, window_bounds = array<i64: 2, 128>}, {transform_indices = @transform_1, window_bounds = array<i64: 512, 128>}, {transform_indices = @transform_2, window_bounds = array<i64: 512, 128>}, {transform_indices = @transform_3, window_bounds = array<i64: 512, 128>}]} {
    %c0 = arith.constant 0 : index
    %c0_0 = arith.constant 0 : index
    %0 = vector.load %arg1[%c0, %c0_0] : memref<2x128xf32, #tpu.memory_space<vmem>>, vector<1x128xf32>
    %c1 = arith.constant 1 : index
    %c0_1 = arith.constant 0 : index
    %1 = vector.load %arg1[%c1, %c0_1] : memref<2x128xf32, #tpu.memory_space<vmem>>, vector<1x128xf32>
    %c0_2 = arith.constant 0 : index
    %c0_3 = arith.constant 0 : index
    %2 = vector.load %arg2[%c0_2, %c0_3] : memref<512x128xbf16, #tpu.memory_space<vmem>>, vector<512x128xbf16>
    %3 = arith.extf %2 : vector<512x128xbf16> to vector<512x128xf32>
    %4 = vector.broadcast %0 : vector<1x128xf32> to vector<512x128xf32>
    %5 = arith.mulf %3, %4 : vector<512x128xf32>
    %6 = vector.broadcast %1 : vector<1x128xf32> to vector<512x128xf32>
    %7 = arith.addf %5, %6 : vector<512x128xf32>
    %c0_4 = arith.constant 0 : index
    %c0_5 = arith.constant 0 : index
    %8 = vector.load %arg3[%c0_4, %c0_5] : memref<512x128xf32, #tpu.memory_space<vmem>>, vector<512x128xf32>
    %9 = arith.addf %7, %8 : vector<512x128xf32>
    %cst = arith.constant 0.000000e+00 : f32
    %10 = vector.broadcast %cst : f32 to vector<512x128xf32>
    %11 = arith.maximumf %9, %10 : vector<512x128xf32>
    %c0_6 = arith.constant 0 : index
    %c0_7 = arith.constant 0 : index
    %12 = vector.load %arg4[%c0_6, %c0_7] : memref<512x128xf32, #tpu.memory_space<vmem>>, vector<512x128xf32>
    tpu.vector_store %arg4[%c0_6, %c0_7], %11 {strides = array<i32>} : memref<512x128xf32, #tpu.memory_space<vmem>>, vector<512x128xf32>,
    return
  }
  func.func @transform_0(%arg0: i32) -> (i32, i32) {
    %c0_i32 = arith.constant 0 : i32
    %c0_i32_0 = arith.constant 0 : i32
    %c0_i32_1 = arith.constant 0 : i32
    return %c0_i32, %c0_i32_0 : i32, i32
  }
  func.func @transform_1(%arg0: i32) -> (i32, i32) {
    %c0_i32 = arith.constant 0 : i32
    %c0_i32_0 = arith.constant 0 : i32
    return %arg0, %c0_i32 : i32, i32
  }
  func.func @transform_2(%arg0: i32) -> (i32, i32) {
    %c0_i32 = arith.constant 0 : i32
    %c0_i32_0 = arith.constant 0 : i32
    return %arg0, %c0_i32 : i32, i32
  }
  func.func @transform_3(%arg0: i32) -> (i32, i32) {
    %c0_i32 = arith.constant 0 : i32
    %c0_i32_0 = arith.constant 0 : i32
    return %arg0, %c0_i32 : i32, i32
  }
}

</mosaic_0001>

<bundles_post_ra>
// kernel: mul.4
= control target key start
LH: loop header
LB: loop body
LE: loop exit
PB: predicated region body
PF: predicated region fallthrough
CT: control target
= control target key end

     0   :  { %vm163_vm0 = vcmask 1047556   ;;  %s352_s10 = smov 64   ;;  %vm165_vm1 = vcmask 261120   ;;  %s353_s14 = smov 32   ;;  %vm202_vm2 = vcmask 785920   ;;  %vm245_vm3 = vcmask 523520   ;;  %s516_s0 = inlined_call_operand.vmem [shape: f32[1,3,32,32], index: 0, kind: input, shape index: {}]   ;;  %s517_s1 = inlined_call_operand.vmem [shape: f32[96,32], index: 1, kind: output, shape index: {}]  }
   0x1   :  { %v334_v0 = vld [vmem:[%s516_s0 + $0x1c] sm:$0xf]  ;;  %v335_v1 = vld [vmem:[%s516_s0 + $0x18] sm:$0xf]  ;;  %v336_v2 = vld [vmem:[%s516_s0 + $0x14] sm:$0xf] }
   0x2   :  { %129 = vst [vmem:[#allocation0 + $0x38] sm:$0xf] %v334_v0  ;;  %134 = vst [vmem:[#allocation0 + $0x30] sm:$0xf] %v335_v1  ;;  %v337_v3 = vld [vmem:[%s516_s0 + $0x10] sm:$0xf] }
   0x3   :  { %139 = vst [vmem:[#allocation0 + $0x28] sm:$0xf] %v336_v2  ;;  %v338_v4 = vld [vmem:[%s516_s0 + $0xc] sm:$0xf]  ;;  %v339_v5 = vld [vmem:[%s516_s0 + $0x8] sm:$0xf] }
   0x4   :  { %144 = vst [vmem:[#allocation0 + $0x20] sm:$0xf] %v337_v3  ;;  %149 = vst [vmem:[#allocation0 + $0x18] sm:$0xf] %v338_v4  ;;  %v340_v6 = vld [vmem:[%s516_s0 + $0x4] sm:$0xf] }
   0x5   :  { %154 = vst [vmem:[#allocation0 + $0x10] sm:$0xf] %v339_v5  ;;  %v159_v7 = vld [vmem:[%s516_s0] sm:$0xf]  ;;  %158 = vst [vmem:[#allocation0 + $0x8] sm:$0xf] %v340_v6 }
   0x6   :  { %160 = vst [vmem:[#allocation0] sm:$0xf] %v159_v7  ;;  %v318_v8 = vld [vmem:[%s516_s0 + $0x5c] sm:$0xf]  ;;  %v319_v9 = vld [vmem:[%s516_s0 + $0x58] sm:$0xf] }
   0x7   :  { %v320_v10 = vld [vmem:[%s516_s0 + $0x54] sm:$0xf]  ;;  %49 = vst [vmem:[#allocation0 + $0xb8] sm:$0xf] %v318_v8  ;;  %54 = vst [vmem:[#allocation0 + $0xb0] sm:$0xf] %v319_v9 }
   0x8   :  { %59 = vst [vmem:[#allocation0 + $0xa8] sm:$0xf] %v320_v10  ;;  %v321_v11 = vld [vmem:[%s516_s0 + $0x50] sm:$0xf]  ;;  %v322_v12 = vld [vmem:[%s516_s0 + $0x4c] sm:$0xf] }
   0x9   :  { %v323_v13 = vld [vmem:[%s516_s0 + $0x48] sm:$0xf]  ;;  %64 = vst [vmem:[#allocation0 + $0xa0] sm:$0xf] %v321_v11  ;;  %69 = vst [vmem:[#allocation0 + $0x98] sm:$0xf] %v322_v12 }
   0xa   :  { %74 = vst [vmem:[#allocation0 + $0x90] sm:$0xf] %v323_v13  ;;  %v324_v14 = vld [vmem:[%s516_s0 + $0x44] sm:$0xf]  ;;  %v325_v15 = vld [vmem:[%s516_s0 + $0x40] sm:$0xf] }
   0xb   :  { %v326_v16 = vld [vmem:[%s516_s0 + $0x3c] sm:$0xf]  ;;  %79 = vst [vmem:[#allocation0 + $0x88] sm:$0xf] %v324_v14  ;;  %84 = vst [vmem:[#allocation0 + $0x80] sm:$0xf] %v325_v15 }
   0xc   :  { %89 = vst [vmem:[#allocation0 + $0x78] sm:$0xf] %v326_v16  ;;  %v327_v17 = vld [vmem:[%s516_s0 + $0x38] sm:$0xf]  ;;  %v328_v18 = vld [vmem:[%s516_s0 + $0x34] sm:$0xf] }
   0xd   :  { %v329_v19 = vld [vmem:[%s516_s0 + $0x30] sm:$0xf]  ;;  %94 = vst [vmem:[#allocation0 + $0x70] sm:$0xf] %v327_v17  ;;  %99 = vst [vmem:[#allocation0 + $0x68] sm:$0xf] %v328_v18 }
   0xe   :  { %104 = vst [vmem:[#allocation0 + $0x60] sm:$0xf] %v329_v19  ;;  %v330_v20 = vld [vmem:[%s516_s0 + $0x2c] sm:$0xf]  ;;  %v331_v21 = vld [vmem:[%s516_s0 + $0x28] sm:$0xf] }
   0xf   :  { %v332_v22 = vld [vmem:[%s516_s0 + $0x24] sm:$0xf]  ;;  %109 = vst [vmem:[#allocation0 + $0x58] sm:$0xf] %v330_v20  ;;  %114 = vst [vmem:[#allocation0 + $0x50] sm:$0xf] %v331_v21 }
  0x10   :  { %119 = vst [vmem:[#allocation0 + $0x48] sm:$0xf] %v332_v22  ;;  %v333_v23 = vld [vmem:[%s516_s0 + $0x20] sm:$0xf]  ;;  %v310_v24 = vld [vmem:[%s516_s0 + $0x7c] sm:$0xf] }
  0x11   :  { %v311_v25 = vld [vmem:[%s516_s0 + $0x78] sm:$0xf]  ;;  %124 = vst [vmem:[#allocation0 + $0x40] sm:$0xf] %v333_v23  ;;  %9 = vst [vmem:[#allocation0 + $0xf8] sm:$0xf] %v310_v24 }
  0x12   :  { %v197_v26 = vld [vmem:[#allocation0 + $0x2] ss:$8 sm:$0xf0]   ;;  %14 = vst [vmem:[#allocation0 + $0xf0] sm:$0xf] %v311_v25 }
  0x13   :  { %v312_v27 = vld [vmem:[%s516_s0 + $0x74] sm:$0xf]  ;;  %v195_v28 = vld [vmem:[#allocation0 + $0x2] ss:$8 sm:$0xf]  }
  0x14   :  { %19 = vst [vmem:[#allocation0 + $0xe8] sm:$0xf] %v312_v27  ;;  %v313_v29 = vld [vmem:[%s516_s0 + $0x70] sm:$0xf]  ;;  %v199_v30 = vsel %vm163_vm0, %v197_v26, %v195_v28  ;;  %v314_v31 = vld [vmem:[%s516_s0 + $0x6c] sm:$0xf] }
  0x15   :  { %24 = vst [vmem:[#allocation0 + $0xe0] sm:$0xf] %v313_v29  ;;  %v315_v32 = vld [vmem:[%s516_s0 + $0x68] sm:$0xf]  ;;  %v316_v33 = vld [vmem:[%s516_s0 + $0x64] sm:$0xf]  ;;  %200 = vrot.lane.b32.xlu0 %v199_v30, %s352_s10 }
  0x16   :  { %v218_v34 = vld [vmem:[#allocation0 + $0x82] ss:$8 sm:$0xf0]   ;;  %29 = vst [vmem:[#allocation0 + $0xd8] sm:$0xf] %v314_v31 }
  0x17   :  { %34 = vst [vmem:[#allocation0 + $0xd0] sm:$0xf] %v315_v32  ;;  %39 = vst [vmem:[#allocation0 + $0xc8] sm:$0xf] %v316_v33  ;;  %v317_v35 = vld [vmem:[%s516_s0 + $0x60] sm:$0xf] }
  0x18   :  { %v216_v36 = vld [vmem:[#allocation0 + $0x82] ss:$8 sm:$0xf]   ;;  %44 = vst [vmem:[#allocation0 + $0xc0] sm:$0xf] %v317_v35 }
  0x19   :  { %v220_v37 = vsel %vm163_vm0, %v218_v34, %v216_v36  ;;  %v207_v38 = vld [vmem:[#allocation0 + $0x42] ss:$8 sm:$0xf0]   ;;  %v238_v39 = vld [vmem:[#allocation0 + $0x1] ss:$8 sm:$0xf]  }
  0x1a   :  { %221 = vrot.lane.b32.xlu1 %v220_v37, %s352_s10  ;;  %v205_v40 = vld [vmem:[#allocation0 + $0x42] ss:$8 sm:$0xf]   ;;  %v240_v41 = vld [vmem:[#allocation0 + $0x1] ss:$8 sm:$0xf0]  }
  0x1b   :  { %v209_v42 = vsel %vm163_vm0, %v207_v38, %v205_v40  ;;  %v161_v43 = vld [vmem:[#allocation0] ss:$8 sm:$0xf]   ;;  %v248_v45 = vld [vmem:[#allocation0 + $0x41] ss:$8 sm:$0xf]   ;;  %v242_v48 = vsel %vm163_vm0, %v240_v41, %v238_v39 }
  0x1c   :  { %210 = vrot.lane.b32.xlu0 %v209_v42, %s352_s10  ;;  %v229_v44 = vld [vmem:[#allocation0 + $0xc2] ss:$8 sm:$0xf0]   ;;  %v250_v46 = vld [vmem:[#allocation0 + $0x41] ss:$8 sm:$0xf0]  }
  0x1d   :  { %v259_v47 = vld [vmem:[#allocation0 + $0x81] ss:$8 sm:$0xf]   ;;  %v162_v49 = vld [vmem:[#allocation0] ss:$8 sm:$0xf0]   ;;  %v252_v60 = vsel %vm163_vm0, %v250_v46, %v248_v45 }
  0x1e   :  { %v177_v50 = vld [vmem:[#allocation0 + $0x80] ss:$8 sm:$0xf]   ;;  %v261_v52 = vld [vmem:[#allocation0 + $0x81] ss:$8 sm:$0xf0]   ;;  %v164_v53 = vsel %vm163_vm0, %v162_v49, %v161_v43 }
  0x1f   :  { %v227_v51 = vld [vmem:[#allocation0 + $0xc2] ss:$8 sm:$0xf]   ;;  %166 = vst.msk [vmem:[%s517_s1] sm:$0xff] %vm165_vm1, %v164_v53   ;;  %v263_v61 = vsel %vm163_vm0, %v261_v52, %v259_v47 }
  0x20   :  { %v231_v54 = vsel %vm163_vm0, %v229_v44, %v227_v51  ;;  %v179_v55 = vld [vmem:[#allocation0 + $0x80] ss:$8 sm:$0xf0]   ;;  %243 = vrot.lane.b32.xlu0 %v242_v48, %s353_s14  ;;  %v270_v0 = vld [vmem:[#allocation0 + $0xc1] ss:$8 sm:$0xf]  }
  0x21   :  { %v168_v56 = vld [vmem:[#allocation0 + $0x40] ss:$8 sm:$0xf]   ;;  %232 = vrot.lane.b32.xlu1 %v231_v54, %s352_s10  ;;  %v181_v57 = vsel %vm163_vm0, %v179_v55, %v177_v50  ;;  %v272_v1 = vld [vmem:[#allocation0 + $0xc1] ss:$8 sm:$0xf0]  }
  0x22   :  { %v170_v58 = vld [vmem:[#allocation0 + $0x40] ss:$8 sm:$0xf0]   ;;  %342 = vst.msk [vmem:[%s517_s1 + $0x10] sm:$0xff] %vm165_vm1, %v181_v57   ;;  %v274_v3 = vsel %vm163_vm0, %v272_v1, %v270_v0 }
  0x23   :  { %v186_v59 = vld [vmem:[#allocation0 + $0xc0] ss:$8 sm:$0xf]   ;;  %v172_v62 = vsel %vm163_vm0, %v170_v58, %v168_v56 }
  0x24   :  { %v188_v63 = vld [vmem:[#allocation0 + $0xc0] ss:$8 sm:$0xf0]   ;;  %341 = vst.msk [vmem:[%s517_s1 + $0x8] sm:$0xff] %vm165_vm1, %v172_v62   ;;  %264 = vrot.lane.b32.xlu0 %v263_v61, %s353_s14 }
  0x25   :  { %v190_v2 = vsel %vm163_vm0, %v188_v63, %v186_v59  ;;  %253 = vrot.lane.b32.xlu1 %v252_v60, %s353_s14 }
  0x26   :  { %343 = vst.msk [vmem:[%s517_s1 + $0x18] sm:$0xff] %vm165_vm1, %v190_v2  }
  0x29   :  { %275 = vrot.lane.b32.xlu1 %v274_v3, %s353_s14 }
  0x87   :  { %v201_v4 = vpop.permute.xlu0 %200  }
  0x88   :  { %203 = vst.msk [vmem:[%s517_s1] sm:$0xff] %vm202_vm2, %v201_v4  }
  0x8c   :  { %v222_v5 = vpop.permute.xlu1 %221  }
  0x8d   :  { %345 = vst.msk [vmem:[%s517_s1 + $0x10] sm:$0xff] %vm202_vm2, %v222_v5  }
  0x8e   :  { %v211_v6 = vpop.permute.xlu0 %210  }
  0x8f   :  { %344 = vst.msk [vmem:[%s517_s1 + $0x8] sm:$0xff] %vm202_vm2, %v211_v6  }
  0x92   :  { %v244_v8 = vpop.permute.xlu0 %243  }
  0x93   :  { %v233_v7 = vpop.permute.xlu1 %232   ;;  %246 = vst.msk [vmem:[%s517_s1] sm:$0xff] %vm245_vm3, %v244_v8  }
  0x94   :  { %346 = vst.msk [vmem:[%s517_s1 + $0x18] sm:$0xff] %vm202_vm2, %v233_v7  }
  0x96   :  { %v265_v10 = vpop.permute.xlu0 %264  }
  0x97   :  { %v254_v9 = vpop.permute.xlu1 %253   ;;  %348 = vst.msk [vmem:[%s517_s1 + $0x10] sm:$0xff] %vm245_vm3, %v265_v10  }
  0x98   :  { %347 = vst.msk [vmem:[%s517_s1 + $0x8] sm:$0xff] %vm245_vm3, %v254_v9  }
  0x9b   :  { %v276_v11 = vpop.permute.xlu1 %275  }
  0x9c   :  { %349 = vst.msk [vmem:[%s517_s1 + $0x18] sm:$0xff] %vm245_vm3, %v276_v11  }

// kernel: tile.17
= control target key start
LH: loop header
LB: loop body
LE: loop exit
PB: predicated region body
PF: predicated region fallthrough
CT: control target
= control target key end

     0   :  { %s22_s0 = inlined_call_operand.vmem [shape: f32[32], index: 0, kind: input, shape index: {}]   ;;  %s23_s1 = inlined_call_operand.vmem [shape: f32[4,32], index: 1, kind: output, shape index: {}]  }
   0x1   :  { %v4_v0 = vld [vmem:[%s22_s0] ss:$0 sm:$0xff] }
   0x2   :  { %5 = vst [vmem:[%s23_s1] sm:$0xf] %v4_v0 }

// kernel: tile.19
= control target key start
LH: loop header
LB: loop body
LE: loop exit
PB: predicated region body
PF: predicated region fallthrough
CT: control target
= control target key end

     0   :  { %vm8_vm0 = vcmask 261120   ;;  %s40_s8 = smov 32   ;;  %s41_s9 = smov 64   ;;  %vm14_vm1 = vcmask 1048320   ;;  %vm20_vm2 = vcmask 785920   ;;  %vm26_vm3 = vcmask 523520   ;;  %s58_s0 = inlined_call_operand.vmem [shape: f32[4,32], index: 0, kind: input, shape index: {}]   ;;  %s59_s1 = inlined_call_operand.vmem [shape: f32[1,128], index: 1, kind: output, shape index: {}]  }
   0x1   :  { %v5_v0 = vld [vmem:[%s58_s0] sm:$0xf]  ;;  %s39_s0 = smov 96  }
   0x2   :  { %6 = vst [vmem:[#allocation1] sm:$0xf] %v5_v0 }
   0x9   :  { %v11_v1 = vld [vmem:[#allocation1 + $0x3] sm:$0x1]   ;;  %v23_v2 = vld [vmem:[#allocation1 + $0x1] sm:$0x1]   ;;  %v7_v3 = vld [vmem:[#allocation1] sm:$0x1]  }
   0xa   :  { %12 = vrot.lane.b32.xlu0 %v11_v1, %s39_s0  ;;  %24 = vrot.lane.b32.xlu1 %v23_v2, %s40_s8  ;;  %v17_v4 = vld [vmem:[#allocation1 + $0x2] sm:$0x1]   ;;  %9 = vst.msk [vmem:[#allocation0] sm:$0x1] %vm8_vm0, %v7_v3  }
   0xe   :  { %18 = vrot.lane.b32.xlu0 %v17_v4, %s41_s9 }
  0x7c   :  { %v13_v5 = vpop.permute.xlu0 %12   ;;  %v25_v6 = vpop.permute.xlu1 %24  }
  0x7d   :  { %15 = vst.msk [vmem:[#allocation0] sm:$0x1] %vm14_vm1, %v13_v5  }
  0x80   :  { %v19_v7 = vpop.permute.xlu0 %18  }
  0x81   :  { %21 = vst.msk [vmem:[#allocation0] sm:$0x1] %vm20_vm2, %v19_v7  }
  0x82   :  { %27 = vst.msk [vmem:[#allocation0] sm:$0x1] %vm26_vm3, %v25_v6  }
  0x89   :  { %v32_v8 = vld [vmem:[#allocation0] sm:$0x1] }
  0x8a   :  { %35 = vst [vmem:[%s59_s1] sm:$0x1] %v32_v8 }

// kernel: residual_block.3
= control target key start
LH: loop header
LB: loop body
LE: loop exit
PB: predicated region body
PF: predicated region fallthrough
CT: control target
= control target key end

     0   :  { %s1339_s0 = inlined_call_operand.vmem [shape: f32[2,128], index: 0, kind: input, shape index: {}]   ;;  %s1340_s1 = inlined_call_operand.vmem [shape: bf16[512,128], index: 1, kind: input, shape index: {}]   ;;  %s1341_s2 = inlined_call_operand.vmem [shape: f32[512,128], index: 2, kind: input, shape index: {}]   ;;  %s1342_s3 = inlined_call_operand.vmem [shape: f32[512,128], index: 3, kind: output, shape index: {}]  }
   0x1   :  { %v724_v0 = vld [vmem:[%s1339_s0] ss:$0 sm:$0xff]  ;;  %v670_v4 = vld [vmem:[%s1340_s1 + $0x8] sm:$0xff]   ;;  %v735_v5 = vld [vmem:[%s1339_s0 + $0x1] ss:$0 sm:$0xff] }
   0x2   :  { %v543_v1 = vld [vmem:[%s1340_s1] sm:$0xff]   ;;  %v548_v6 = vunpack.c.l.bf16 %v670_v4  ;;  %v549_v7 = vunpack.c.h.bf16 %v670_v4  ;;  %v671_v8 = vld [vmem:[%s1340_s1 + $0x10] sm:$0xff]   ;;  %v672_v13 = vld [vmem:[%s1340_s1 + $0x18] sm:$0xff]  }
   0x3   :  { %v544_v2 = vunpack.c.l.bf16 %v543_v1  ;;  %v545_v3 = vunpack.c.h.bf16 %v543_v1  ;;  %v552_v11 = vunpack.c.l.bf16 %v671_v8  ;;  %v553_v12 = vunpack.c.h.bf16 %v671_v8  ;;  %v280_v14 = vld [vmem:[%s1341_s2] sm:$0xff]  ;;  %v281_v15 = vld [vmem:[%s1341_s2 + $0x8] sm:$0xff]  ;;  %v282_v22 = vld [vmem:[%s1341_s2 + $0x10] sm:$0xff] }
   0x4   :  { %v150_v16 = vmul.f32 %v548_v6, %v724_v0  ;;  %v151_v17 = vmul.f32 %v549_v7, %v724_v0  ;;  %v556_v18 = vunpack.c.l.bf16 %v672_v13  ;;  %v557_v19 = vunpack.c.h.bf16 %v672_v13  ;;  %v283_v23 = vld [vmem:[%s1341_s2 + $0x18] sm:$0xff]  ;;  %v284_v28 = vld [vmem:[%s1341_s2 + $0x20] sm:$0xff]  ;;  %v285_v29 = vld [vmem:[%s1341_s2 + $0x28] sm:$0xff] }
   0x5   :  { %v148_v9 = vmul.f32 %v544_v2, %v724_v0  ;;  %v149_v10 = vmul.f32 %v545_v3, %v724_v0  ;;  %v152_v24 = vmul.f32 %v552_v11, %v724_v0  ;;  %v153_v25 = vmul.f32 %v553_v12, %v724_v0  ;;  %v286_v36 = vld [vmem:[%s1341_s2 + $0x30] sm:$0xff]  ;;  %v287_v37 = vld [vmem:[%s1341_s2 + $0x38] sm:$0xff]  ;;  %v673_v42 = vld [vmem:[%s1340_s1 + $0x20] sm:$0xff]  }
   0x6   :  { %v218_v26 = vadd.f32 %v735_v5, %v150_v16  ;;  %v219_v27 = vadd.f32 %v735_v5, %v151_v17  ;;  %v154_v30 = vmul.f32 %v556_v18, %v724_v0  ;;  %v155_v31 = vmul.f32 %v557_v19, %v724_v0  ;;  %v674_v47 = vld [vmem:[%s1340_s1 + $0x28] sm:$0xff]   ;;  %v675_v52 = vld [vmem:[%s1340_s1 + $0x30] sm:$0xff]   ;;  %v676_v57 = vld [vmem:[%s1340_s1 + $0x38] sm:$0xff]  }
   0x7   :  { %v216_v20 = vadd.f32 %v735_v5, %v148_v9  ;;  %v217_v21 = vadd.f32 %v735_v5, %v149_v10  ;;  %v220_v34 = vadd.f32 %v735_v5, %v152_v24  ;;  %v221_v35 = vadd.f32 %v735_v5, %v153_v25  ;;  %v288_v3 = vld [vmem:[%s1341_s2 + $0x40] sm:$0xff]  ;;  %v289_v4 = vld [vmem:[%s1341_s2 + $0x48] sm:$0xff]  ;;  %v290_v12 = vld [vmem:[%s1341_s2 + $0x50] sm:$0xff] }
   0x8   :  { %v346_v38 = vadd.f32 %v282_v22, %v218_v26  ;;  %v347_v39 = vadd.f32 %v283_v23, %v219_v27  ;;  %v222_v40 = vadd.f32 %v735_v5, %v154_v30  ;;  %v223_v41 = vadd.f32 %v735_v5, %v155_v31  ;;  %v291_v13 = vld [vmem:[%s1341_s2 + $0x58] sm:$0xff]  ;;  %v292_v18 = vld [vmem:[%s1341_s2 + $0x60] sm:$0xff]  ;;  %v293_v19 = vld [vmem:[%s1341_s2 + $0x68] sm:$0xff] }
   0x9   :  { %v344_v32 = vadd.f32 %v280_v14, %v216_v20  ;;  %v345_v33 = vadd.f32 %v281_v15, %v217_v21  ;;  %v348_v45 = vadd.f32 %v284_v28, %v220_v34  ;;  %v349_v46 = vadd.f32 %v285_v29, %v221_v35  ;;  %v294_v26 = vld [vmem:[%s1341_s2 + $0x70] sm:$0xff]  ;;  %v295_v27 = vld [vmem:[%s1341_s2 + $0x78] sm:$0xff] }
   0xa   :  { %v410_v48 = vmax.f32 %v346_v38, 0.0  ;;  %v411_v49 = vmax.f32 %v347_v39, 0.0  ;;  %v350_v50 = vadd.f32 %v286_v36, %v222_v40  ;;  %v351_v51 = vadd.f32 %v287_v37, %v223_v41  ;;  %v678_v37 = vld [vmem:[%s1340_s1 + $0x48] sm:$0xff]  }
   0xb   :  { %v408_v43 = vmax.f32 %v344_v32, 0.0  ;;  %v409_v44 = vmax.f32 %v345_v33, 0.0  ;;  %v412_v53 = vmax.f32 %v348_v45, 0.0  ;;  %v413_v54 = vmax.f32 %v349_v46, 0.0  ;;  %v677_v32 = vld [vmem:[%s1340_s1 + $0x40] sm:$0xff]  }
   0xc   :  { %v560_v55 = vunpack.c.l.bf16 %v673_v42  ;;  %v561_v56 = vunpack.c.h.bf16 %v673_v42  ;;  %474 = vst [vmem:[%s1342_s3 + $0x10] sm:$0xff] %v410_v48  ;;  %475 = vst [vmem:[%s1342_s3 + $0x18] sm:$0xff] %v411_v49  ;;  %v414_v58 = vmax.f32 %v350_v50, 0.0  ;;  %v415_v59 = vmax.f32 %v351_v51, 0.0  ;;  %v679_v42 = vld [vmem:[%s1340_s1 + $0x50] sm:$0xff]  }
   0xd   :  { %472 = vst [vmem:[%s1342_s3] sm:$0xff] %v408_v43  ;;  %473 = vst [vmem:[%s1342_s3 + $0x8] sm:$0xff] %v409_v44  ;;  %v564_v60 = vunpack.c.l.bf16 %v674_v47  ;;  %v565_v61 = vunpack.c.h.bf16 %v674_v47  ;;  %v568_v1 = vunpack.c.l.bf16 %v675_v52  ;;  %v569_v2 = vunpack.c.h.bf16 %v675_v52  ;;  %v680_v47 = vld [vmem:[%s1340_s1 + $0x58] sm:$0xff]  }
   0xe   :  { %476 = vst [vmem:[%s1342_s3 + $0x20] sm:$0xff] %v412_v53  ;;  %477 = vst [vmem:[%s1342_s3 + $0x28] sm:$0xff] %v413_v54  ;;  %v156_v62 = vmul.f32 %v560_v55, %v724_v0  ;;  %v157_v63 = vmul.f32 %v561_v56, %v724_v0  ;;  %v572_v8 = vunpack.c.l.bf16 %v676_v57  ;;  %v573_v9 = vunpack.c.h.bf16 %v676_v57  ;;  %v296_v56 = vld [vmem:[%s1341_s2 + $0x80] sm:$0xff]  ;;  %v297_v57 = vld [vmem:[%s1341_s2 + $0x88] sm:$0xff] }
   0xf   :  { %478 = vst [vmem:[%s1342_s3 + $0x30] sm:$0xff] %v414_v58  ;;  %479 = vst [vmem:[%s1342_s3 + $0x38] sm:$0xff] %v415_v59  ;;  %v158_v6 = vmul.f32 %v564_v60, %v724_v0  ;;  %v159_v7 = vmul.f32 %v565_v61, %v724_v0  ;;  %v160_v14 = vmul.f32 %v568_v1, %v724_v0  ;;  %v576_v45 = vunpack.c.l.bf16 %v677_v32  ;;  %v298_v1 = vld [vmem:[%s1341_s2 + $0x90] sm:$0xff] }
  0x10   :  { %v224_v10 = vadd.f32 %v735_v5, %v156_v62  ;;  %v225_v11 = vadd.f32 %v735_v5, %v157_v63  ;;  %v161_v15 = vmul.f32 %v569_v2, %v724_v0  ;;  %v162_v20 = vmul.f32 %v572_v8, %v724_v0  ;;  %v299_v2 = vld [vmem:[%s1341_s2 + $0x98] sm:$0xff]  ;;  %v300_v8 = vld [vmem:[%s1341_s2 + $0xa0] sm:$0xff] }
  0x11   :  { %v226_v16 = vadd.f32 %v735_v5, %v158_v6  ;;  %v227_v17 = vadd.f32 %v735_v5, %v159_v7  ;;  %v163_v21 = vmul.f32 %v573_v9, %v724_v0  ;;  %v228_v24 = vadd.f32 %v735_v5, %v160_v14  ;;  %v301_v9 = vld [vmem:[%s1341_s2 + $0xa8] sm:$0xff] }
  0x12   :  { %v352_v22 = vadd.f32 %v288_v3, %v224_v10  ;;  %v353_v23 = vadd.f32 %v289_v4, %v225_v11  ;;  %v229_v25 = vadd.f32 %v735_v5, %v161_v15  ;;  %v230_v30 = vadd.f32 %v735_v5, %v162_v20 }
  0x13   :  { %v354_v28 = vadd.f32 %v290_v12, %v226_v16  ;;  %v355_v29 = vadd.f32 %v291_v13, %v227_v17  ;;  %v231_v31 = vadd.f32 %v735_v5, %v163_v21  ;;  %v356_v35 = vadd.f32 %v292_v18, %v228_v24  ;;  %v302_v16 = vld [vmem:[%s1341_s2 + $0xb0] sm:$0xff]  ;;  %v303_v17 = vld [vmem:[%s1341_s2 + $0xb8] sm:$0xff] }
  0x14   :  { %v416_v33 = vmax.f32 %v352_v22, 0.0  ;;  %v417_v34 = vmax.f32 %v353_v23, 0.0  ;;  %v357_v36 = vadd.f32 %v293_v19, %v229_v25  ;;  %v358_v40 = vadd.f32 %v294_v26, %v230_v30  ;;  %v681_v22 = vld [vmem:[%s1340_s1 + $0x60] sm:$0xff]  }
  0x15   :  { %v418_v38 = vmax.f32 %v354_v28, 0.0  ;;  %v419_v39 = vmax.f32 %v355_v29, 0.0  ;;  %v359_v41 = vadd.f32 %v295_v27, %v231_v31  ;;  %v420_v43 = vmax.f32 %v356_v35, 0.0  ;;  %v682_v27 = vld [vmem:[%s1340_s1 + $0x68] sm:$0xff]  }
  0x16   :  { %480 = vst [vmem:[%s1342_s3 + $0x40] sm:$0xff] %v416_v33  ;;  %481 = vst [vmem:[%s1342_s3 + $0x48] sm:$0xff] %v417_v34  ;;  %v421_v44 = vmax.f32 %v357_v36, 0.0  ;;  %v577_v46 = vunpack.c.h.bf16 %v677_v32  ;;  %v422_v48 = vmax.f32 %v358_v40, 0.0  ;;  %v580_v50 = vunpack.c.l.bf16 %v678_v37  ;;  %v683_v32 = vld [vmem:[%s1340_s1 + $0x70] sm:$0xff]  }
  0x17   :  { %482 = vst [vmem:[%s1342_s3 + $0x50] sm:$0xff] %v418_v38  ;;  %483 = vst [vmem:[%s1342_s3 + $0x58] sm:$0xff] %v419_v39  ;;  %v423_v49 = vmax.f32 %v359_v41, 0.0  ;;  %v581_v51 = vunpack.c.h.bf16 %v678_v37  ;;  %v164_v52 = vmul.f32 %v576_v45, %v724_v0  ;;  %v584_v54 = vunpack.c.l.bf16 %v679_v42  ;;  %v684_v37 = vld [vmem:[%s1340_s1 + $0x78] sm:$0xff]  }
  0x18   :  { %484 = vst [vmem:[%s1342_s3 + $0x60] sm:$0xff] %v420_v43  ;;  %485 = vst [vmem:[%s1342_s3 + $0x68] sm:$0xff] %v421_v44  ;;  %v165_v53 = vmul.f32 %v577_v46, %v724_v0  ;;  %v585_v55 = vunpack.c.h.bf16 %v679_v42  ;;  %v166_v58 = vmul.f32 %v580_v50, %v724_v0  ;;  %v588_v60 = vunpack.c.l.bf16 %v680_v47  ;;  %v304_v46 = vld [vmem:[%s1341_s2 + $0xc0] sm:$0xff] }
  0x19   :  { %486 = vst [vmem:[%s1342_s3 + $0x70] sm:$0xff] %v422_v48  ;;  %487 = vst [vmem:[%s1342_s3 + $0x78] sm:$0xff] %v423_v49  ;;  %v167_v59 = vmul.f32 %v581_v51, %v724_v0  ;;  %v589_v61 = vunpack.c.h.bf16 %v680_v47  ;;  %v232_v62 = vadd.f32 %v735_v5, %v164_v52  ;;  %v168_v3 = vmul.f32 %v584_v54, %v724_v0  ;;  %v305_v47 = vld [vmem:[%s1341_s2 + $0xc8] sm:$0xff]  ;;  %v306_v54 = vld [vmem:[%s1341_s2 + $0xd0] sm:$0xff] }
  0x1a   :  { %v233_v63 = vadd.f32 %v735_v5, %v165_v53  ;;  %v169_v4 = vmul.f32 %v585_v55, %v724_v0  ;;  %v234_v6 = vadd.f32 %v735_v5, %v166_v58  ;;  %v170_v10 = vmul.f32 %v588_v60, %v724_v0  ;;  %v307_v55 = vld [vmem:[%s1341_s2 + $0xd8] sm:$0xff]  ;;  %v308_v60 = vld [vmem:[%s1341_s2 + $0xe0] sm:$0xff] }
  0x1b   :  { %v235_v7 = vadd.f32 %v735_v5, %v167_v59  ;;  %v171_v11 = vmul.f32 %v589_v61, %v724_v0  ;;  %v360_v12 = vadd.f32 %v296_v56, %v232_v62  ;;  %v236_v14 = vadd.f32 %v735_v5, %v168_v3  ;;  %v309_v61 = vld [vmem:[%s1341_s2 + $0xe8] sm:$0xff] }
  0x1c   :  { %v361_v13 = vadd.f32 %v297_v57, %v233_v63  ;;  %v237_v15 = vadd.f32 %v735_v5, %v169_v4  ;;  %v362_v18 = vadd.f32 %v298_v1, %v234_v6  ;;  %v238_v20 = vadd.f32 %v735_v5, %v170_v10  ;;  %v310_v6 = vld [vmem:[%s1341_s2 + $0xf0] sm:$0xff] }
  0x1d   :  { %v363_v19 = vadd.f32 %v299_v2, %v235_v7  ;;  %v239_v21 = vadd.f32 %v735_v5, %v171_v11  ;;  %v424_v23 = vmax.f32 %v360_v12, 0.0  ;;  %v364_v25 = vadd.f32 %v300_v8, %v236_v14  ;;  %v311_v7 = vld [vmem:[%s1341_s2 + $0xf8] sm:$0xff]  ;;  %v685_v12 = vld [vmem:[%s1340_s1 + $0x80] sm:$0xff]  }
  0x1e   :  { %v425_v24 = vmax.f32 %v361_v13, 0.0  ;;  %v365_v26 = vadd.f32 %v301_v9, %v237_v15  ;;  %v426_v28 = vmax.f32 %v362_v18, 0.0  ;;  %v366_v30 = vadd.f32 %v302_v16, %v238_v20 }
  0x1f   :  { %v427_v29 = vmax.f32 %v363_v19, 0.0  ;;  %v367_v31 = vadd.f32 %v303_v17, %v239_v21  ;;  %488 = vst [vmem:[%s1342_s3 + $0x80] sm:$0xff] %v424_v23  ;;  %v428_v33 = vmax.f32 %v364_v25, 0.0  ;;  %v592_v35 = vunpack.c.l.bf16 %v681_v22  ;;  %v686_v17 = vld [vmem:[%s1340_s1 + $0x88] sm:$0xff]  }
  0x20   :  { %489 = vst [vmem:[%s1342_s3 + $0x88] sm:$0xff] %v425_v24  ;;  %v429_v34 = vmax.f32 %v365_v26, 0.0  ;;  %v593_v36 = vunpack.c.h.bf16 %v681_v22  ;;  %490 = vst [vmem:[%s1342_s3 + $0x90] sm:$0xff] %v426_v28  ;;  %v430_v38 = vmax.f32 %v366_v30, 0.0  ;;  %v596_v40 = vunpack.c.l.bf16 %v682_v27  ;;  %v687_v22 = vld [vmem:[%s1340_s1 + $0x90] sm:$0xff]  }
  0x21   :  { %491 = vst [vmem:[%s1342_s3 + $0x98] sm:$0xff] %v427_v29  ;;  %v431_v39 = vmax.f32 %v367_v31, 0.0  ;;  %v597_v41 = vunpack.c.h.bf16 %v682_v27  ;;  %492 = vst [vmem:[%s1342_s3 + $0xa0] sm:$0xff] %v428_v33  ;;  %v172_v42 = vmul.f32 %v592_v35, %v724_v0  ;;  %v600_v44 = vunpack.c.l.bf16 %v683_v32  ;;  %v688_v27 = vld [vmem:[%s1340_s1 + $0x98] sm:$0xff]  }
  0x22   :  { %493 = vst [vmem:[%s1342_s3 + $0xa8] sm:$0xff] %v429_v34  ;;  %v173_v43 = vmul.f32 %v593_v36, %v724_v0  ;;  %v601_v45 = vunpack.c.h.bf16 %v683_v32  ;;  %494 = vst [vmem:[%s1342_s3 + $0xb0] sm:$0xff] %v430_v38  ;;  %v174_v48 = vmul.f32 %v596_v40, %v724_v0  ;;  %v604_v50 = vunpack.c.l.bf16 %v684_v37  ;;  %v312_v36 = vld [vmem:[%s1341_s2 + $0x100] sm:$0xff] }
  0x23   :  { %495 = vst [vmem:[%s1342_s3 + $0xb8] sm:$0xff] %v431_v39  ;;  %v175_v49 = vmul.f32 %v597_v41, %v724_v0  ;;  %v605_v51 = vunpack.c.h.bf16 %v684_v37  ;;  %v240_v52 = vadd.f32 %v735_v5, %v172_v42  ;;  %v176_v56 = vmul.f32 %v600_v44, %v724_v0  ;;  %v313_v37 = vld [vmem:[%s1341_s2 + $0x108] sm:$0xff]  ;;  %v314_v44 = vld [vmem:[%s1341_s2 + $0x110] sm:$0xff] }
  0x24   :  { %v241_v53 = vadd.f32 %v735_v5, %v173_v43  ;;  %v177_v57 = vmul.f32 %v601_v45, %v724_v0  ;;  %v242_v58 = vadd.f32 %v735_v5, %v174_v48  ;;  %v178_v62 = vmul.f32 %v604_v50, %v724_v0  ;;  %v315_v45 = vld [vmem:[%s1341_s2 + $0x118] sm:$0xff]  ;;  %v316_v50 = vld [vmem:[%s1341_s2 + $0x120] sm:$0xff] }
  0x25   :  { %v243_v59 = vadd.f32 %v735_v5, %v175_v49  ;;  %v179_v63 = vmul.f32 %v605_v51, %v724_v0  ;;  %v368_v1 = vadd.f32 %v304_v46, %v240_v52  ;;  %v244_v3 = vadd.f32 %v735_v5, %v176_v56  ;;  %v317_v51 = vld [vmem:[%s1341_s2 + $0x128] sm:$0xff] }
  0x26   :  { %v369_v2 = vadd.f32 %v305_v47, %v241_v53  ;;  %v245_v4 = vadd.f32 %v735_v5, %v177_v57  ;;  %v370_v8 = vadd.f32 %v306_v54, %v242_v58  ;;  %v246_v10 = vadd.f32 %v735_v5, %v178_v62  ;;  %v318_v58 = vld [vmem:[%s1341_s2 + $0x130] sm:$0xff] }
  0x27   :  { %v371_v9 = vadd.f32 %v307_v55, %v243_v59  ;;  %v247_v11 = vadd.f32 %v735_v5, %v179_v63  ;;  %v432_v13 = vmax.f32 %v368_v1, 0.0  ;;  %v372_v15 = vadd.f32 %v308_v60, %v244_v3  ;;  %v319_v59 = vld [vmem:[%s1341_s2 + $0x138] sm:$0xff]  ;;  %v689_v1 = vld [vmem:[%s1340_s1 + $0xa0] sm:$0xff]  }
  0x28   :  { %v433_v14 = vmax.f32 %v369_v2, 0.0  ;;  %v373_v16 = vadd.f32 %v309_v61, %v245_v4  ;;  %v434_v18 = vmax.f32 %v370_v8, 0.0  ;;  %v374_v20 = vadd.f32 %v310_v6, %v246_v10 }
  0x29   :  { %v435_v19 = vmax.f32 %v371_v9, 0.0  ;;  %v375_v21 = vadd.f32 %v311_v7, %v247_v11  ;;  %496 = vst [vmem:[%s1342_s3 + $0xc0] sm:$0xff] %v432_v13  ;;  %v436_v23 = vmax.f32 %v372_v15, 0.0  ;;  %v608_v25 = vunpack.c.l.bf16 %v685_v12  ;;  %v690_v7 = vld [vmem:[%s1340_s1 + $0xa8] sm:$0xff]  }
  0x2a   :  { %497 = vst [vmem:[%s1342_s3 + $0xc8] sm:$0xff] %v433_v14  ;;  %v437_v24 = vmax.f32 %v373_v16, 0.0  ;;  %v609_v26 = vunpack.c.h.bf16 %v685_v12  ;;  %498 = vst [vmem:[%s1342_s3 + $0xd0] sm:$0xff] %v434_v18  ;;  %v438_v28 = vmax.f32 %v374_v20, 0.0  ;;  %v612_v30 = vunpack.c.l.bf16 %v686_v17  ;;  %v691_v12 = vld [vmem:[%s1340_s1 + $0xb0] sm:$0xff]  }
  0x2b   :  { %499 = vst [vmem:[%s1342_s3 + $0xd8] sm:$0xff] %v435_v19  ;;  %v439_v29 = vmax.f32 %v375_v21, 0.0  ;;  %v613_v31 = vunpack.c.h.bf16 %v686_v17  ;;  %500 = vst [vmem:[%s1342_s3 + $0xe0] sm:$0xff] %v436_v23  ;;  %v180_v32 = vmul.f32 %v608_v25, %v724_v0  ;;  %v616_v34 = vunpack.c.l.bf16 %v687_v22  ;;  %v692_v17 = vld [vmem:[%s1340_s1 + $0xb8] sm:$0xff]  }
  0x2c   :  { %501 = vst [vmem:[%s1342_s3 + $0xe8] sm:$0xff] %v437_v24  ;;  %v181_v33 = vmul.f32 %v609_v26, %v724_v0  ;;  %v617_v35 = vunpack.c.h.bf16 %v687_v22  ;;  %502 = vst [vmem:[%s1342_s3 + $0xf0] sm:$0xff] %v438_v28  ;;  %v182_v38 = vmul.f32 %v612_v30, %v724_v0  ;;  %v620_v40 = vunpack.c.l.bf16 %v688_v27  ;;  %v320_v26 = vld [vmem:[%s1341_s2 + $0x140] sm:$0xff] }
  0x2d   :  { %503 = vst [vmem:[%s1342_s3 + $0xf8] sm:$0xff] %v439_v29  ;;  %v183_v39 = vmul.f32 %v613_v31, %v724_v0  ;;  %v621_v41 = vunpack.c.h.bf16 %v688_v27  ;;  %v248_v42 = vadd.f32 %v735_v5, %v180_v32  ;;  %v184_v46 = vmul.f32 %v616_v34, %v724_v0  ;;  %v321_v27 = vld [vmem:[%s1341_s2 + $0x148] sm:$0xff]  ;;  %v322_v34 = vld [vmem:[%s1341_s2 + $0x150] sm:$0xff] }
  0x2e   :  { %v249_v43 = vadd.f32 %v735_v5, %v181_v33  ;;  %v185_v47 = vmul.f32 %v617_v35, %v724_v0  ;;  %v250_v48 = vadd.f32 %v735_v5, %v182_v38  ;;  %v186_v52 = vmul.f32 %v620_v40, %v724_v0  ;;  %v323_v35 = vld [vmem:[%s1341_s2 + $0x158] sm:$0xff]  ;;  %v324_v40 = vld [vmem:[%s1341_s2 + $0x160] sm:$0xff] }
  0x2f   :  { %v251_v49 = vadd.f32 %v735_v5, %v183_v39  ;;  %v187_v53 = vmul.f32 %v621_v41, %v724_v0  ;;  %v376_v54 = vadd.f32 %v312_v36, %v248_v42  ;;  %v252_v56 = vadd.f32 %v735_v5, %v184_v46  ;;  %v325_v41 = vld [vmem:[%s1341_s2 + $0x168] sm:$0xff] }
  0x30   :  { %v377_v55 = vadd.f32 %v313_v37, %v249_v43  ;;  %v253_v57 = vadd.f32 %v735_v5, %v185_v47  ;;  %v378_v60 = vadd.f32 %v314_v44, %v250_v48  ;;  %v254_v62 = vadd.f32 %v735_v5, %v186_v52  ;;  %v326_v48 = vld [vmem:[%s1341_s2 + $0x170] sm:$0xff] }
  0x31   :  { %v379_v61 = vadd.f32 %v315_v45, %v251_v49  ;;  %v255_v63 = vadd.f32 %v735_v5, %v187_v53  ;;  %v440_v2 = vmax.f32 %v376_v54, 0.0  ;;  %v380_v4 = vadd.f32 %v316_v50, %v252_v56  ;;  %v327_v49 = vld [vmem:[%s1341_s2 + $0x178] sm:$0xff]  ;;  %v693_v54 = vld [vmem:[%s1340_s1 + $0xc0] sm:$0xff]  }
  0x32   :  { %v441_v3 = vmax.f32 %v377_v55, 0.0  ;;  %v381_v6 = vadd.f32 %v317_v51, %v253_v57  ;;  %v442_v8 = vmax.f32 %v378_v60, 0.0  ;;  %v382_v10 = vadd.f32 %v318_v58, %v254_v62 }
  0x33   :  { %v443_v9 = vmax.f32 %v379_v61, 0.0  ;;  %v383_v11 = vadd.f32 %v319_v59, %v255_v63  ;;  %504 = vst [vmem:[%s1342_s3 + $0x100] sm:$0xff] %v440_v2  ;;  %v444_v13 = vmax.f32 %v380_v4, 0.0  ;;  %v624_v15 = vunpack.c.l.bf16 %v689_v1  ;;  %v694_v59 = vld [vmem:[%s1340_s1 + $0xc8] sm:$0xff]  }
  0x34   :  { %505 = vst [vmem:[%s1342_s3 + $0x108] sm:$0xff] %v441_v3  ;;  %v445_v14 = vmax.f32 %v381_v6, 0.0  ;;  %v625_v16 = vunpack.c.h.bf16 %v689_v1  ;;  %506 = vst [vmem:[%s1342_s3 + $0x110] sm:$0xff] %v442_v8  ;;  %v446_v18 = vmax.f32 %v382_v10, 0.0  ;;  %v628_v20 = vunpack.c.l.bf16 %v690_v7  ;;  %v695_v1 = vld [vmem:[%s1340_s1 + $0xd0] sm:$0xff]  }
  0x35   :  { %507 = vst [vmem:[%s1342_s3 + $0x118] sm:$0xff] %v443_v9  ;;  %v447_v19 = vmax.f32 %v383_v11, 0.0  ;;  %v629_v21 = vunpack.c.h.bf16 %v690_v7  ;;  %508 = vst [vmem:[%s1342_s3 + $0x120] sm:$0xff] %v444_v13  ;;  %v188_v22 = vmul.f32 %v624_v15, %v724_v0  ;;  %v632_v24 = vunpack.c.l.bf16 %v691_v12  ;;  %v696_v7 = vld [vmem:[%s1340_s1 + $0xd8] sm:$0xff]  }
  0x36   :  { %509 = vst [vmem:[%s1342_s3 + $0x128] sm:$0xff] %v445_v14  ;;  %v189_v23 = vmul.f32 %v625_v16, %v724_v0  ;;  %v633_v25 = vunpack.c.h.bf16 %v691_v12  ;;  %510 = vst [vmem:[%s1342_s3 + $0x130] sm:$0xff] %v446_v18  ;;  %v190_v28 = vmul.f32 %v628_v20, %v724_v0  ;;  %v636_v30 = vunpack.c.l.bf16 %v692_v17  ;;  %v328_v16 = vld [vmem:[%s1341_s2 + $0x180] sm:$0xff] }
  0x37   :  { %511 = vst [vmem:[%s1342_s3 + $0x138] sm:$0xff] %v447_v19  ;;  %v191_v29 = vmul.f32 %v629_v21, %v724_v0  ;;  %v637_v31 = vunpack.c.h.bf16 %v692_v17  ;;  %v256_v32 = vadd.f32 %v735_v5, %v188_v22  ;;  %v192_v36 = vmul.f32 %v632_v24, %v724_v0  ;;  %v329_v17 = vld [vmem:[%s1341_s2 + $0x188] sm:$0xff]  ;;  %v330_v24 = vld [vmem:[%s1341_s2 + $0x190] sm:$0xff] }
  0x38   :  { %v257_v33 = vadd.f32 %v735_v5, %v189_v23  ;;  %v193_v37 = vmul.f32 %v633_v25, %v724_v0  ;;  %v258_v38 = vadd.f32 %v735_v5, %v190_v28  ;;  %v194_v42 = vmul.f32 %v636_v30, %v724_v0  ;;  %v331_v25 = vld [vmem:[%s1341_s2 + $0x198] sm:$0xff]  ;;  %v332_v30 = vld [vmem:[%s1341_s2 + $0x1a0] sm:$0xff] }
  0x39   :  { %v259_v39 = vadd.f32 %v735_v5, %v191_v29  ;;  %v195_v43 = vmul.f32 %v637_v31, %v724_v0  ;;  %v384_v44 = vadd.f32 %v320_v26, %v256_v32  ;;  %v260_v46 = vadd.f32 %v735_v5, %v192_v36  ;;  %v333_v31 = vld [vmem:[%s1341_s2 + $0x1a8] sm:$0xff] }
  0x3a   :  { %v385_v45 = vadd.f32 %v321_v27, %v257_v33  ;;  %v261_v47 = vadd.f32 %v735_v5, %v193_v37  ;;  %v386_v50 = vadd.f32 %v322_v34, %v258_v38  ;;  %v262_v52 = vadd.f32 %v735_v5, %v194_v42  ;;  %v334_v38 = vld [vmem:[%s1341_s2 + $0x1b0] sm:$0xff] }
  0x3b   :  { %v387_v51 = vadd.f32 %v323_v35, %v259_v39  ;;  %v263_v53 = vadd.f32 %v735_v5, %v195_v43  ;;  %v448_v55 = vmax.f32 %v384_v44, 0.0  ;;  %v388_v57 = vadd.f32 %v324_v40, %v260_v46  ;;  %v335_v39 = vld [vmem:[%s1341_s2 + $0x1b8] sm:$0xff]  ;;  %v697_v44 = vld [vmem:[%s1340_s1 + $0xe0] sm:$0xff]  }
  0x3c   :  { %v449_v56 = vmax.f32 %v385_v45, 0.0  ;;  %v389_v58 = vadd.f32 %v325_v41, %v261_v47  ;;  %v450_v60 = vmax.f32 %v386_v50, 0.0  ;;  %v390_v62 = vadd.f32 %v326_v48, %v262_v52 }
  0x3d   :  { %v451_v61 = vmax.f32 %v387_v51, 0.0  ;;  %v391_v63 = vadd.f32 %v327_v49, %v263_v53  ;;  %512 = vst [vmem:[%s1342_s3 + $0x140] sm:$0xff] %v448_v55  ;;  %v452_v2 = vmax.f32 %v388_v57, 0.0  ;;  %v640_v4 = vunpack.c.l.bf16 %v693_v54  ;;  %v698_v49 = vld [vmem:[%s1340_s1 + $0xe8] sm:$0xff]  }
  0x3e   :  { %513 = vst [vmem:[%s1342_s3 + $0x148] sm:$0xff] %v449_v56  ;;  %v453_v3 = vmax.f32 %v389_v58, 0.0  ;;  %v641_v6 = vunpack.c.h.bf16 %v693_v54  ;;  %514 = vst [vmem:[%s1342_s3 + $0x150] sm:$0xff] %v450_v60  ;;  %v454_v8 = vmax.f32 %v390_v62, 0.0  ;;  %v644_v10 = vunpack.c.l.bf16 %v694_v59  ;;  %v699_v54 = vld [vmem:[%s1340_s1 + $0xf0] sm:$0xff]  }
  0x3f   :  { %515 = vst [vmem:[%s1342_s3 + $0x158] sm:$0xff] %v451_v61  ;;  %v455_v9 = vmax.f32 %v391_v63, 0.0  ;;  %v645_v11 = vunpack.c.h.bf16 %v694_v59  ;;  %516 = vst [vmem:[%s1342_s3 + $0x160] sm:$0xff] %v452_v2  ;;  %v196_v12 = vmul.f32 %v640_v4, %v724_v0  ;;  %v648_v14 = vunpack.c.l.bf16 %v695_v1  ;;  %v700_v59 = vld [vmem:[%s1340_s1 + $0xf8] sm:$0xff]  }
  0x40   :  { %517 = vst [vmem:[%s1342_s3 + $0x168] sm:$0xff] %v453_v3  ;;  %v197_v13 = vmul.f32 %v641_v6, %v724_v0  ;;  %v649_v15 = vunpack.c.h.bf16 %v695_v1  ;;  %518 = vst [vmem:[%s1342_s3 + $0x170] sm:$0xff] %v454_v8  ;;  %v198_v18 = vmul.f32 %v644_v10, %v724_v0  ;;  %v652_v20 = vunpack.c.l.bf16 %v696_v7  ;;  %v336_v6 = vld [vmem:[%s1341_s2 + $0x1c0] sm:$0xff] }
  0x41   :  { %519 = vst [vmem:[%s1342_s3 + $0x178] sm:$0xff] %v455_v9  ;;  %v199_v19 = vmul.f32 %v645_v11, %v724_v0  ;;  %v653_v21 = vunpack.c.h.bf16 %v696_v7  ;;  %v264_v22 = vadd.f32 %v735_v5, %v196_v12  ;;  %v200_v26 = vmul.f32 %v648_v14, %v724_v0  ;;  %v337_v7 = vld [vmem:[%s1341_s2 + $0x1c8] sm:$0xff]  ;;  %v338_v14 = vld [vmem:[%s1341_s2 + $0x1d0] sm:$0xff] }
  0x42   :  { %v265_v23 = vadd.f32 %v735_v5, %v197_v13  ;;  %v201_v27 = vmul.f32 %v649_v15, %v724_v0  ;;  %v266_v28 = vadd.f32 %v735_v5, %v198_v18  ;;  %v202_v32 = vmul.f32 %v652_v20, %v724_v0  ;;  %v339_v15 = vld [vmem:[%s1341_s2 + $0x1d8] sm:$0xff]  ;;  %v340_v20 = vld [vmem:[%s1341_s2 + $0x1e0] sm:$0xff] }
  0x43   :  { %v267_v29 = vadd.f32 %v735_v5, %v199_v19  ;;  %v203_v33 = vmul.f32 %v653_v21, %v724_v0  ;;  %v392_v34 = vadd.f32 %v328_v16, %v264_v22  ;;  %v268_v36 = vadd.f32 %v735_v5, %v200_v26  ;;  %v341_v21 = vld [vmem:[%s1341_s2 + $0x1e8] sm:$0xff] }
  0x44   :  { %v393_v35 = vadd.f32 %v329_v17, %v265_v23  ;;  %v269_v37 = vadd.f32 %v735_v5, %v201_v27  ;;  %v394_v40 = vadd.f32 %v330_v24, %v266_v28  ;;  %v270_v42 = vadd.f32 %v735_v5, %v202_v32  ;;  %v342_v28 = vld [vmem:[%s1341_s2 + $0x1f0] sm:$0xff] }
  0x45   :  { %v395_v41 = vadd.f32 %v331_v25, %v267_v29  ;;  %v271_v43 = vadd.f32 %v735_v5, %v203_v33  ;;  %v456_v45 = vmax.f32 %v392_v34, 0.0  ;;  %v396_v47 = vadd.f32 %v332_v30, %v268_v36  ;;  %v343_v29 = vld [vmem:[%s1341_s2 + $0x1f8] sm:$0xff] }
  0x46   :  { %v457_v46 = vmax.f32 %v393_v35, 0.0  ;;  %v397_v48 = vadd.f32 %v333_v31, %v269_v37  ;;  %v458_v50 = vmax.f32 %v394_v40, 0.0  ;;  %v398_v52 = vadd.f32 %v334_v38, %v270_v42 }
  0x47   :  { %v459_v51 = vmax.f32 %v395_v41, 0.0  ;;  %v399_v53 = vadd.f32 %v335_v39, %v271_v43  ;;  %520 = vst [vmem:[%s1342_s3 + $0x180] sm:$0xff] %v456_v45  ;;  %v460_v55 = vmax.f32 %v396_v47, 0.0  ;;  %v656_v57 = vunpack.c.l.bf16 %v697_v44 }
  0x48   :  { %521 = vst [vmem:[%s1342_s3 + $0x188] sm:$0xff] %v457_v46  ;;  %v461_v56 = vmax.f32 %v397_v48, 0.0  ;;  %v657_v58 = vunpack.c.h.bf16 %v697_v44  ;;  %522 = vst [vmem:[%s1342_s3 + $0x190] sm:$0xff] %v458_v50  ;;  %v462_v60 = vmax.f32 %v398_v52, 0.0  ;;  %v660_v62 = vunpack.c.l.bf16 %v698_v49 }
  0x49   :  { %523 = vst [vmem:[%s1342_s3 + $0x198] sm:$0xff] %v459_v51  ;;  %v463_v61 = vmax.f32 %v399_v53, 0.0  ;;  %v661_v63 = vunpack.c.h.bf16 %v698_v49  ;;  %524 = vst [vmem:[%s1342_s3 + $0x1a0] sm:$0xff] %v460_v55  ;;  %v204_v1 = vmul.f32 %v656_v57, %v724_v0  ;;  %v664_v3 = vunpack.c.l.bf16 %v699_v54 }
  0x4a   :  { %525 = vst [vmem:[%s1342_s3 + $0x1a8] sm:$0xff] %v461_v56  ;;  %v205_v2 = vmul.f32 %v657_v58, %v724_v0  ;;  %v665_v4 = vunpack.c.h.bf16 %v699_v54  ;;  %526 = vst [vmem:[%s1342_s3 + $0x1b0] sm:$0xff] %v462_v60  ;;  %v206_v8 = vmul.f32 %v660_v62, %v724_v0  ;;  %v668_v10 = vunpack.c.l.bf16 %v700_v59 }
  0x4b   :  { %527 = vst [vmem:[%s1342_s3 + $0x1b8] sm:$0xff] %v463_v61  ;;  %v207_v9 = vmul.f32 %v661_v63, %v724_v0  ;;  %v669_v11 = vunpack.c.h.bf16 %v700_v59  ;;  %v272_v12 = vadd.f32 %v735_v5, %v204_v1  ;;  %v208_v16 = vmul.f32 %v664_v3, %v724_v0 }
  0x4c   :  { %v273_v13 = vadd.f32 %v735_v5, %v205_v2  ;;  %v209_v17 = vmul.f32 %v665_v4, %v724_v0  ;;  %v274_v18 = vadd.f32 %v735_v5, %v206_v8  ;;  %v210_v22 = vmul.f32 %v668_v10, %v724_v0 }
  0x4d   :  { %v275_v19 = vadd.f32 %v735_v5, %v207_v9  ;;  %v211_v23 = vmul.f32 %v669_v11, %v724_v0  ;;  %v400_v24 = vadd.f32 %v336_v6, %v272_v12  ;;  %v276_v26 = vadd.f32 %v735_v5, %v208_v16 }
  0x4e   :  { %v401_v25 = vadd.f32 %v337_v7, %v273_v13  ;;  %v277_v27 = vadd.f32 %v735_v5, %v209_v17  ;;  %v402_v30 = vadd.f32 %v338_v14, %v274_v18  ;;  %v278_v32 = vadd.f32 %v735_v5, %v210_v22 }
  0x4f   :  { %v403_v31 = vadd.f32 %v339_v15, %v275_v19  ;;  %v279_v0 = vadd.f32 %v735_v5, %v211_v23  ;;  %v464_v33 = vmax.f32 %v400_v24, 0.0  ;;  %v404_v35 = vadd.f32 %v340_v20, %v276_v26 }
  0x50   :  { %v465_v34 = vmax.f32 %v401_v25, 0.0  ;;  %v405_v36 = vadd.f32 %v341_v21, %v277_v27  ;;  %v466_v37 = vmax.f32 %v402_v30, 0.0  ;;  %v406_v39 = vadd.f32 %v342_v28, %v278_v32 }
  0x51   :  { %v467_v38 = vmax.f32 %v403_v31, 0.0  ;;  %v407_v40 = vadd.f32 %v343_v29, %v279_v0  ;;  %528 = vst [vmem:[%s1342_s3 + $0x1c0] sm:$0xff] %v464_v33  ;;  %v468_v41 = vmax.f32 %v404_v35, 0.0 }
  0x52   :  { %529 = vst [vmem:[%s1342_s3 + $0x1c8] sm:$0xff] %v465_v34  ;;  %v469_v42 = vmax.f32 %v405_v36, 0.0  ;;  %530 = vst [vmem:[%s1342_s3 + $0x1d0] sm:$0xff] %v466_v37  ;;  %v470_v5 = vmax.f32 %v406_v39, 0.0 }
  0x53   :  { %531 = vst [vmem:[%s1342_s3 + $0x1d8] sm:$0xff] %v467_v38  ;;  %v471_v43 = vmax.f32 %v407_v40, 0.0  ;;  %532 = vst [vmem:[%s1342_s3 + $0x1e0] sm:$0xff] %v468_v41 }
  0x54   :  { %533 = vst [vmem:[%s1342_s3 + $0x1e8] sm:$0xff] %v469_v42  ;;  %534 = vst [vmem:[%s1342_s3 + $0x1f0] sm:$0xff] %v470_v5 }
  0x55   :  { %535 = vst [vmem:[%s1342_s3 + $0x1f8] sm:$0xff] %v471_v43 }

// kernel: residual_block.2
= control target key start
LH: loop header
LB: loop body
LE: loop exit
PB: predicated region body
PF: predicated region fallthrough
CT: control target
= control target key end

     0   :  { %s4593_s15 = smov 0   ;;  %s5868_s0 = inlined_call_operand.vmem [shape: bf16[2,264,384], index: 0, kind: input, shape index: {}]   ;;  %s5869_s1 = inlined_call_operand.vmem [shape: bf16[3,384,128], index: 1, kind: input, shape index: {}]   ;;  %s5870_s2 = inlined_call_operand.vmem [shape: f32[512,1], index: 2, kind: input, shape index: {}]   ;;  %s5871_s3 = inlined_call_operand.vmem [shape: bf16[512,128], index: 3, kind: output, shape index: {0}]   ;;  %s5872_s4 = inlined_call_operand.vmem [shape: f32[2,2,128], index: 4, kind: output, shape index: {1}]  }
   0x1 LB: > { %s4599_s16 = sadd.s32 4294967295, %s4565_s15   ;;  %p3257_p0 = scmp.ge.s32.totalorder %s4565_s15, 1  ;;  %s4565_s15 = sphi %s4593_s15, %s15_s15  }
   0x2   : > { %p176_p1 = scmp.lt.s32.totalorder %s4565_s15, 3 }
   0x4   : > { %p177_p2 = pnand %p3257_p0, %p176_p1 }
   0x6   : > { %180 = sbr.rel (%p177_p2) target bundleno = 551 (0x227), region = 32 }
   0xb   : > { %v4320_v0 = vld [vmem:[%s5869_s1 + $0x138] sm:$0xff]   ;;  %p211_p3 = scmp.lt.s32.totalorder %s4599_s16, 1  ;;  %v4322_v2 = vld [vmem:[%s5869_s1 + $0x130] sm:$0xff]   ;;  %v4324_v4 = vld [vmem:[%s5869_s1 + $0x128] sm:$0xff]   ;;  %vm676_vm0 = vcmask 1045504   ;;  %s3259_s29 = sshll.u32 %s4599_s16, 5 }
   0xc   : > { %v4321_v1 = vld [vmem:[%s5869_s1 + $0xf8] sm:$0xff]   ;;  %3740 = vmatprep.subr.bf16.mxu0 %v4320_v0  ;;  %4292 = vmatprep.subr.bf16.mxu1 %v4320_v0  ;;  %v4323_v3 = vld [vmem:[%s5869_s1 + $0xf0] sm:$0xff]   ;;  %v4325_v5 = vld [vmem:[%s5869_s1 + $0xe8] sm:$0xff]   ;;  %p217_p4 = scmp.lt.s32.totalorder %s3259_s29, 63 }
   0xd   : > { %3741 = vmatpush3.bf16.msra.mxu0 %v4321_v1  ;;  %4300 = vmatpush3.bf16.msra.mxu1 %v4321_v1  ;;  %s4620_s27 = scalar_select %p211_p3, %s4599_s16, 1  ;;  %v4326_v6 = vld [vmem:[%s5869_s1 + $0x120] sm:$0xff]   ;;  %v4328_v8 = vld [vmem:[%s5869_s1 + $0x118] sm:$0xff]   ;;  %v4330_v10 = vld [vmem:[%s5869_s1 + $0x110] sm:$0xff]  }
   0xe   : > { %3742 = vmatprep.subr.bf16.mxu0 %v4322_v2  ;;  %4293 = vmatprep.subr.bf16.mxu1 %v4322_v2  ;;  %v4327_v7 = vld [vmem:[%s5869_s1 + $0xe0] sm:$0xff]   ;;  %v4329_v9 = vld [vmem:[%s5869_s1 + $0xd8] sm:$0xff]   ;;  %v4331_v22 = vld [vmem:[%s5869_s1 + $0xd0] sm:$0xff]   ;;  %s5951_s29 = smov (!%p217_p4, %s3259_s29), 63 }
   0xf   : > { %s4308_s6 = smul.u32 396, %s4620_s27  ;;  %v4332_v25 = vld [vmem:[%s5869_s1 + $0x108] sm:$0xff]   ;;  %v4334_v40 = vld [vmem:[%s5869_s1 + $0x100] sm:$0xff]   ;;  %v4344_v48 = vld [vmem:[%s5869_s1 + $0x178] sm:$0xff]   ;;  %s3260_s9 = sshll.u32 %s5951_s29, 3 }
  0x10   : > { %v4333_v29 = vld [vmem:[%s5869_s1 + $0xc8] sm:$0xff]   ;;  %v4335_v42 = vld [vmem:[%s5869_s1 + $0xc0] sm:$0xff]   ;;  %v4345_v49 = vld [vmem:[%s5869_s1 + $0xb8] sm:$0xff]   ;;  %s5156_s21 = scalar_lea.vmem %s5870_s2, %s3260_s9 }
  0x11   : > { %3743 = vmatpush3.bf16.msra.mxu0 %v4323_v3  ;;  %4301 = vmatpush3.bf16.msra.mxu1 %v4323_v3  ;;  %s4638_s13 = scalar_lea.vmem %s5868_s0, %s4308_s6  ;;  %v4346_v60 = vld [vmem:[%s5869_s1 + $0x170] sm:$0xff]  }
  0x12   : > { %3744 = vmatprep.subr.bf16.mxu0 %v4324_v4  ;;  %4294 = vmatprep.subr.bf16.mxu1 %v4324_v4  ;;  %v345_v11 = vld [vmem:[%s4638_s13] sm:$0xcc]  ;;  %v4648_v12 = vld [vmem:[%s4638_s13 + $0xc] sm:$0xff]  ;;  %v4651_v13 = vld [vmem:[%s4638_s13 + $0x18] sm:$0xff] }
  0x13   : > { %v4654_v14 = vld [vmem:[%s4638_s13 + $0x24] sm:$0xff]  ;;  %v3313_v15 = vcombine.high %v345_v11, %v4648_v12  ;;  %v395_v17 = vld [vmem:[%s4638_s13 + $0x12c] sm:$0xff]  ;;  %v397_v19 = vld [vmem:[%s4638_s13 + $0x138] sm:$0xff]  ;;  %v3312_v31 = vcombine.low %v345_v11, %v4648_v12 }
  0x14   : > { %v393_v16 = vld [vmem:[%s4638_s13 + $0x120] sm:$0xff]  ;;  %v4661_v18 = vcombine.high %v4651_v13, %v4654_v14  ;;  %v4681_v32 = vcombine.low %v4651_v13, %v4654_v14  ;;  %v4684_v33 = vld [vmem:[%s4638_s13 + $0x30] sm:$0xff]  ;;  %v4713_v50 = vld [vmem:[%s4638_s13 + $0x48] sm:$0xff] }
  0x15   : > { %3745 = vmatpush3.bf16.msra.mxu0 %v4325_v5  ;;  %4302 = vmatpush3.bf16.msra.mxu1 %v4325_v5  ;;  %v399_v20 = vld [vmem:[%s4638_s13 + $0x144] sm:$0xff]  ;;  %v3349_v21 = vcombine.high %v393_v16, %v395_v17  ;;  %v680_v23 = vrot.slane %v3313_v15, 2  ;;  %v3348_v35 = vcombine.low %v393_v16, %v395_v17  ;;  %v4689_v37 = vld [vmem:[%s4638_s13 + $0x3c] sm:$0xff]  ;;  %v401_v38 = vld [vmem:[%s4638_s13 + $0x150] sm:$0xff]  ;;  %v677_v43 = vrot.slane %v3312_v31, 2 }
  0x16   : > { %3746 = vmatprep.subr.bf16.mxu0 %v4326_v6  ;;  %4295 = vmatprep.subr.bf16.mxu1 %v4326_v6  ;;  %v3352_v24 = vcombine.high %v397_v19, %v399_v20  ;;  %v681_v26 = vrot.slane %v4661_v18, 2  ;;  %v3351_v36 = vcombine.low %v397_v19, %v399_v20  ;;  %v403_v39 = vld [vmem:[%s4638_s13 + $0x15c] sm:$0xff]  ;;  %v4698_v41 = vcombine.high %v4684_v33, %v4689_v37  ;;  %v4717_v52 = vld [vmem:[%s4638_s13 + $0x54] sm:$0xff]  ;;  %v405_v55 = vld [vmem:[%s4638_s13 + $0x168] sm:$0xff] }
  0x17   : > { %v4672_v27 = vrot.slane %v3349_v21, 2  ;;  %v3355_v44 = vcombine.high %v401_v38, %v403_v39  ;;  %v678_v45 = vrot.slane %v4681_v32, 2  ;;  %v4704_v46 = vrot.slane %v3348_v35, 2  ;;  %v407_v56 = vld [vmem:[%s4638_s13 + $0x174] sm:$0xff]  ;;  %v4351_v4 = vld [vmem:[%s5869_s1 + $0x168] sm:$0xff]   ;;  %v4745_v5 = vld [vmem:[%s4638_s13 + $0x60] sm:$0xff] }
  0x18   : > { %v754_v28 = vrot.slane %v3352_v24, 2  ;;  %v682_v30 = vsel %vm676_vm0, %v680_v23, %v681_v26  ;;  %v752_v47 = vrot.slane %v3351_v36, 2  ;;  %v688_v51 = vrot.slane %v4698_v41, 2  ;;  %v4353_v63 = vld [vmem:[%s5869_s1 + $0xb0] sm:$0xff]   ;;  %v4756_v11 = vld [vmem:[%s4638_s13 + $0x2c] sm:$0xf] }
  0x19   : > { %3747 = vmatpush3.bf16.msra.mxu0 %v4327_v7  ;;  %4303 = vmatpush3.bf16.msra.mxu1 %v4327_v7  ;;  %v760_v53 = vrot.slane %v3355_v44, 2  ;;  %v4721_v54 = vcombine.low %v4684_v33, %v4689_v37  ;;  %v679_v57 = vsel %vm676_vm0, %v677_v43, %v678_v45  ;;  %v3354_v59 = vcombine.low %v401_v38, %v403_v39  ;;  %v4749_v7 = vld [vmem:[%s4638_s13 + $0x6c] sm:$0xff]  ;;  %v4759_v15 = vld [vmem:[%s4638_s13 + $0x38] sm:$0xf]  ;;  %v4352_v24 = vld [vmem:[%s5869_s1 + $0x160] sm:$0xff]  }
  0x1a   : > { %3748 = vmatprep.subr.bf16.mxu0 %v4328_v8  ;;  %4296 = vmatprep.subr.bf16.mxu1 %v4328_v8  ;;  %v755_v34 = vsel %vm676_vm0, %v4672_v27, %v754_v28  ;;  %v753_v58 = vsel %vm676_vm0, %v4704_v46, %v752_v47  ;;  %v4733_v61 = vcombine.high %v4713_v50, %v4717_v52  ;;  %v409_v8 = vld [vmem:[%s4638_s13 + $0x180] sm:$0x33]  ;;  %v4787_v36 = vld [vmem:[%s4638_s13 + $0x78] sm:$0xff]  ;;  %v346_v39 = vld [vmem:[%s4638_s13 + $0x8] sm:$0xc] }
  0x1b   : > { %1000 = vmatprep.mubr.bf16.mxu0 %v682_v30  ;;  %1096 = vmatprep.mubr.bf16.mxu1 %v755_v34  ;;  %v689_v62 = vsel %vm676_vm0, %v681_v26, %v688_v51  ;;  %v3358_v0 = vcombine.high %v405_v55, %v407_v56  ;;  %v761_v1 = vsel %vm676_vm0, %v754_v28, %v760_v53  ;;  %v686_v2 = vrot.slane %v4721_v54, 2  ;;  %v4358_v30 = vld [vmem:[%s5869_s1 + $0x158] sm:$0xff]   ;;  %v4375_v31 = vld [vmem:[%s5869_s1 + $0xa0] sm:$0xff]  }
  0x1c   : > { %v758_v3 = vrot.slane %v3354_v59, 2  ;;  %v694_v6 = vrot.slane %v4733_v61, 2  ;;  %v4764_v17 = vcombine.low %v4713_v50, %v4717_v52  ;;  %v3357_v19 = vcombine.low %v405_v55, %v407_v56  ;;  %v367_v38 = vld [vmem:[%s4638_s13 + $0x84] sm:$0xff] }
  0x1d   : > { %3749 = vmatpush3.bf16.msra.mxu0 %v4329_v9  ;;  %4304 = vmatpush3.bf16.msra.mxu1 %v4329_v9  ;;  %v4365_v9 = vld [vmem:[%s5869_s1 + $0xa8] sm:$0xff]   ;;  %v687_v16 = vsel %vm676_vm0, %v678_v45, %v686_v2  ;;  %v3361_v23 = vcombine.high %v409_v8, %v409_v8  ;;  %v4797_v45 = vcombine.low %v4745_v5, %v4749_v7 }
  0x1e   : > { %3750 = vmatprep.subr.bf16.mxu0 %v4330_v10  ;;  %4297 = vmatprep.subr.bf16.mxu1 %v4330_v10  ;;  %v766_v10 = vrot.slane %v3358_v0, 2  ;;  %v759_v21 = vsel %vm676_vm0, %v752_v47, %v758_v3  ;;  %v692_v28 = vrot.slane %v4764_v17, 2  ;;  %v3360_v47 = vcombine.low %v409_v8, %v409_v8 }
  0x1f   : > { %v772_v35 = vrot.slane %v3361_v23, 2 }
  0x20   : > { %v767_v26 = vsel %vm676_vm0, %v760_v53, %v766_v10  ;;  %v693_v43 = vsel %vm676_vm0, %v686_v2, %v692_v28  ;;  %v770_v59 = vrot.slane %v3360_v47, 2  ;;  %v369_v2 = vld [vmem:[%s4638_s13 + $0x90] sm:$0xff]  ;;  %v4374_v47 = vld [vmem:[%s5869_s1 + $0x38] sm:$0xff]  }
  0x21   : > { %3751 = vmatpush3.bf16.msra.mxu0 %v4331_v22  ;;  %4305 = vmatpush3.bf16.msra.mxu1 %v4331_v22  ;;  %v4771_v22 = vcombine.high %v4745_v5, %v4749_v7  ;;  %v773_v56 = vsel %vm676_vm0, %v766_v10, %v772_v35 }
  0x22   : > { %3752 = vmatprep.subr.bf16.mxu0 %v4332_v25  ;;  %4298 = vmatprep.subr.bf16.mxu1 %v4332_v25  ;;  %v695_v25 = vsel %vm676_vm0, %v688_v51, %v694_v6  ;;  %v4804_v51 = vcombine.high %v4787_v36, %v367_v38 }
  0x23   : > { %v700_v34 = vrot.slane %v4771_v22, 2 }
  0x25   : > { %3753 = vmatpush3.bf16.msra.mxu0 %v4333_v29  ;;  %4306 = vmatpush3.bf16.msra.mxu1 %v4333_v29  ;;  %v764_v29 = vrot.slane %v3357_v19, 2  ;;  %v4366_v19 = vld [vmem:[%s5869_s1 + $0x140] sm:$0xff]  }
  0x26   : > { %3754 = vmatprep.subr.bf16.mxu0 %v4334_v40  ;;  %4299 = vmatprep.subr.bf16.mxu1 %v4334_v40  ;;  %v348_v40 = vld [vmem:[%s4638_s13 + $0x14] sm:$0xf] }
  0x27   : > { %v765_v44 = vsel %vm676_vm0, %v758_v3, %v764_v29  ;;  %v3314_v53 = vcombine.low %v346_v39, %v348_v40  ;;  %v371_v3 = vld [vmem:[%s4638_s13 + $0x9c] sm:$0xff]  ;;  %v373_v39 = vld [vmem:[%s4638_s13 + $0xa8] sm:$0xff] }
  0x28   : > { %v4831_v23 = vcombine.high %v369_v2, %v371_v3 }
  0x29   : > { %3755 = vmatpush3.bf16.msra.mxu0 %v4335_v42  ;;  %4307 = vmatpush3.bf16.msra.mxu1 %v4335_v42  ;;  %v350_v42 = vld [vmem:[%s4638_s13 + $0x20] sm:$0xf]  ;;  %v683_v0 = vrot.slane %v3314_v53, 2 }
  0x2a   : > { %4148 = vmatprep.subr.bf16.mxu1 %v4344_v48  ;;  %4196 = vmatprep.subr.bf16.mxu0 %v4345_v49  ;;  %v3317_v55 = vcombine.low %v350_v42, %v4756_v11  ;;  %v712_v35 = vrot.slane %v4831_v23, 2  ;;  %v375_v42 = vld [vmem:[%s4638_s13 + $0xb4] sm:$0xff] }
  0x2c   : > { %1001 = vmatmul.mubr.bf16.vlgmr.msra.gmra.mxu0 %v679_v57  ;;  %1097 = vmatmul.mubr.bf16.vlgmr.msra.gmra.mxu1 %v753_v58  ;;  %v4388_v57 = vld [vmem:[%s5869_s1 + $0x98] sm:$0xff]   ;;  %v698_v58 = vrot.slane %v4797_v45, 2 }
  0x2d   : > { %4149 = vmatpush3.bf16.msra.mxu1 %v4344_v48  ;;  %4197 = vmatpush3.bf16.msra.mxu0 %v4345_v49  ;;  %v4359_v48 = vld [vmem:[%s5869_s1 + $0x150] sm:$0xff]   ;;  %v701_v49 = vsel %vm676_vm0, %v694_v6, %v700_v34  ;;  %v4821_v6 = vcombine.low %v4787_v36, %v367_v38 }
  0x2e   : > { %4150 = vmatprep.subr.bf16.mxu1 %v4346_v60  ;;  %1008 = vmatprep.mubr.bf16.mxu0 %v689_v62  ;;  %v4364_v62 = vld [vmem:[%s5869_s1 + $0x148] sm:$0xff]   ;;  %v699_v10 = vsel %vm676_vm0, %v692_v28, %v698_v58  ;;  %v364_v38 = vld [vmem:[%s4638_s13 + $0x74] sm:$0xf] }
  0x2f   : > { %1104 = vmatprep.mubr.bf16.mxu1 %v761_v1  ;;  %4198 = vmatprep.subr.bf16.mxu0 %v4353_v63  ;;  %v684_v1 = vrot.slane %v3317_v55, 2  ;;  %v704_v28 = vrot.slane %v4821_v6, 2 }
  0x31   : > { %4151 = vmatpush3.bf16.msra.mxu1 %v4346_v60  ;;  %4199 = vmatpush3.bf16.msra.mxu0 %v4353_v63  ;;  %v356_v60 = vld [vmem:[%s4638_s13 + $0x44] sm:$0xf]  ;;  %v706_v63 = vrot.slane %v4804_v51, 2  ;;  %v705_v53 = vsel %vm676_vm0, %v698_v58, %v704_v28 }
  0x32   : > { %4152 = vmatprep.subr.bf16.mxu1 %v4351_v4  ;;  %4200 = vmatprep.subr.bf16.mxu0 %v4365_v9  ;;  %v3320_v8 = vcombine.low %v4759_v15, %v356_v60 }
  0x34   : > { %1009 = vmatmul.mubr.bf16.gmra.mxu0 %v687_v16  ;;  %1105 = vmatmul.mubr.bf16.gmra.mxu1 %v759_v21  ;;  %v771_v16 = vsel %vm676_vm0, %v764_v29, %v770_v59  ;;  %v707_v21 = vsel %vm676_vm0, %v700_v34, %v706_v63  ;;  %v690_v29 = vrot.slane %v3320_v8, 2  ;;  %v4861_v59 = vcombine.high %v373_v39, %v375_v42  ;;  %v4879_v8 = vld [vmem:[%s4638_s13 + $0xc0] sm:$0xff] }
  0x35   : > { %4153 = vmatpush3.bf16.msra.mxu1 %v4351_v4  ;;  %1016 = vmatprep.mubr.bf16.mxu0 %v695_v25  ;;  %v358_v4 = vld [vmem:[%s4638_s13 + $0x50] sm:$0xf] }
  0x36   : > { %4154 = vmatprep.subr.bf16.mxu1 %v4352_v24  ;;  %1112 = vmatprep.mubr.bf16.mxu1 %v767_v26  ;;  %v4395_v26 = vld [vmem:[%s5869_s1 + $0x90] sm:$0xff]   ;;  %v691_v55 = vsel %vm676_vm0, %v684_v1, %v690_v29 }
  0x37   : > { %4201 = vmatpush3.bf16.msra.mxu0 %v4365_v9  ;;  %v360_v9 = vld [vmem:[%s4638_s13 + $0x5c] sm:$0xf] }
  0x38   : > { %4202 = vmatprep.subr.bf16.mxu0 %v4375_v31  ;;  %v3323_v25 = vcombine.low %v358_v4, %v360_v9  ;;  %v4386_v4 = vld [vmem:[%s5869_s1 + $0x68] sm:$0xff]  }
  0x39   : > { %4155 = vmatpush3.bf16.msra.mxu1 %v4352_v24  ;;  %v685_v24 = vsel %vm676_vm0, %v683_v0, %v684_v1  ;;  %v372_v0 = vld [vmem:[%s4638_s13 + $0xa4] sm:$0xf]  ;;  %v4381_v1 = vld [vmem:[%s5869_s1 + $0x30] sm:$0xff]   ;;  %v389_v9 = vld [vmem:[%s4638_s13 + $0x108] sm:$0xff] }
  0x3a   : > { %4156 = vmatprep.subr.bf16.mxu1 %v4358_v30  ;;  %v696_v40 = vrot.slane %v3323_v25, 2  ;;  %v376_v25 = vld [vmem:[%s4638_s13 + $0xbc] sm:$0xf] }
  0x3b   : > { %4203 = vmatpush3.bf16.msra.mxu0 %v4375_v31  ;;  %v362_v31 = vld [vmem:[%s4638_s13 + $0x68] sm:$0xf] }
  0x3c   : > { %1017 = vmatmul.mubr.bf16.gmra.mxu0 %v693_v43  ;;  %1113 = vmatmul.mubr.bf16.gmra.mxu1 %v765_v44  ;;  %v366_v43 = vld [vmem:[%s4638_s13 + $0x80] sm:$0xf]  ;;  %v368_v44 = vld [vmem:[%s4638_s13 + $0x8c] sm:$0xf]  ;;  %v697_v58 = vsel %vm676_vm0, %v690_v29, %v696_v40  ;;  %v718_v29 = vrot.slane %v4861_v59, 2 }
  0x3d   : > { %4157 = vmatpush3.bf16.msra.mxu1 %v4358_v30  ;;  %1024 = vmatprep.mubr.bf16.mxu0 %v701_v49  ;;  %v4373_v30 = vld [vmem:[%s5869_s1 + $0x78] sm:$0xff]   ;;  %v4380_v49 = vld [vmem:[%s5869_s1 + $0x70] sm:$0xff]   ;;  %v3329_v60 = vcombine.low %v366_v43, %v368_v44 }
  0x3e   : > { %4158 = vmatprep.subr.bf16.mxu1 %v4359_v48  ;;  %1120 = vmatprep.mubr.bf16.mxu1 %v773_v56  ;;  %v3326_v56 = vcombine.low %v362_v31, %v364_v38 }
  0x3f   : > { %4204 = vmatprep.subr.bf16.mxu0 %v4388_v57 }
  0x40   : > { %4205 = vmatpush3.bf16.msra.mxu0 %v4388_v57  ;;  %v713_v57 = vsel %vm676_vm0, %v706_v63, %v712_v35  ;;  %v4408_v63 = vld [vmem:[%s5869_s1 + $0x88] sm:$0xff]  }
  0x41   : > { %4159 = vmatpush3.bf16.msra.mxu1 %v4359_v48  ;;  %4206 = vmatprep.subr.bf16.mxu0 %v4395_v26  ;;  %v4853_v48 = vcombine.low %v369_v2, %v371_v3  ;;  %v4414_v2 = vld [vmem:[%s5869_s1 + $0x8] sm:$0xff]  }
  0x42   : > { %4160 = vmatprep.subr.bf16.mxu1 %v4364_v62 }
  0x43   : > { %v710_v3 = vrot.slane %v4853_v48, 2 }
  0x44   : > { %1025 = vmatmul.mubr.bf16.gmra.mxu0 %v699_v10  ;;  %1121 = vmatmul.mubr.bf16.gmra.mxu1 %v771_v16  ;;  %v391_v10 = vld [vmem:[%s4638_s13 + $0x114] sm:$0xff]  ;;  %v702_v16 = vrot.slane %v3326_v56, 2 }
  0x45   : > { %4161 = vmatpush3.bf16.msra.mxu1 %v4364_v62  ;;  %1032 = vmatprep.mubr.bf16.mxu0 %v707_v21  ;;  %v370_v62 = vld [vmem:[%s4638_s13 + $0x98] sm:$0xf]  ;;  %v4886_v21 = vld [vmem:[%s4638_s13 + $0xcc] sm:$0xff]  ;;  %v4893_v38 = vcombine.low %v389_v9, %v391_v10 }
  0x46   : > { %4162 = vmatprep.subr.bf16.mxu1 %v4366_v19  ;;  %4164 = vmatprep.mubr.bf16.mxu1 %v685_v24  ;;  %v374_v24 = vld [vmem:[%s4638_s13 + $0xb0] sm:$0xf]  ;;  %v3332_v31 = vcombine.low %v370_v62, %v372_v0  ;;  %v4903_v44 = vcombine.high %v4879_v8, %v4886_v21  ;;  %v378_v0 = vld [vmem:[%s4638_s13 + $0xc8] sm:$0xf] }
  0x47   : > { %4207 = vmatpush3.bf16.msra.mxu0 %v4395_v26  ;;  %v4890_v26 = vcombine.high %v389_v9, %v391_v10  ;;  %v5873_v56 = vrot.slane %v4893_v38, 2  ;;  %v4394_v9 = vld [vmem:[%s5869_s1 + $0x20] sm:$0xff]   ;;  %v4940_v10 = vld [vmem:[%s4638_s13 + $0xd8] sm:$0xff] }
  0x48   : > { %4208 = vmatprep.subr.bf16.mxu0 %v4408_v63  ;;  %v714_v62 = vrot.slane %v3332_v31, 2  ;;  %v384_v31 = vld [vmem:[%s4638_s13 + $0xec] sm:$0xf] }
  0x49   : > { %4163 = vmatpush3.bf16.msra.mxu1 %v4366_v19  ;;  %v4883_v19 = vcombine.low %v373_v39, %v375_v42  ;;  %v5874_v43 = vrot.slane %v4890_v26, 2  ;;  %v711_v42 = vsel %vm676_vm0, %v704_v28, %v710_v3  ;;  %v4387_v28 = vld [vmem:[%s5869_s1 + $0x28] sm:$0xff]   ;;  %v4978_v39 = vld [vmem:[%s4638_s13 + $0xf0] sm:$0xff] }
  0x4a   : > { %3876 = vmatprep.subr.bf16.mxu1 %v4373_v30  ;;  %v708_v30 = vrot.slane %v3329_v60, 2  ;;  %v719_v60 = vsel %vm676_vm0, %v712_v35, %v718_v29 }
  0x4b   : > { %4209 = vmatpush3.bf16.msra.mxu0 %v4408_v63  ;;  %v724_v63 = vrot.slane %v4903_v44, 2 }
  0x4c   : > { %1033 = vmatmul.mubr.bf16.gmra.mxu0 %v705_v53  ;;  %4165 = vmatmul.mubr.bf16.vlgmr.msra.gmra.mxu1 %v691_v55  ;;  %v703_v53 = vsel %vm676_vm0, %v696_v40, %v702_v16  ;;  %v716_v55 = vrot.slane %v4883_v19, 2  ;;  %v709_v40 = vsel %vm676_vm0, %v702_v16, %v708_v30  ;;  %v4943_v16 = vld [vmem:[%s4638_s13 + $0xe4] sm:$0xff] }
  0x4d   : > { %3877 = vmatpush3.bf16.msra.mxu1 %v4374_v47  ;;  %1040 = vmatprep.mubr.bf16.mxu0 %v713_v57  ;;  %v3335_v47 = vcombine.low %v374_v24, %v376_v25  ;;  %v4918_v57 = vsel %vm676_vm0, %v5874_v43, %v4672_v27  ;;  %v4931_v27 = vsel %vm676_vm0, %v5873_v56, %v4704_v46  ;;  %v382_v46 = vld [vmem:[%s4638_s13 + $0xe0] sm:$0xf]  ;;  %v5065_v43 = vld [vmem:[%s4638_s13 + $0x164] sm:$0xf] }
  0x4e   : > { %4168 = vmatprep.mubr.bf16.mxu1 %v697_v58  ;;  %3878 = vmatprep.subr.bf16.mxu1 %v4380_v49  ;;  %v4415_v49 = vld [vmem:[%s5869_s1 + $0x80] sm:$0xff]   ;;  %v380_v58 = vld [vmem:[%s4638_s13 + $0xd4] sm:$0xf]  ;;  %v4950_v25 = vcombine.low %v4879_v8, %v4886_v21  ;;  %v3341_v35 = vcombine.low %v382_v46, %v384_v31  ;;  %v4991_v46 = vcombine.low %v4940_v10, %v4943_v16 }
  0x4f   : > { %4210 = vmatprep.subr.bf16.mxu0 %v4415_v49  ;;  %5882 = vst [vmem:[#allocation5_spill] sm:$0xff] %v5065_v43 }
  0x50   : > { %4211 = vmatpush3.bf16.msra.mxu0 %v4415_v49  ;;  %v717_v49 = vsel %vm676_vm0, %v710_v3, %v716_v55  ;;  %v722_v24 = vrot.slane %v4950_v25, 2  ;;  %v732_v3 = vrot.slane %v3341_v35, 2 }
  0x51   : > { %3879 = vmatpush3.bf16.msra.mxu1 %v4381_v1  ;;  %v4393_v1 = vld [vmem:[%s5869_s1 + $0x60] sm:$0xff]  }
  0x52   : > { %3880 = vmatprep.subr.bf16.mxu1 %v4386_v4  ;;  %v720_v4 = vrot.slane %v3335_v47, 2  ;;  %v4400_v47 = vld [vmem:[%s5869_s1 + $0x58] sm:$0xff]  }
  0x54   : > { %1041 = vmatmul.mubr.bf16.gmra.mxu0 %v711_v42  ;;  %4169 = vmatmul.mubr.bf16.gmra.mxu1 %v703_v53  ;;  %v3338_v42 = vcombine.low %v378_v0, %v380_v58  ;;  %v4958_v53 = vcombine.high %v4940_v10, %v4943_v16  ;;  %v715_v0 = vsel %vm676_vm0, %v708_v30, %v714_v62 }
  0x55   : > { %1048 = vmatprep.mubr.bf16.mxu0 %v719_v60  ;;  %4172 = vmatprep.mubr.bf16.mxu1 %v709_v40  ;;  %v386_v60 = vld [vmem:[%s4638_s13 + $0xf8] sm:$0xf]  ;;  %v388_v40 = vld [vmem:[%s4638_s13 + $0x104] sm:$0xf]  ;;  %v725_v58 = vsel %vm676_vm0, %v718_v29, %v724_v63  ;;  %v721_v20 = vsel %vm676_vm0, %v714_v62, %v720_v4  ;;  %v4406_v29 = vld [vmem:[%s5869_s1 + $0x50] sm:$0xff]  }
  0x56   : > { %3881 = vmatpush3.bf16.msra.mxu1 %v4387_v28  ;;  %v4425_v28 = vld [vmem:[%s5869_s1 + $0x1f8] sm:$0xff]   ;;  %v726_v30 = vrot.slane %v3338_v42, 2  ;;  %v730_v62 = vrot.slane %v4958_v53, 2  ;;  %v3344_v31 = vcombine.low %v386_v60, %v388_v40  ;;  %v4413_v60 = vld [vmem:[%s5869_s1 + $0x48] sm:$0xff]   ;;  %v723_v40 = vsel %vm676_vm0, %v716_v55, %v722_v24 }
  0x57   : > { %3882 = vmatprep.subr.bf16.mxu1 %v4393_v1  ;;  %v4401_v1 = vld [vmem:[%s5869_s1 + $0x18] sm:$0xff]   ;;  %4012 = vmatprep.subr.bf16.mxu0 %v4425_v28  ;;  %v4994_v28 = vld [vmem:[%s4638_s13 + $0x110] sm:$0xf] }
  0x58   : > { %v392_v42 = vld [vmem:[%s4638_s13 + $0x11c] sm:$0xf]  ;;  %v727_v35 = vsel %vm676_vm0, %v720_v4, %v726_v30 }
  0x5a   : > { %3883 = vmatpush3.bf16.msra.mxu1 %v4394_v9  ;;  %v4987_v9 = vld [vmem:[%s4638_s13 + $0xfc] sm:$0xff] }
  0x5b   : > { %3884 = vmatprep.subr.bf16.mxu1 %v4400_v47  ;;  %v3347_v47 = vcombine.low %v4994_v28, %v392_v42  ;;  %v5033_v42 = vld [vmem:[%s4638_s13 + $0x140] sm:$0xf] }
  0x5c   : > { %1049 = vmatmul.mubr.bf16.gmra.mxu0 %v717_v49  ;;  %4173 = vmatmul.mubr.bf16.gmra.mxu1 %v715_v0  ;;  %v4407_v49 = vld [vmem:[%s5869_s1 + $0x10] sm:$0xff]   ;;  %v728_v0 = vrot.slane %v4991_v46, 2  ;;  %5880 = vst [vmem:[#allocation3_spill] sm:$0xff] %v5033_v42 }
  0x5d   : > { %1056 = vmatprep.mubr.bf16.mxu0 %v725_v58  ;;  %4176 = vmatprep.mubr.bf16.mxu1 %v721_v20  ;;  %v5004_v20 = vcombine.high %v4978_v39, %v4987_v9  ;;  %v738_v58 = vrot.slane %v3344_v31, 2  ;;  %v5030_v31 = vld [vmem:[%s4638_s13 + $0x134] sm:$0xf] }
  0x5e   : > { %3885 = vmatpush3.bf16.msra.mxu1 %v4401_v1  ;;  %v731_v1 = vsel %vm676_vm0, %v724_v63, %v730_v62  ;;  %v4418_v63 = vld [vmem:[%s5869_s1 + $0x40] sm:$0xff]   ;;  %5879 = vst [vmem:[#allocation2_spill] sm:$0xff] %v5030_v31 }
  0x5f   : > { %3886 = vmatprep.subr.bf16.mxu1 %v4406_v29  ;;  %v733_v29 = vsel %vm676_vm0, %v726_v30, %v732_v3  ;;  %v736_v4 = vrot.slane %v5004_v20, 2  ;;  %v5027_v30 = vld [vmem:[%s4638_s13 + $0x128] sm:$0xf] }
  0x61   : > { %v737_v34 = vsel %vm676_vm0, %v730_v62, %v736_v4 }
  0x62   : > { %3887 = vmatpush3.bf16.msra.mxu1 %v4407_v49  ;;  %v5036_v49 = vld [vmem:[%s4638_s13 + $0x14c] sm:$0xf] }
  0x63   : > { %3888 = vmatprep.subr.bf16.mxu1 %v4413_v60  ;;  %5881 = vst [vmem:[#allocation4_spill] sm:$0xff] %v5036_v49  ;;  %v744_v60 = vrot.slane %v3347_v47, 2  ;;  %v739_v47 = vsel %vm676_vm0, %v732_v3, %v738_v58  ;;  %v3353_v55 = vcombine.low %v5033_v42, %v5036_v49  ;;  %v5062_v3 = vld [vmem:[%s4638_s13 + $0x158] sm:$0xf] }
  0x64   : > { %1057 = vmatmul.mubr.bf16.gmra.mxu0 %v723_v40  ;;  %4177 = vmatmul.mubr.bf16.gmra.mxu1 %v727_v35  ;;  %v4419_v40 = vld [vmem:[%s5869_s1] sm:$0xff]   ;;  %v5045_v35 = vcombine.low %v4978_v39, %v4987_v9 }
  0x65   : > { %1064 = vmatprep.mubr.bf16.mxu0 %v731_v1  ;;  %4180 = vmatprep.mubr.bf16.mxu1 %v733_v29  ;;  %v4424_v1 = vld [vmem:[%s5869_s1 + $0x238] sm:$0xff]   ;;  %v729_v29 = vsel %vm676_vm0, %v722_v24, %v728_v0  ;;  %v756_v62 = vrot.slane %v3353_v55, 2 }
  0x66   : > { %3889 = vmatpush3.bf16.msra.mxu1 %v4414_v2  ;;  %v3350_v2 = vcombine.low %v5027_v30, %v5030_v31  ;;  %v734_v24 = vrot.slane %v5045_v35, 2  ;;  %v5068_v31 = vld [vmem:[%s4638_s13 + $0x170] sm:$0xf] }
  0x67   : > { %3890 = vmatprep.subr.bf16.mxu1 %v4418_v63  ;;  %v745_v63 = vsel %vm676_vm0, %v738_v58, %v744_v60  ;;  %v5071_v58 = vld [vmem:[%s4638_s13 + $0x17c] sm:$0xf] }
  0x68   : > { %v750_v49 = vrot.slane %v3350_v2, 2  ;;  %v3359_v55 = vcombine.low %v5068_v31, %v5071_v58  ;;  %v4417_v2 = vld [vmem:[%s4638_s13 + $0x188] ss:$0 sps:$4 sm:$0x33]  }
  0x6a   : > { %3891 = vmatpush3.bf16.msra.mxu1 %v4419_v40  ;;  %v735_v40 = vsel %vm676_vm0, %v728_v0, %v734_v24  ;;  %v751_v56 = vsel %vm676_vm0, %v744_v60, %v750_v49  ;;  %v768_v60 = vrot.slane %v3359_v55, 2  ;;  %v4429_v55 = vld [vmem:[%s5869_s1 + $0x1f0] sm:$0xff]  }
  0x6b   : > { %4244 = vmatprep.subr.bf16.mxu1 %v4424_v1 }
  0x6c   : > { %1065 = vmatmul.mubr.bf16.gmra.mxu0 %v729_v29  ;;  %4181 = vmatmul.mubr.bf16.gmra.mxu1 %v739_v47  ;;  %v3356_v29 = vcombine.low %v5062_v3, %v5065_v43  ;;  %v5883_v47 = vrot.slane %v4890_v26, 2 }
  0x6d   : > { %1072 = vmatprep.mubr.bf16.mxu0 %v737_v34  ;;  %4184 = vmatprep.mubr.bf16.mxu1 %v745_v63  ;;  %v757_v34 = vsel %vm676_vm0, %v750_v49, %v756_v62  ;;  %v5884_v63 = vrot.slane %v4893_v38, 2 }
  0x6e   : > { %v743_v42 = vsel %vm676_vm0, %v736_v4, %v5883_v47  ;;  %v762_v0 = vrot.slane %v3356_v29, 2  ;;  %v4521_v29 = vld [vmem:[%s4638_s13 + $0xc] sm:$0xff] }
  0x6f   : > { %v741_v43 = vsel %vm676_vm0, %v734_v24, %v5884_v63  ;;  %v4431_v63 = vld [vmem:[%s4638_s13 + $0x68] ss:$12 sps:$4 sm:$0xff]  }
  0x70   : > { %v763_v4 = vsel %vm676_vm0, %v756_v62, %v762_v0  ;;  %v769_v49 = vsel %vm676_vm0, %v762_v0, %v768_v60  ;;  %v4423_v62 = vld [vmem:[%s4638_s13 + $0x20] ss:$12 sps:$4 sm:$0xff]   ;;  %v4430_v0 = vld [vmem:[%s5869_s1 + $0x1b0] sm:$0xff]  }
  0x74   : > { %1073 = vmatmul.mubr.bf16.gmra.mxu0 %v735_v40  ;;  %4185 = vmatmul.mubr.bf16.gmra.mxu1 %v751_v56  ;;  %v774_v56 = vrot.slane %v4417_v2, 2  ;;  %v4442_v2 = vld [vmem:[%s5869_s1 + $0x228] sm:$0xff]  }
  0x75   : > { %1080 = vmatprep.mubr.bf16.mxu0 %v743_v42  ;;  %4188 = vmatprep.mubr.bf16.mxu1 %v757_v34  ;;  %v233_v42 = vld [vmem:[%s4638_s13] sm:$0xff]  ;;  %v4422_v34 = vld [vmem:[%s4638_s13 + $0x8] ss:$12 sps:$4 sm:$0xff]  }
  0x76   : > { %v775_v40 = vsel %vm676_vm0, %v768_v60, %v774_v56  ;;  %v3388_v47 = vcombine.high %v233_v42, %v4521_v29  ;;  %v3387_v24 = vcombine.low %v233_v42, %v4521_v29  ;;  %v4434_v60 = vld [vmem:[%s5869_s1 + $0x1e8] sm:$0xff]   ;;  %v4439_v56 = vld [vmem:[%s5869_s1 + $0x1a0] sm:$0xff]   ;;  %v4443_v42 = vld [vmem:[%s5869_s1 + $0x1d8] sm:$0xff]  }
  0x77   : > { %v4444_v29 = vld [vmem:[%s5869_s1 + $0x198] sm:$0xff]  }
  0x7c   : > { %1081 = vmatmul.mubr.bf16.gmra.mxu0 %v741_v43  ;;  %4189 = vmatmul.mubr.bf16.gmra.mxu1 %v763_v4  ;;  %v4426_v43 = vld [vmem:[%s5869_s1 + $0x1b8] sm:$0xff]   ;;  %v4438_v4 = vld [vmem:[%s5869_s1 + $0x1e0] sm:$0xff]  }
  0x7d   : > { %1088 = vmatprep.mubr.bf16.mxu0 %v4918_v57  ;;  %4192 = vmatprep.mubr.bf16.mxu1 %v769_v49  ;;  %v4427_v57 = vld [vmem:[%s4638_s13 + $0x38] ss:$12 sps:$4 sm:$0xff]  }
  0x7e   : > { %v4451_v49 = vld [vmem:[%s5869_s1 + $0x220] sm:$0xff]  }
  0x84   : > { %1089 = vmatmul.mubr.bf16.gmra.mxu0 %v4931_v27  ;;  %4193 = vmatmul.mubr.bf16.gmra.mxu1 %v775_v40  ;;  %v4433_v27 = vld [vmem:[%s5869_s1 + $0x230] sm:$0xff]   ;;  %v4436_v40 = vld [vmem:[%s4638_s13 + $0x98] ss:$12 sps:$4 sm:$0xff]  }
  0x85   : > { %1722 = vmatprep.mubr.bf16.mxu1 %v3388_v47  ;;  %4212 = vmatprep.mubr.bf16.mxu0 %v4422_v34  ;;  %v4447_v47 = vld [vmem:[%s5869_s1 + $0x1d0] sm:$0xff]  }
  0x86   : > { %v4465_v34 = vld [vmem:[%s5869_s1 + $0x210] sm:$0xff]  }
  0x8c   : > { %1723 = vmatmul.mubr.bf16.vlgmr.msra.gmra.mxu1 %v3387_v24  ;;  %4213 = vmatmul.mubr.bf16.vlgmr.msra.gmra.mxu0 %v4423_v62  ;;  %v4448_v24 = vld [vmem:[%s5869_s1 + $0x190] sm:$0xff]   ;;  %v2662_v62 = vld [vmem:[%s5156_s21] sm:$0xff] }
  0x8d   : > { %4245 = vmatpush3.bf16.msra.mxu1 %v4424_v1  ;;  %4013 = vmatpush3.bf16.msra.mxu0 %v4426_v43  ;;  %v4428_v1 = vld [vmem:[%s4638_s13 + $0x50] ss:$12 sps:$4 sm:$0xff]  }
  0x8e   : > { %1730 = vmatprep.mubr.bf16.mxu1 %v4661_v18  ;;  %4216 = vmatprep.mubr.bf16.mxu0 %v4427_v57  ;;  %v4435_v18 = vld [vmem:[%s5869_s1 + $0x1a8] sm:$0xff]   ;;  %v2664_v43 = vld [vmem:[%s5156_s21 + $0x10] sm:$0xff] }
  0x8f   : > { %4014 = vmatprep.subr.bf16.mxu0 %v4429_v55  ;;  %4246 = vmatprep.subr.bf16.mxu1 %v4433_v27  ;;  %v4452_v57 = vld [vmem:[%s5869_s1 + $0x1c8] sm:$0xff]   ;;  %v4567_v55 = vmov 0  }
  0x90   : > { %4318 = vset.pattern.permute.xlu0 %v4567_v55  ;;  %4319 = vset.pattern.permute.xlu1 %v4567_v55  ;;  %v2682_v55 = vld [vmem:[%s5156_s21 + $0xa0] sm:$0xff] }
  0x91   : > { %4015 = vmatpush3.bf16.msra.mxu0 %v4430_v0  ;;  %4247 = vmatpush3.bf16.msra.mxu1 %v4433_v27  ;;  %v4440_v27 = vld [vmem:[%s4638_s13 + $0xc8] ss:$12 sps:$4 sm:$0xff]  }
  0x92   : > { %4016 = vmatprep.subr.bf16.mxu0 %v4434_v60  ;;  %4248 = vmatprep.subr.bf16.mxu1 %v4442_v2  ;;  %v4453_v0 = vld [vmem:[%s5869_s1 + $0x188] sm:$0xff]   ;;  %v4456_v60 = vld [vmem:[%s5869_s1 + $0x1c0] sm:$0xff]  }
  0x93   : > { %2696 = vperm.xlu0 %4318, %v2662_v62   ;;  %2706 = vperm.xlu1 %4319, %v2664_v43   ;;  %v2675_v62 = vld [vmem:[%s5156_s21 + $0x68] sm:$0xff]  ;;  %v4455_v43 = vld [vmem:[%s4638_s13 + $0x170] ss:$12 sps:$4 sm:$0xff]  }
  0x94   : > { %1731 = vmatmul.mubr.bf16.gmra.mxu1 %v4681_v32  ;;  %4217 = vmatmul.mubr.bf16.gmra.mxu0 %v4428_v1  ;;  %v4460_v32 = vld [vmem:[%s5869_s1 + $0x218] sm:$0xff]   ;;  %v2663_v1 = vld [vmem:[%s5156_s21 + $0x8] sm:$0xff] }
  0x95   : > { %1738 = vmatprep.mubr.bf16.mxu1 %v4698_v41  ;;  %4220 = vmatprep.mubr.bf16.mxu0 %v4431_v63  ;;  %v4432_v41 = vld [vmem:[%s4638_s13 + $0x80] ss:$12 sps:$4 sm:$0xff]   ;;  %v2665_v63 = vld [vmem:[%s5156_s21 + $0x18] sm:$0xff] }
  0x96   : > { %4017 = vmatpush3.bf16.msra.mxu0 %v4435_v18  ;;  %4249 = vmatpush3.bf16.msra.mxu1 %v4442_v2  ;;  %v4484_v2 = vld [vmem:[%s5869_s1 + $0x200] sm:$0xff]  }
  0x97   : > { %4018 = vmatprep.subr.bf16.mxu0 %v4438_v4  ;;  %4250 = vmatprep.subr.bf16.mxu1 %v4451_v49  ;;  %v4457_v18 = vld [vmem:[%s5869_s1 + $0x180] sm:$0xff]  }
  0x98   : > { %v4441_v4 = vld [vmem:[%s4638_s13 + $0xe0] ss:$12 sps:$4 sm:$0xff]   ;;  %2701 = vperm.xlu0 %4318, %v2663_v1   ;;  %2711 = vperm.xlu1 %4319, %v2665_v63   ;;  %v2689_v1 = vld [vmem:[%s5156_s21 + $0xd8] sm:$0xff] }
  0x99   : > { %v2691_v63 = vld [vmem:[%s5156_s21 + $0xe8] sm:$0xff] }
  0x9a   : > { %4019 = vmatpush3.bf16.msra.mxu0 %v4439_v56  ;;  %4251 = vmatpush3.bf16.msra.mxu1 %v4451_v49  ;;  %v2667_v49 = vld [vmem:[%s5156_s21 + $0x28] sm:$0xff]  ;;  %v2668_v56 = vld [vmem:[%s5156_s21 + $0x30] sm:$0xff] }
  0x9b   : > { %4020 = vmatprep.subr.bf16.mxu0 %v4443_v42  ;;  %4252 = vmatprep.subr.bf16.mxu1 %v4460_v32  ;;  %v2669_v42 = vld [vmem:[%s5156_s21 + $0x38] sm:$0xff] }
  0x9c   : > { %1739 = vmatmul.mubr.bf16.gmra.mxu1 %v4721_v54  ;;  %4221 = vmatmul.mubr.bf16.gmra.mxu0 %v4432_v41  ;;  %v4473_v54 = vld [vmem:[%s5869_s1 + $0x208] sm:$0xff]  }
  0x9d   : > { %1746 = vmatprep.mubr.bf16.mxu1 %v4733_v61  ;;  %4224 = vmatprep.mubr.bf16.mxu0 %v4436_v40  ;;  %v4437_v61 = vld [vmem:[%s4638_s13 + $0xb0] ss:$12 sps:$4 sm:$0xff]   ;;  %v4449_v41 = vld [vmem:[%s4638_s13 + $0x128] ss:$12 sps:$4 sm:$0xff]   ;;  %v2670_v40 = vld [vmem:[%s5156_s21 + $0x40] sm:$0xff] }
  0x9e   : > { %4021 = vmatpush3.bf16.msra.mxu0 %v4444_v29  ;;  %4253 = vmatpush3.bf16.msra.mxu1 %v4460_v32  ;;  %v4446_v32 = vld [vmem:[%s4638_s13 + $0x110] ss:$12 sps:$4 sm:$0xff]  }
  0x9f   : > { %4022 = vmatprep.subr.bf16.mxu0 %v4447_v47  ;;  %4254 = vmatprep.subr.bf16.mxu1 %v4465_v34  ;;  %v2673_v29 = vld [vmem:[%s5156_s21 + $0x58] sm:$0xff]  ;;  %v4450_v47 = vld [vmem:[%s4638_s13 + $0x140] ss:$12 sps:$4 sm:$0xff]  }
  0xa0   : > { %2721 = vperm.xlu1 %4319, %v2667_v49  }
  0xa2   : > { %4023 = vmatpush3.bf16.msra.mxu0 %v4448_v24  ;;  %4255 = vmatpush3.bf16.msra.mxu1 %v4465_v34  ;;  %v4454_v34 = vld [vmem:[%s4638_s13 + $0x158] ss:$12 sps:$4 sm:$0xff]  }
  0xa3   : > { %4024 = vmatprep.subr.bf16.mxu0 %v4452_v57  ;;  %4256 = vmatprep.subr.bf16.mxu1 %v4473_v54  ;;  %v2674_v24 = vld [vmem:[%s5156_s21 + $0x60] sm:$0xff] }
  0xa4   : > { %1747 = vmatmul.mubr.bf16.gmra.mxu1 %v4764_v17  ;;  %4225 = vmatmul.mubr.bf16.gmra.mxu0 %v4437_v61  ;;  %v4445_v17 = vld [vmem:[%s4638_s13 + $0xf8] ss:$12 sps:$4 sm:$0xff]  }
  0xa5   : > { %1754 = vmatprep.mubr.bf16.mxu1 %v4771_v22  ;;  %4228 = vmatprep.mubr.bf16.mxu0 %v4440_v27  ;;  %v2666_v22 = vld [vmem:[%s5156_s21 + $0x20] sm:$0xff]  ;;  %v2681_v61 = vld [vmem:[%s5156_s21 + $0x98] sm:$0xff]  ;;  %v2683_v27 = vld [vmem:[%s5156_s21 + $0xa8] sm:$0xff] }
  0xa6   : > { %4025 = vmatpush3.bf16.msra.mxu0 %v4453_v0  ;;  %4257 = vmatpush3.bf16.msra.mxu1 %v4473_v54  ;;  %v2678_v57 = vld [vmem:[%s5156_s21 + $0x80] sm:$0xff]  ;;  %v2679_v54 = vld [vmem:[%s5156_s21 + $0x88] sm:$0xff]  ;;  %v2684_v0 = vld [vmem:[%s5156_s21 + $0xb0] sm:$0xff] }
  0xa7   : > { %4026 = vmatprep.subr.bf16.mxu0 %v4456_v60  ;;  %4258 = vmatprep.subr.bf16.mxu1 %v4484_v2  ;;  %v2685_v60 = vld [vmem:[%s5156_s21 + $0xb8] sm:$0xff] }
  0xa8   : > { %2716 = vperm.xlu0 %4318, %v2666_v22   ;;  %2731 = vperm.xlu1 %4319, %v2669_v42   ;;  %v4523_v22 = vld [vmem:[%s4638_s13 + $0x90] sm:$0xff] }
  0xaa   : > { %4027 = vmatpush3.bf16.msra.mxu0 %v4457_v18  ;;  %4259 = vmatpush3.bf16.msra.mxu1 %v4484_v2  ;;  %v2687_v2 = vld [vmem:[%s5156_s21 + $0xc8] sm:$0xff]  ;;  %v2693_v18 = vld [vmem:[%s5156_s21 + $0xf8] sm:$0xff] }
  0xac   : > { %1755 = vmatmul.mubr.bf16.gmra.mxu1 %v4797_v45  ;;  %4229 = vmatmul.mubr.bf16.gmra.mxu0 %v4441_v4  ;;  %v2671_v45 = vld [vmem:[%s5156_s21 + $0x48] sm:$0xff]  ;;  %v4468_v4 = vld [vmem:[%s4638_s13 + $0x124] ss:$12 sps:$4 sm:$0xff]  }
  0xad   : > { %1762 = vmatprep.mubr.bf16.mxu1 %v4804_v51  ;;  %4232 = vmatprep.mubr.bf16.mxu0 %v4445_v17  ;;  %v2672_v51 = vld [vmem:[%s5156_s21 + $0x50] sm:$0xff]  ;;  %v4522_v17 = vld [vmem:[%s4638_s13 + $0x84] sm:$0xff] }
  0xae   : > { %2726 = vperm.xlu0 %4318, %v2668_v56   ;;  %2741 = vperm.xlu1 %4319, %v2671_v45   ;;  %v3523_v49 = vcombine.high %v4522_v17, %v4523_v22 }
  0xb2   : > { %2736 = vperm.xlu0 %4318, %v2670_v40   ;;  %2751 = vperm.xlu1 %4319, %v2673_v29   ;;  %v3522_v29 = vcombine.low %v4522_v17, %v4523_v22  ;;  %v4529_v17 = vld [vmem:[%s4638_s13 + $0x20] sm:$0xf] }
  0xb4   : > { %1763 = vmatmul.mubr.bf16.gmra.mxu1 %v4821_v6  ;;  %4233 = vmatmul.mubr.bf16.gmra.mxu0 %v4446_v32  ;;  %v2676_v6 = vld [vmem:[%s5156_s21 + $0x70] sm:$0xff] }
  0xb5   : > { %1770 = vmatprep.mubr.bf16.mxu1 %v4831_v23  ;;  %4236 = vmatprep.mubr.bf16.mxu0 %v4449_v41  ;;  %v2677_v23 = vld [vmem:[%s5156_s21 + $0x78] sm:$0xff] }
  0xb6   : > { %2746 = vperm.xlu0 %4318, %v2672_v51   ;;  %2761 = vperm.xlu1 %4319, %v2675_v62   ;;  %v4477_v51 = vld [vmem:[%s4638_s13 + $0x138] ss:$12 sps:$4 sm:$0xff]  }
  0xba   : > { %2756 = vperm.xlu0 %4318, %v2674_v24   ;;  %2771 = vperm.xlu1 %4319, %v2677_v23   ;;  %v4525_v24 = vld [vmem:[%s4638_s13 + $0xa8] sm:$0xff] }
  0xbc   : > { %1771 = vmatmul.mubr.bf16.gmra.mxu1 %v4853_v48  ;;  %4237 = vmatmul.mubr.bf16.gmra.mxu0 %v4450_v47  ;;  %v5885_v48 = vcombine.high %v4648_v12, %v4651_v13  ;;  %v4479_v47 = vld [vmem:[%s4638_s13 + $0x154] ss:$12 sps:$4 sm:$0xff]  }
  0xbd   : > { %1778 = vmatprep.mubr.bf16.mxu1 %v4861_v59  ;;  %4240 = vmatprep.mubr.bf16.mxu0 %v4454_v34  ;;  %v2680_v59 = vld [vmem:[%s5156_s21 + $0x90] sm:$0xff]  ;;  %v4524_v34 = vld [vmem:[%s4638_s13 + $0x9c] sm:$0xff] }
  0xbe   : > { %2766 = vperm.xlu0 %4318, %v2676_v6   ;;  %2781 = vperm.xlu1 %4319, %v2679_v54   ;;  %v3526_v62 = vcombine.high %v4524_v34, %v4525_v24 }
  0xc2   : > { %2776 = vperm.xlu0 %4318, %v2678_v57   ;;  %2791 = vperm.xlu1 %4319, %v2681_v61  }
  0xc4   : > { %1779 = vmatmul.mubr.bf16.gmra.mxu1 %v4883_v19  ;;  %4241 = vmatmul.mubr.bf16.gmra.mxu0 %v4455_v43  ;;  %v5886_v19 = vcombine.low %v4648_v12, %v4651_v13  ;;  %v5888_v12 = vcombine.low %v4654_v14, %v4684_v33  ;;  %v5889_v13 = vcombine.high %v4689_v37, %v4713_v50 }
  0xc5   : > { %1786 = vmatprep.mubr.bf16.mxu1 %v4903_v44  ;;  %2340 = vmatprep.mubr.bf16.mxu0 %v5885_v48  ;;  %v5887_v44 = vcombine.high %v4654_v14, %v4684_v33  ;;  %v5890_v14 = vcombine.low %v4689_v37, %v4713_v50  ;;  %v5891_v33 = vcombine.high %v4717_v52, %v4745_v5 }
  0xc6   : > { %2786 = vperm.xlu0 %4318, %v2680_v59   ;;  %2801 = vperm.xlu1 %4319, %v2683_v27   ;;  %v5892_v37 = vcombine.low %v4717_v52, %v4745_v5  ;;  %v5893_v50 = vcombine.high %v4749_v7, %v4787_v36  ;;  %v5894_v52 = vcombine.low %v4749_v7, %v4787_v36 }
  0xca   : > { %2796 = vperm.xlu0 %4318, %v2682_v55   ;;  %2811 = vperm.xlu1 %4319, %v2685_v60   ;;  %v4526_v60 = vld [vmem:[%s4638_s13 + $0xb4] sm:$0xff] }
  0xcc   : > { %1787 = vmatmul.mubr.bf16.gmra.mxu1 %v4950_v25  ;;  %2341 = vmatmul.mubr.bf16.vlgmr.msra.gmra.mxu0 %v5886_v19  ;;  %v2686_v25 = vld [vmem:[%s5156_s21 + $0xc0] sm:$0xff]  ;;  %v4482_v19 = vld [vmem:[%s4638_s13 + $0x150] ss:$12 sps:$4 sm:$0xff]  }
  0xcd   : > { %1794 = vmatprep.mubr.bf16.mxu1 %v4958_v53  ;;  %2348 = vmatprep.mubr.bf16.mxu0 %v5887_v44  ;;  %v2688_v53 = vld [vmem:[%s5156_s21 + $0xd0] sm:$0xff]  ;;  %v3525_v44 = vcombine.low %v4524_v34, %v4525_v24 }
  0xce   : > { %2806 = vperm.xlu0 %4318, %v2684_v0   ;;  %2821 = vperm.xlu1 %4319, %v2687_v2   ;;  %v4485_v0 = vld [vmem:[%s4638_s13 + $0x16c] ss:$12 sps:$4 sm:$0xff]  }
  0xcf   : > { %v4530_v34 = vld [vmem:[%s4638_s13 + $0xcc] sm:$0xff] }
  0xd0   : > { %v3531_v24 = vcombine.low %v4530_v34, %v4940_v10  ;;  %v4541_v34 = vld [vmem:[%s4638_s13 + $0x114] sm:$0xff] }
  0xd2   : > { %2816 = vperm.xlu0 %4318, %v2686_v25   ;;  %2831 = vperm.xlu1 %4319, %v2689_v1   ;;  %v3529_v25 = vcombine.high %v4526_v60, %v4879_v8 }
  0xd4   : > { %1795 = vmatmul.mubr.bf16.gmra.mxu1 %v4991_v46  ;;  %2349 = vmatmul.mubr.bf16.gmra.mxu0 %v5888_v12  ;;  %v2690_v46 = vld [vmem:[%s5156_s21 + $0xe0] sm:$0xff] }
  0xd5   : > { %1802 = vmatprep.mubr.bf16.mxu1 %v5004_v20  ;;  %2356 = vmatprep.mubr.bf16.mxu0 %v5889_v13  ;;  %v2692_v20 = vld [vmem:[%s5156_s21 + $0xf0] sm:$0xff] }
  0xd6   : > { %2826 = vperm.xlu0 %4318, %v2688_v53   ;;  %2841 = vperm.xlu1 %4319, %v2691_v63  }
  0xda   : > { %2836 = vperm.xlu0 %4318, %v2690_v46   ;;  %2851 = vperm.xlu1 %4319, %v2693_v18  }
  0xdc   : > { %1803 = vmatmul.mubr.bf16.gmra.mxu1 %v5045_v35  ;;  %2357 = vmatmul.mubr.bf16.gmra.mxu0 %v5890_v14  ;;  %v4474_v35 = vld [vmem:[%s4638_s13 + $0x13c] ss:$12 sps:$4 sm:$0xff]  }
  0xdd   : > { %1810 = vmatprep.mubr.bf16.mxu1 %v4890_v26  ;;  %2364 = vmatprep.mubr.bf16.mxu0 %v5891_v33  ;;  %v4471_v26 = vld [vmem:[%s4638_s13 + $0x120] ss:$12 sps:$4 sm:$0xff]  }
  0xde   : > { %2846 = vperm.xlu0 %4318, %v2692_v20  }
  0xe4   : > { %1811 = vmatmul.mubr.bf16.gmra.mxu1 %v4893_v38  ;;  %2365 = vmatmul.mubr.bf16.gmra.mxu0 %v5892_v37  ;;  %v4527_v37 = vld [vmem:[%s4638_s13 + $0xc0] sm:$0xff] }
  0xe5   : > { %1818 = vmatprep.mubr.bf16.mxu1 %v4468_v4  ;;  %2372 = vmatprep.mubr.bf16.mxu0 %v5893_v50  ;;  %v4488_v4 = vld [vmem:[%s4638_s13 + $0x168] ss:$12 sps:$4 sm:$0xff]   ;;  %v3528_v50 = vcombine.low %v4526_v60, %v4527_v37 }
  0xec   : > { %v3756_v56 = vpop.f32.mrf.mxu0  ;;  %v3828_v38 = vpop.f32.mrf.mxu1  ;;  %1819 = vmatmul.mubr.bf16.gmra.mxu1 %v4471_v26  ;;  %2373 = vmatmul.mubr.bf16.gmra.mxu0 %v5894_v52  ;;  %v3532_v26 = vcombine.high %v4886_v21, %v4940_v10 }
  0xed   : > { %1826 = vmatprep.mubr.bf16.mxu1 %v4474_v35  ;;  %2380 = vmatprep.mubr.bf16.mxu0 %v3523_v49  ;;  %v4528_v35 = vld [vmem:[%s4638_s13 + $0x14] sm:$0xf] }
  0xee   : > { %v3757_v5 = vpop.f32.mrf.mxu0  ;;  %v3829_v42 = vpop.f32.mrf.mxu1  ;;  %v3509_v22 = vcombine.low %v4528_v35, %v4529_v17 }
  0xef   : > { %v5274_v32 = vadd.f32 %v3757_v5, %v3756_v56  ;;  %v5276_v41 = vadd.f32 %v3829_v42, %v3828_v38 }
  0xf0   : > { %v3759_v40 = vpop.f32.mrf.mxu0  ;;  %v3831_v45 = vpop.f32.mrf.mxu1 }
  0xf2   : > { %v3760_v6 = vpop.f32.mrf.mxu0  ;;  %v3832_v7 = vpop.f32.mrf.mxu1 }
  0xf3   : > { %v5282_v36 = vadd.f32 %v3760_v6, %v3759_v40  ;;  %v5284_v23 = vadd.f32 %v3832_v7, %v3831_v45  ;;  %v4531_v6 = vld [vmem:[%s4638_s13 + $0x44] sm:$0xf]  ;;  %v4532_v7 = vld [vmem:[%s4638_s13 + $0x50] sm:$0xf] }
  0xf4   : > { %v3762_v43 = vpop.f32.mrf.mxu0  ;;  %v3834_v57 = vpop.f32.mrf.mxu1  ;;  %1827 = vmatmul.mubr.bf16.gmra.mxu1 %v4477_v51  ;;  %2381 = vmatmul.mubr.bf16.gmra.mxu0 %v3522_v29 }
  0xf5   : > { %1834 = vmatprep.mubr.bf16.mxu1 %v4479_v47  ;;  %2388 = vmatprep.mubr.bf16.mxu0 %v3526_v62  ;;  %v3535_v62 = vcombine.high %v4943_v16, %v4978_v39 }
  0xf6   : > { %v3763_v54 = vpop.f32.mrf.mxu0  ;;  %v3835_v48 = vpop.f32.mrf.mxu1 }
  0xf7   : > { %v3764_v59 = vadd.f32 %v3763_v54, %v3762_v43  ;;  %v5286_v61 = vadd.f32 %v3835_v48, %v3834_v57  ;;  %v3515_v43 = vcombine.low %v4531_v6, %v4532_v7  ;;  %v4543_v6 = vld [vmem:[%s4638_s13 + $0xb0] sm:$0xf] }
  0xf8   : > { %v3765_v55 = vpop.f32.mrf.mxu0  ;;  %v3837_v27 = vpop.f32.mrf.mxu1 }
  0xfa   : > { %v3766_v2 = vpop.f32.mrf.mxu0  ;;  %v3838_v12 = vpop.f32.mrf.mxu1 }
  0xfb   : > { %v5292_v13 = vadd.f32 %v3766_v2, %v3765_v55  ;;  %v5294_v53 = vadd.f32 %v3838_v12, %v3837_v27 }
  0xfc   : > { %v3768_v1 = vpop.f32.mrf.mxu0  ;;  %v3840_v46 = vpop.f32.mrf.mxu1  ;;  %1835 = vmatmul.mubr.bf16.gmra.mxu1 %v4482_v19  ;;  %2389 = vmatmul.mubr.bf16.gmra.mxu0 %v3525_v44  ;;  %v5895_v44 = vcombine.low %v4756_v11, %v4759_v15  ;;  %v4533_v11 = vld [vmem:[%s4638_s13 + $0x5c] sm:$0xf]  ;;  %v4534_v15 = vld [vmem:[%s4638_s13 + $0x68] sm:$0xf] }
  0xfd   : > { %1842 = vmatprep.mubr.bf16.mxu1 %v4485_v0  ;;  %2396 = vmatprep.mubr.bf16.mxu0 %v3529_v25 }
  0xfe   : > { %v3769_v63 = vpop.f32.mrf.mxu0  ;;  %v3841_v14 = vpop.f32.mrf.mxu1 }
  0xff   : > { %v5296_v33 = vadd.f32 %v3769_v63, %v3768_v1  ;;  %v5298_v8 = vadd.f32 %v3841_v14, %v3840_v46  ;;  %v3534_v46 = vcombine.low %v4943_v16, %v4978_v39  ;;  %v3518_v63 = vcombine.low %v4533_v11, %v4534_v15  ;;  %v4535_v14 = vld [vmem:[%s4638_s13 + $0x108] sm:$0xff] }
 0x100   : > { %v3771_v20 = vpop.f32.mrf.mxu0  ;;  %v3843_v18 = vpop.f32.mrf.mxu1  ;;  %v4545_v11 = vld [vmem:[%s4638_s13 + $0xc8] sm:$0xf] }
 0x102   : > { %v3772_v49 = vpop.f32.mrf.mxu0  ;;  %v3844_v56 = vpop.f32.mrf.mxu1 }
 0x103   : > { %v5306_v38 = vadd.f32 %v3772_v49, %v3771_v20  ;;  %v5308_v52 = vadd.f32 %v3844_v56, %v3843_v18  ;;  %v3538_v20 = vcombine.high %v4987_v9, %v4535_v14  ;;  %v4536_v18 = vld [vmem:[%s4638_s13 + $0x74] sm:$0xf] }
 0x104   : > { %v3774_v5 = vpop.f32.mrf.mxu0  ;;  %v3846_v42 = vpop.f32.mrf.mxu1  ;;  %1843 = vmatmul.mubr.bf16.gmra.mxu1 %v4488_v4  ;;  %2397 = vmatmul.mubr.bf16.gmra.mxu0 %v3528_v50  ;;  %v4537_v4 = vld [vmem:[%s4638_s13 + $0x80] sm:$0xf] }
 0x105   : > { %2404 = vmatprep.mubr.bf16.mxu0 %v3532_v26  ;;  %4260 = vmatprep.mubr.bf16.mxu1 %v3509_v22  ;;  %v3521_v37 = vcombine.low %v4536_v18, %v4537_v4  ;;  %v4548_v4 = vld [vmem:[%s4638_s13 + $0xd4] sm:$0xf] }
 0x106   : > { %v3775_v40 = vpop.f32.mrf.mxu0  ;;  %v3847_v21 = vpop.f32.mrf.mxu1 }
 0x107   : > { %v3776_v45 = vadd.f32 %v3775_v40, %v3774_v5  ;;  %v5310_v51 = vadd.f32 %v3847_v21, %v3846_v42  ;;  %v3537_v42 = vcombine.low %v4987_v9, %v4535_v14  ;;  %v4538_v40 = vld [vmem:[%s4638_s13 + $0x8c] sm:$0xf]  ;;  %v4539_v21 = vld [vmem:[%s4638_s13 + $0x98] sm:$0xf] }
 0x108   : > { %v3777_v29 = vpop.f32.mrf.mxu0  ;;  %v3849_v47 = vpop.f32.mrf.mxu1  ;;  %v4546_v14 = vld [vmem:[%s4638_s13 + $0x12c] sm:$0xff] }
 0x10a   : > { %v3778_v57 = vpop.f32.mrf.mxu0  ;;  %v3850_v54 = vpop.f32.mrf.mxu1 }
 0x10b   : > { %v3779_v48 = vadd.f32 %v3778_v57, %v3777_v29  ;;  %v5318_v55 = vadd.f32 %v3850_v54, %v3849_v47  ;;  %v3524_v29 = vcombine.low %v4538_v40, %v4539_v21 }
 0x10c   : > { %v3780_v27 = vpop.f32.mrf.mxu0  ;;  %v4166_v19 = vpop.f32.mrf.mxu1  ;;  %2405 = vmatmul.mubr.bf16.gmra.mxu0 %v3531_v24  ;;  %4261 = vmatmul.mubr.bf16.vlgmr.msra.gmra.mxu1 %v5895_v44 }
 0x10d   : > { %v5323_v10 = vadd.f32 %v4166_v19, %v3764_v59  ;;  %2412 = vmatprep.mubr.bf16.mxu0 %v3535_v62  ;;  %4264 = vmatprep.mubr.bf16.mxu1 %v3515_v43  ;;  %v4542_v62 = vld [vmem:[%s4638_s13 + $0xa4] sm:$0xf] }
 0x10e   : > { %v3781_v0 = vpop.f32.mrf.mxu0  ;;  %v1163_v60 = vpop.f32.mrf.mxu1  ;;  %v3527_v7 = vcombine.low %v4542_v62, %v4543_v6  ;;  %v4552_v62 = vld [vmem:[%s4638_s13 + $0x144] sm:$0xff]  ;;  %v4553_v6 = vld [vmem:[%s4638_s13 + $0x150] sm:$0xff] }
 0x10f   : > { %v3782_v25 = vadd.f32 %v3781_v0, %v3780_v27  ;;  %v5326_v2 = vadd.f32 %v5274_v32, %v1163_v60 }
 0x110   : > { %v3783_v12 = vpop.f32.mrf.mxu0  ;;  %v4167_v1 = vpop.f32.mrf.mxu1 }
 0x111   : > { %v5333_v59 = vadd.f32 %v4167_v1, %v5292_v13 }
 0x112   : > { %v3784_v50 = vpop.f32.mrf.mxu0  ;;  %v1166_v32 = vpop.f32.mrf.mxu1 }
 0x113   : > { %v3785_v26 = vadd.f32 %v3784_v50, %v3783_v12  ;;  %v5340_v35 = vadd.f32 %v5282_v36, %v1166_v32 }
 0x114   : > { %v3786_v39 = vpop.f32.mrf.mxu0  ;;  %v4170_v16 = vpop.f32.mrf.mxu1  ;;  %2413 = vmatmul.mubr.bf16.gmra.mxu0 %v3534_v46  ;;  %4265 = vmatmul.mubr.bf16.gmra.mxu1 %v3518_v63  ;;  %v4544_v46 = vld [vmem:[%s4638_s13 + $0xbc] sm:$0xf] }
 0x115   : > { %v5342_v13 = vadd.f32 %v4170_v16, %v3776_v45  ;;  %2420 = vmatprep.mubr.bf16.mxu0 %v3538_v20  ;;  %4268 = vmatprep.mubr.bf16.mxu1 %v3521_v37  ;;  %v4540_v45 = vld [vmem:[%s4638_s13 + $0x120] sm:$0xff]  ;;  %v3530_v15 = vcombine.low %v4544_v46, %v4545_v11  ;;  %v4547_v20 = vld [vmem:[%s4638_s13 + $0x138] sm:$0xff] }
 0x116   : > { %v3787_v17 = vpop.f32.mrf.mxu0  ;;  %v1179_v22 = vpop.f32.mrf.mxu1  ;;  %v3541_v24 = vcombine.high %v4541_v34, %v4540_v45  ;;  %v3540_v1 = vcombine.low %v4541_v34, %v4540_v45  ;;  %v3544_v18 = vcombine.high %v4546_v14, %v4547_v20  ;;  %v4549_v37 = vld [vmem:[%s4638_s13 + $0xe0] sm:$0xf]  ;;  %v4550_v45 = vld [vmem:[%s4638_s13 + $0xec] sm:$0xf] }
 0x117   : > { %v3788_v49 = vadd.f32 %v3787_v17, %v3786_v39  ;;  %v5345_v56 = vadd.f32 %v5296_v33, %v1179_v22  ;;  %v3533_v50 = vcombine.low %v4548_v4, %v4549_v37  ;;  %v4556_v4 = vld [vmem:[%s4638_s13 + $0x15c] sm:$0xff]  ;;  %v4557_v37 = vld [vmem:[%s4638_s13 + $0x168] sm:$0xff] }
 0x118   : > { %v3789_v36 = vpop.f32.mrf.mxu0  ;;  %v4171_v5 = vpop.f32.mrf.mxu1 }
 0x119   : > { %v5350_v47 = vadd.f32 %v4171_v5, %v3779_v48 }
 0x11a   : > { %v3790_v43 = vpop.f32.mrf.mxu0  ;;  %v1182_v57 = vpop.f32.mrf.mxu1 }
 0x11b   : > { %v3791_v54 = vadd.f32 %v3790_v43, %v3789_v36  ;;  %v5357_v33 = vadd.f32 %v5306_v38, %v1182_v57  ;;  %v4554_v43 = vld [vmem:[%s4638_s13 + $0x104] sm:$0xf] }
 0x11c   : > { %v3792_v9 = vpop.f32.mrf.mxu0  ;;  %v4174_v27 = vpop.f32.mrf.mxu1  ;;  %2421 = vmatmul.mubr.bf16.gmra.mxu0 %v3537_v42  ;;  %4269 = vmatmul.mubr.bf16.gmra.mxu1 %v3524_v29  ;;  %v3543_v29 = vcombine.low %v4546_v14, %v4547_v20  ;;  %v3539_v57 = vcombine.low %v4554_v43, %v4994_v28  ;;  %v4555_v14 = vld [vmem:[%s4638_s13 + $0x11c] sm:$0xf] }
 0x11d   : > { %v5359_v48 = vadd.f32 %v4174_v27, %v3788_v49  ;;  %2428 = vmatprep.mubr.bf16.mxu0 %v3541_v24  ;;  %4272 = vmatprep.mubr.bf16.mxu1 %v3527_v7  ;;  %v3547_v7 = vcombine.high %v4552_v62, %v4553_v6  ;;  %v3542_v20 = vcombine.low %v4555_v14, %v5027_v30 }
 0x11e   : > { %v3793_v19 = vpop.f32.mrf.mxu0  ;;  %v1195_v44 = vpop.f32.mrf.mxu1 }
 0x11f   : > { %v3794_v0 = vadd.f32 %v3793_v19, %v3792_v9  ;;  %v5361_v60 = vadd.f32 %v3782_v25, %v1195_v44 }
 0x120   : > { %v3795_v38 = vpop.f32.mrf.mxu0  ;;  %v4175_v12 = vpop.f32.mrf.mxu1 }
 0x121   : > { %v5365_v63 = vadd.f32 %v4175_v12, %v3791_v54 }
 0x122   : > { %v3796_v32 = vpop.f32.mrf.mxu0  ;;  %v1198_v39 = vpop.f32.mrf.mxu1 }
 0x123   : > { %v3797_v16 = vadd.f32 %v3796_v32, %v3795_v38  ;;  %v5371_v25 = vadd.f32 %v3785_v26, %v1198_v39  ;;  %v4551_v26 = vld [vmem:[%s4638_s13 + $0xf8] sm:$0xf]  ;;  %v5896_v32 = vld [vmem:[#allocation3_spill] sm:$0xff]  ;;  %v5897_v39 = vld [vmem:[#allocation2_spill] sm:$0xff] }
 0x124   : > { %v3798_v17 = vpop.f32.mrf.mxu0  ;;  %v4178_v22 = vpop.f32.mrf.mxu1  ;;  %2429 = vmatmul.mubr.bf16.gmra.mxu0 %v3540_v1  ;;  %4273 = vmatmul.mubr.bf16.gmra.mxu1 %v3530_v15  ;;  %v3536_v34 = vcombine.low %v4550_v45, %v4551_v26  ;;  %v3546_v15 = vcombine.low %v4552_v62, %v4553_v6  ;;  %v3549_v62 = vcombine.low %v4556_v4, %v4557_v37  ;;  %v5898_v6 = vld [vmem:[#allocation4_spill] sm:$0xff] }
 0x125   : > { %2436 = vmatprep.mubr.bf16.mxu0 %v3544_v18  ;;  %4276 = vmatprep.mubr.bf16.mxu1 %v3533_v50  ;;  %v3550_v50 = vcombine.high %v4556_v4, %v4557_v37 }
 0x126   : > { %v3799_v49 = vpop.f32.mrf.mxu0  ;;  %v1211_v36 = vpop.f32.mrf.mxu1 }
 0x127   : > { %v3800_v5 = vadd.f32 %v3799_v49, %v3798_v17  ;;  %v5373_v42 = vadd.f32 %v3794_v0, %v1211_v36 }
 0x128   : > { %v3801_v40 = vpop.f32.mrf.mxu0  ;;  %v4179_v21 = vpop.f32.mrf.mxu1 }
 0x129   : > { %v5377_v24 = vadd.f32 %v4178_v22, %v3800_v5 }
 0x12a   : > { %v3802_v54 = vpop.f32.mrf.mxu0  ;;  %v1214_v9 = vpop.f32.mrf.mxu1 }
 0x12b   : > { %v3803_v27 = vadd.f32 %v3802_v54, %v3801_v40  ;;  %v5383_v19 = vadd.f32 %v3797_v16, %v1214_v9  ;;  %v3545_v16 = vcombine.low %v5897_v39, %v5896_v32  ;;  %v5899_v9 = vld [vmem:[#allocation5_spill] sm:$0xff] }
 0x12c   : > { %v3804_v44 = vpop.f32.mrf.mxu0  ;;  %v4182_v0 = vpop.f32.mrf.mxu1  ;;  %2437 = vmatmul.mubr.bf16.gmra.mxu0 %v3543_v29  ;;  %4277 = vmatmul.mubr.bf16.gmra.mxu1 %v3536_v34  ;;  %v2012_v29 = vld [vmem:[%s4638_s13 + $0x180] sm:$0xff] }
 0x12d   : > { %v5385_v38 = vadd.f32 %v4179_v21, %v3803_v27  ;;  %2444 = vmatprep.mubr.bf16.mxu0 %v3547_v7  ;;  %4280 = vmatprep.mubr.bf16.mxu1 %v3539_v57  ;;  %v3548_v7 = vcombine.low %v5898_v6, %v5062_v3  ;;  %v4558_v57 = vld [vmem:[%s4638_s13 + $0x174] sm:$0xff]  ;;  %v3551_v27 = vcombine.low %v5899_v9, %v5068_v31  ;;  %v2013_v3 = vld [vmem:[%s4638_s13 + $0x188] sm:$0xf]  ;;  %s3262_s13 = sshll.u32 %s5951_s29, 2  ;;  %s3263_s29 = sshll.u32 %s4620_s27, 1 }
 0x12e   : > { %v3805_v12 = vpop.f32.mrf.mxu0  ;;  %v1227_v1 = vpop.f32.mrf.mxu1  ;;  %v3553_v54 = vcombine.high %v4558_v57, %v2012_v29  ;;  %v3552_v32 = vcombine.low %v4558_v57, %v2012_v29  ;;  %v3554_v39 = vcombine.low %v5071_v58, %v2013_v3  ;;  %s5695_s14 = scalar_lea.vmem %s5871_s3, %s3262_s13  ;;  %s231_s19 = scalar_lea.vmem %s5872_s4, %s3263_s29 }
 0x12f   : > { %v3806_v46 = vadd.f32 %v3805_v12, %v3804_v44 }
 0x130   : > { %v3807_v28 = vpop.f32.mrf.mxu0  ;;  %v4183_v11 = vpop.f32.mrf.mxu1 }
 0x131   : > { %v5389_v18 = vadd.f32 %v3806_v46, %v1227_v1 }
 0x132   : > { %v3808_v17 = vpop.f32.mrf.mxu0  ;;  %v1230_v22 = vpop.f32.mrf.mxu1 }
 0x133   : > { %v3809_v49 = vadd.f32 %v3808_v17, %v3807_v28 }
 0x134   : > { %v3810_v36 = vpop.f32.mrf.mxu0  ;;  %v4186_v5 = vpop.f32.mrf.mxu1  ;;  %2445 = vmatmul.mubr.bf16.gmra.mxu0 %v3546_v15  ;;  %4281 = vmatmul.mubr.bf16.gmra.mxu1 %v3542_v20 }
 0x135   : > { %v5395_v40 = vadd.f32 %v3809_v49, %v1230_v22  ;;  %2452 = vmatprep.mubr.bf16.mxu0 %v3550_v50  ;;  %4284 = vmatprep.mubr.bf16.mxu1 %v3545_v16 }
 0x136   : > { %v3811_v30 = vpop.f32.mrf.mxu0  ;;  %v1243_v21 = vpop.f32.mrf.mxu1 }
 0x137   : > { %v3812_v45 = vadd.f32 %v3811_v30, %v3810_v36 }
 0x138   : > { %v3813_v26 = vpop.f32.mrf.mxu0  ;;  %v4187_v34 = vpop.f32.mrf.mxu1 }
 0x139   : > { %v5400_v43 = vadd.f32 %v4182_v0, %v3812_v45 }
 0x13a   : > { %v3814_v44 = vpop.f32.mrf.mxu0  ;;  %v1246_v12 = vpop.f32.mrf.mxu1 }
 0x13b   : > { %v3815_v1 = vadd.f32 %v3814_v44, %v3813_v26 }
 0x13c   : > { %v3816_v46 = vpop.f32.mrf.mxu0  ;;  %v4190_v28 = vpop.f32.mrf.mxu1  ;;  %2453 = vmatmul.mubr.bf16.gmra.mxu0 %v3549_v62  ;;  %4285 = vmatmul.mubr.bf16.gmra.mxu1 %v3548_v7 }
 0x13d   : > { %v5405_v15 = vadd.f32 %v4183_v11, %v3815_v1  ;;  %v5408_v14 = vadd.f32 %v4190_v28, %v5286_v61  ;;  %2460 = vmatprep.mubr.bf16.mxu0 %v3553_v54  ;;  %4288 = vmatprep.mubr.bf16.mxu1 %v3551_v27 }
 0x13e   : > { %v3817_v0 = vpop.f32.mrf.mxu0  ;;  %v1259_v20 = vpop.f32.mrf.mxu1 }
 0x13f   : > { %v3818_v4 = vadd.f32 %v3817_v0, %v3816_v46  ;;  %v5412_v31 = vadd.f32 %v5276_v41, %v1259_v20 }
 0x140   : > { %v3819_v37 = vpop.f32.mrf.mxu0  ;;  %v4191_v50 = vpop.f32.mrf.mxu1 }
 0x141   : > { %v5415_v16 = vadd.f32 %v3818_v4, %v1243_v21  ;;  %v5418_v11 = vadd.f32 %v4191_v50, %v5294_v53 }
 0x142   : > { %v3820_v61 = vpop.f32.mrf.mxu0  ;;  %v1262_v17 = vpop.f32.mrf.mxu1 }
 0x143   : > { %v3821_v22 = vadd.f32 %v3820_v61, %v3819_v37  ;;  %v5421_v49 = vadd.f32 %v5284_v23, %v1262_v17 }
 0x144   : > { %v3822_v36 = vpop.f32.mrf.mxu0  ;;  %v4194_v30 = vpop.f32.mrf.mxu1  ;;  %2461 = vmatmul.mubr.bf16.gmra.mxu0 %v3552_v32  ;;  %4289 = vmatmul.mubr.bf16.gmra.mxu1 %v3554_v39 }
 0x145   : > { %v5423_v41 = vadd.f32 %v3821_v22, %v1246_v12  ;;  %v5426_v29 = vadd.f32 %v4194_v30, %v5310_v51 }
 0x146   : > { %v3823_v58 = vpop.f32.mrf.mxu0  ;;  %v1275_v21 = vpop.f32.mrf.mxu1 }
 0x147   : > { %v3824_v45 = vadd.f32 %v3823_v58, %v3822_v36  ;;  %v5429_v53 = vadd.f32 %v5298_v8, %v1275_v21 }
 0x148   : > { %v3825_v26 = vpop.f32.mrf.mxu0  ;;  %v4195_v62 = vpop.f32.mrf.mxu1 }
 0x149   : > { %v5431_v6 = vadd.f32 %v4186_v5, %v3824_v45  ;;  %v5434_v23 = vadd.f32 %v4195_v62, %v5318_v55 }
 0x14a   : > { %v3826_v7 = vpop.f32.mrf.mxu0  ;;  %v1278_v57 = vpop.f32.mrf.mxu1 }
 0x14b   : > { %v3827_v54 = vadd.f32 %v3826_v7, %v3825_v26  ;;  %v5437_v9 = vadd.f32 %v5308_v52, %v1278_v57 }
 0x14c   : > { %v3892_v51 = vpop.f32.mrf.mxu1  ;;  %v4214_v27 = vpop.f32.mrf.mxu0 }
 0x14d   : > { %v5439_v44 = vadd.f32 %v4187_v34, %v3827_v54 }
 0x14e   : > { %v3893_v12 = vpop.f32.mrf.mxu1  ;;  %v1885_v8 = vpop.f32.mrf.mxu0 }
 0x14f   : > { %v3894_v1 = vadd.f32 %v3893_v12, %v3892_v51 }
 0x150   : > { %v3895_v46 = vpop.f32.mrf.mxu1  ;;  %v4215_v28 = vpop.f32.mrf.mxu0 }
 0x151   : > { %v1725_v5 = vadd.f32 %v3894_v1, %v5326_v2 }
 0x152   : > { %v3896_v3 = vpop.f32.mrf.mxu1  ;;  %v1888_v55 = vpop.f32.mrf.mxu0 }
 0x153   : > { %v5442_v0 = vadd.f32 %v1885_v8, %v1725_v5  ;;  %v3897_v20 = vadd.f32 %v3896_v3, %v3895_v46 }
 0x154   : > { %v3898_v4 = vpop.f32.mrf.mxu1  ;;  %v4218_v37 = vpop.f32.mrf.mxu0 }
 0x155   : > { %v1728_v52 = vadd.f32 %v3897_v20, %v5340_v35 }
 0x156   : > { %v3899_v50 = vpop.f32.mrf.mxu1  ;;  %v1901_v32 = vpop.f32.mrf.mxu0 }
 0x157   : > { %v5445_v34 = vadd.f32 %v1888_v55, %v1728_v52  ;;  %v3900_v39 = vadd.f32 %v3899_v50, %v3898_v4 }
 0x158   : > { %v3901_v61 = vpop.f32.mrf.mxu1  ;;  %v4219_v17 = vpop.f32.mrf.mxu0 }
 0x159   : > { %v1733_v22 = vadd.f32 %v3900_v39, %v5323_v10 }
 0x15a   : > { %v3902_v36 = vpop.f32.mrf.mxu1  ;;  %v1904_v2 = vpop.f32.mrf.mxu0 }
 0x15b   : > { %v3903_v30 = vadd.f32 %v3902_v36, %v3901_v61  ;;  %v5448_v58 = vadd.f32 %v4214_v27, %v1733_v22 }
 0x15c   : > { %v3904_v21 = vpop.f32.mrf.mxu1  ;;  %v4222_v45 = vpop.f32.mrf.mxu0 }
 0x15d   : > { %v1736_v26 = vadd.f32 %v3903_v30, %v5333_v59 }
 0x15e   : > { %v3905_v62 = vpop.f32.mrf.mxu1  ;;  %v1917_v35 = vpop.f32.mrf.mxu0 }
 0x15f   : > { %v3906_v7 = vadd.f32 %v3905_v62, %v3904_v21  ;;  %v5451_v57 = vadd.f32 %v4215_v28, %v1736_v26 }
 0x160   : > { %v3907_v54 = vpop.f32.mrf.mxu1  ;;  %v4223_v51 = vpop.f32.mrf.mxu0 }
 0x161   : > { %v1741_v12 = vadd.f32 %v3906_v7, %v5345_v56 }
 0x162   : > { %v3908_v8 = vpop.f32.mrf.mxu1  ;;  %v1920_v10 = vpop.f32.mrf.mxu0 }
 0x163   : > { %v3909_v1 = vadd.f32 %v3908_v8, %v3907_v54  ;;  %v5454_v46 = vadd.f32 %v1901_v32, %v1741_v12 }
 0x164   : > { %v3910_v27 = vpop.f32.mrf.mxu1  ;;  %v5456_v5 = vpop.f32.mrf.mxu0 }
 0x165   : > { %v1744_v3 = vadd.f32 %v3909_v1, %v5357_v33 }
 0x166   : > { %v3911_v59 = vpop.f32.mrf.mxu1  ;;  %v1933_v55 = vpop.f32.mrf.mxu0 }
 0x167   : > { %v3912_v20 = vadd.f32 %v3911_v59, %v3910_v27  ;;  %v5459_v4 = vadd.f32 %v1904_v2, %v1744_v3 }
 0x168   : > { %v3913_v28 = vpop.f32.mrf.mxu1  ;;  %v5461_v52 = vpop.f32.mrf.mxu0 }
 0x169   : > { %v1749_v56 = vadd.f32 %v3912_v20, %v5342_v13 }
 0x16a   : > { %v3914_v50 = vpop.f32.mrf.mxu1  ;;  %v1936_v39 = vpop.f32.mrf.mxu0 }
 0x16b   : > { %v3915_v61 = vadd.f32 %v3914_v50, %v3913_v28  ;;  %v5464_v32 = vadd.f32 %v4218_v37, %v1749_v56 }
 0x16c   : > { %v3916_v22 = vpop.f32.mrf.mxu1  ;;  %v5466_v36 = vpop.f32.mrf.mxu0 }
 0x16d   : > { %v1752_v33 = vadd.f32 %v3915_v61, %v5350_v47 }
 0x16e   : > { %v3917_v30 = vpop.f32.mrf.mxu1  ;;  %v5469_v21 = vpop.f32.mrf.mxu0 }
 0x16f   : > { %v3918_v2 = vadd.f32 %v3917_v30, %v3916_v22  ;;  %v5471_v26 = vadd.f32 %v4219_v17, %v1752_v33 }
 0x170   : > { %v3919_v62 = vpop.f32.mrf.mxu1  ;;  %v5473_v7 = vpop.f32.mrf.mxu0 }
 0x171   : > { %v1757_v13 = vadd.f32 %v3918_v2, %v5361_v60 }
 0x172   : > { %v3920_v54 = vpop.f32.mrf.mxu1  ;;  %v5476_v12 = vpop.f32.mrf.mxu0 }
 0x173   : > { %v3921_v37 = vadd.f32 %v3920_v54, %v3919_v62  ;;  %v5478_v8 = vadd.f32 %v1917_v35, %v1757_v13 }
 0x174   : > { %v3922_v1 = vpop.f32.mrf.mxu1  ;;  %v5480_v27 = vpop.f32.mrf.mxu0 }
 0x175   : > { %v1760_v47 = vadd.f32 %v3921_v37, %v5371_v25 }
 0x176   : > { %v3923_v3 = vpop.f32.mrf.mxu1  ;;  %v5483_v59 = vpop.f32.mrf.mxu0 }
 0x177   : > { %v3924_v17 = vadd.f32 %v3923_v3, %v3922_v1  ;;  %v5485_v20 = vadd.f32 %v1920_v10, %v1760_v47 }
 0x178   : > { %v3925_v28 = vpop.f32.mrf.mxu1  ;;  %v5487_v56 = vpop.f32.mrf.mxu0 }
 0x179   : > { %v1765_v60 = vadd.f32 %v3924_v17, %v5359_v48 }
 0x17a   : > { %v3926_v50 = vpop.f32.mrf.mxu1  ;;  %v5490_v61 = vpop.f32.mrf.mxu0 }
 0x17b   : > { %v3927_v35 = vadd.f32 %v3926_v50, %v3925_v28  ;;  %v5492_v22 = vadd.f32 %v4222_v45, %v1765_v60 }
 0x17c   : > { %v3928_v33 = vpop.f32.mrf.mxu1  ;;  %v5494_v30 = vpop.f32.mrf.mxu0 }
 0x17d   : > { %v1768_v25 = vadd.f32 %v3927_v35, %v5365_v63 }
 0x17e   : > { %v3929_v2 = vpop.f32.mrf.mxu1  ;;  %v5497_v62 = vpop.f32.mrf.mxu0 }
 0x17f   : > { %v3930_v10 = vadd.f32 %v3929_v2, %v3928_v33  ;;  %v5499_v13 = vadd.f32 %v4223_v51, %v1768_v25 }
 0x180   : > { %v3931_v54 = vpop.f32.mrf.mxu1  ;;  %v5501_v37 = vpop.f32.mrf.mxu0 }
 0x181   : > { %v1773_v48 = vadd.f32 %v3930_v10, %v5373_v42 }
 0x182   : > { %v3932_v1 = vpop.f32.mrf.mxu1  ;;  %v5504_v47 = vpop.f32.mrf.mxu0 }
 0x183   : > { %v3933_v45 = vadd.f32 %v3932_v1, %v3931_v54  ;;  %v5506_v3 = vadd.f32 %v1933_v55, %v1773_v48 }
 0x184   : > { %v3934_v17 = vpop.f32.mrf.mxu1  ;;  %v5508_v28 = vpop.f32.mrf.mxu0 }
 0x185   : > { %5900 = vst [vmem:[#allocation3_spill] sm:$0xff] %v5506_v3  ;;  %5901 = vst [vmem:[#allocation2_spill] sm:$0xff] %v5508_v28  ;;  %v1776_v63 = vadd.f32 %v3933_v45, %v5383_v19 }
 0x186   : > { %v3935_v60 = vpop.f32.mrf.mxu1  ;;  %v5511_v50 = vpop.f32.mrf.mxu0 }
 0x187   : > { %v3936_v51 = vadd.f32 %v3935_v60, %v3934_v17  ;;  %v5513_v35 = vadd.f32 %v1936_v39, %v1776_v63 }
 0x188   : > { %v3937_v33 = vpop.f32.mrf.mxu1  ;;  %v5515_v25 = vpop.f32.mrf.mxu0 }
 0x189   : > { %5902 = vst [vmem:[#allocation4_spill] sm:$0xff] %v5513_v35  ;;  %5903 = vst [vmem:[#allocation5_spill] sm:$0xff] %v5515_v25  ;;  %v1781_v42 = vadd.f32 %v3936_v51, %v5377_v24 }
 0x18a   : > { %v3938_v2 = vpop.f32.mrf.mxu1  ;;  %v5518_v10 = vpop.f32.mrf.mxu0 }
 0x18b   : > { %v3939_v55 = vadd.f32 %v3938_v2, %v3937_v33  ;;  %v5521_v54 = vadd.f32 %v5456_v5, %v1781_v42 }
 0x18c   : > { %v3940_v48 = vpop.f32.mrf.mxu1  ;;  %v4028_v19 = vpop.f32.mrf.mxu0 }
 0x18d   : > { %5904 = vst [vmem:[#allocation6_spill] sm:$0xff] %v5521_v54  ;;  %v1784_v1 = vadd.f32 %v3939_v55, %v5385_v38 }
 0x18e   : > { %v3941_v45 = vpop.f32.mrf.mxu1  ;;  %v4029_v17 = vpop.f32.mrf.mxu0 }
 0x18f   : > { %v3942_v39 = vadd.f32 %v3941_v45, %v3940_v48  ;;  %v5524_v63 = vadd.f32 %v4029_v17, %v4028_v19  ;;  %v5527_v60 = vadd.f32 %v5461_v52, %v1784_v1 }
 0x190   : > { %v3943_v24 = vpop.f32.mrf.mxu1  ;;  %v5529_v51 = vpop.f32.mrf.mxu0 }
 0x191   : > { %5905 = vst [vmem:[#allocation7_spill] sm:$0xff] %v5527_v60  ;;  %v1789_v33 = vadd.f32 %v3942_v39, %v5389_v18 }
 0x192   : > { %v3944_v2 = vpop.f32.mrf.mxu1  ;;  %v5532_v5 = vpop.f32.mrf.mxu0 }
 0x193   : > { %v3945_v42 = vadd.f32 %v3944_v2, %v3943_v24  ;;  %v5535_v25 = vadd.f32 %v5469_v21, %v1789_v33 }
 0x194   : > { %v3946_v38 = vpop.f32.mrf.mxu1  ;;  %v5537_v55 = vpop.f32.mrf.mxu0 }
 0x195   : > { %5906 = vst [vmem:[#allocation8_spill] sm:$0xff] %v5535_v25  ;;  %v1792_v48 = vadd.f32 %v3945_v42, %v5395_v40 }
 0x196   : > { %v3947_v19 = vpop.f32.mrf.mxu1  ;;  %v5540_v52 = vpop.f32.mrf.mxu0 }
 0x197   : > { %v3948_v1 = vadd.f32 %v3947_v19, %v3946_v38  ;;  %v5543_v45 = vadd.f32 %v5476_v12, %v1792_v48 }
 0x198   : > { %v3949_v18 = vpop.f32.mrf.mxu1  ;;  %v5545_v17 = vpop.f32.mrf.mxu0 }
 0x199   : > { %5907 = vst [vmem:[#allocation9_spill] sm:$0xff] %v5543_v45  ;;  %v1797_v39 = vadd.f32 %v3948_v1, %v5400_v43 }
 0x19a   : > { %v3950_v24 = vpop.f32.mrf.mxu1  ;;  %v5548_v21 = vpop.f32.mrf.mxu0 }
 0x19b   : > { %v3951_v33 = vadd.f32 %v3950_v24, %v3949_v18  ;;  %v5551_v2 = vadd.f32 %v5466_v36, %v1797_v39 }
 0x19c   : > { %v3952_v40 = vpop.f32.mrf.mxu1  ;;  %v5553_v42 = vpop.f32.mrf.mxu0 }
 0x19d   : > { %5908 = vst [vmem:[#allocation10_spill] sm:$0xff] %v5551_v2  ;;  %v1800_v38 = vadd.f32 %v3951_v33, %v5405_v15  ;;  %v5603_v2 = vpop.permute.xlu0 %2696 }
 0x19e   : > { %v3953_v19 = vpop.f32.mrf.mxu1  ;;  %v5556_v12 = vpop.f32.mrf.mxu0 }
 0x19f   : > { %v3954_v48 = vadd.f32 %v3953_v19, %v3952_v40  ;;  %v5559_v28 = vadd.f32 %v5473_v7, %v1800_v38 }
 0x1a0   : > { %v3955_v43 = vpop.f32.mrf.mxu1  ;;  %v5561_v1 = vpop.f32.mrf.mxu0 }
 0x1a1   : > { %5909 = vst [vmem:[#allocation11_spill] sm:$0xff] %v5559_v28  ;;  %v1805_v18 = vadd.f32 %v3954_v48, %v5415_v16 }
 0x1a2   : > { %v3956_v24 = vpop.f32.mrf.mxu1  ;;  %v5564_v36 = vpop.f32.mrf.mxu0 }
 0x1a3   : > { %v3957_v39 = vadd.f32 %v3956_v24, %v3955_v43  ;;  %v5567_v45 = vadd.f32 %v5483_v59, %v1805_v18 }
 0x1a4   : > { %v3958_v15 = vpop.f32.mrf.mxu1  ;;  %v5569_v33 = vpop.f32.mrf.mxu0 }
 0x1a5   : > { %5910 = vst [vmem:[#allocation12_spill] sm:$0xff] %v5567_v45  ;;  %v1808_v40 = vadd.f32 %v3957_v39, %v5423_v41 }
 0x1a6   : > { %v3959_v19 = vpop.f32.mrf.mxu1  ;;  %v5572_v7 = vpop.f32.mrf.mxu0 }
 0x1a7   : > { %v3960_v38 = vadd.f32 %v3959_v19, %v3958_v15  ;;  %v5575_v28 = vadd.f32 %v5490_v61, %v1808_v40 }
 0x1a8   : > { %v3961_v16 = vpop.f32.mrf.mxu1  ;;  %v5577_v48 = vpop.f32.mrf.mxu0 }
 0x1a9   : > { %5911 = vst [vmem:[#allocation13_spill] sm:$0xff] %v5575_v28  ;;  %v1813_v43 = vadd.f32 %v3960_v38, %v5431_v6 }
 0x1aa   : > { %v3962_v24 = vpop.f32.mrf.mxu1  ;;  %v5580_v59 = vpop.f32.mrf.mxu0 }
 0x1ab   : > { %v3963_v18 = vadd.f32 %v3962_v24, %v3961_v16  ;;  %v5583_v45 = vadd.f32 %v5480_v27, %v1813_v43 }
 0x1ac   : > { %v3964_v41 = vpop.f32.mrf.mxu1  ;;  %v5585_v39 = vpop.f32.mrf.mxu0 }
 0x1ad   : > { %5912 = vst [vmem:[#allocation14_spill] sm:$0xff] %v5583_v45  ;;  %v1816_v15 = vadd.f32 %v3963_v18, %v5439_v44 }
 0x1ae   : > { %v3965_v19 = vpop.f32.mrf.mxu1  ;;  %v5588_v61 = vpop.f32.mrf.mxu0 }
 0x1af   : > { %v3966_v40 = vadd.f32 %v3965_v19, %v3964_v41  ;;  %v5591_v28 = vadd.f32 %v5487_v56, %v1816_v15  ;;  %v5608_v19 = vpop.permute.xlu1 %2706 }
 0x1b0   : > { %v3967_v6 = vpop.f32.mrf.mxu1  ;;  %v5593_v38 = vpop.f32.mrf.mxu0 }
 0x1b1   : > { %5913 = vst [vmem:[#allocation15_spill] sm:$0xff] %v5591_v28  ;;  %v1821_v16 = vadd.f32 %v3966_v40, %v5412_v31  ;;  %v5618_v28 = vpop.permute.xlu0 %2701 }
 0x1b2   : > { %v3968_v24 = vpop.f32.mrf.mxu1  ;;  %v5596_v27 = vpop.f32.mrf.mxu0 }
 0x1b3   : > { %v3969_v43 = vadd.f32 %v3968_v24, %v3967_v6  ;;  %v5599_v45 = vadd.f32 %v5497_v62, %v1821_v16 }
 0x1b4   : > { %v3970_v44 = vpop.f32.mrf.mxu1  ;;  %v5601_v18 = vpop.f32.mrf.mxu0 }
 0x1b5   : > { %5914 = vst [vmem:[#allocation16_spill] sm:$0xff] %v5599_v45  ;;  %v1824_v56 = vadd.f32 %v3969_v43, %v5421_v49 }
 0x1b6   : > { %v3971_v41 = vpop.f32.mrf.mxu1  ;;  %v5606_v15 = vpop.f32.mrf.mxu0 }
 0x1b7   : > { %v3972_v31 = vadd.f32 %v3971_v41, %v3970_v44  ;;  %v5611_v40 = vadd.f32 %v5504_v47, %v1824_v56  ;;  %v5625_v44 = vpop.permute.xlu1 %2711 }
 0x1b8   : > { %v3973_v6 = vpop.f32.mrf.mxu1  ;;  %v5613_v24 = vpop.f32.mrf.mxu0 }
 0x1b9   : > { %5915 = vst [vmem:[#allocation17_spill] sm:$0xff] %v5611_v40  ;;  %v1829_v62 = vadd.f32 %v3972_v31, %v5408_v14 }
 0x1ba   : > { %v3974_v16 = vpop.f32.mrf.mxu1  ;;  %v5616_v45 = vpop.f32.mrf.mxu0 }
 0x1bb   : > { %v3975_v49 = vadd.f32 %v3974_v16, %v3973_v6  ;;  %v5621_v43 = vadd.f32 %v5494_v30, %v1829_v62  ;;  %v5635_v6 = vpop.permute.xlu0 %2716 }
 0x1bc   : > { %v3976_v25 = vpop.f32.mrf.mxu1  ;;  %v5623_v35 = vpop.f32.mrf.mxu0 }
 0x1bd   : > { %5916 = vst [vmem:[#allocation18_spill] sm:$0xff] %v5621_v43  ;;  %v1832_v47 = vadd.f32 %v3975_v49, %v5418_v11  ;;  %v5640_v43 = vpop.permute.xlu1 %2721 }
 0x1be   : > { %v3977_v56 = vpop.f32.mrf.mxu1  ;;  %v5628_v41 = vpop.f32.mrf.mxu0 }
 0x1bf   : > { %v3978_v14 = vadd.f32 %v3977_v56, %v3976_v25  ;;  %v5631_v31 = vadd.f32 %v5501_v37, %v1832_v47  ;;  %v5650_v54 = vpop.permute.xlu0 %2726 }
 0x1c0   : > { %v3979_v40 = vpop.f32.mrf.mxu1  ;;  %v5633_v60 = vpop.f32.mrf.mxu0 }
 0x1c1   : > { %5917 = vst [vmem:[#allocation19_spill] sm:$0xff] %v5631_v31  ;;  %v1837_v30 = vadd.f32 %v3978_v14, %v5429_v53 }
 0x1c2   : > { %v3980_v62 = vpop.f32.mrf.mxu1  ;;  %v5638_v16 = vpop.f32.mrf.mxu0 }
 0x1c3   : > { %5918 = vst [vmem:[#allocation20_spill] sm:$0xff] %v5638_v16  ;;  %v3981_v11 = vadd.f32 %v3980_v62, %v3979_v40  ;;  %v5643_v49 = vadd.f32 %v5511_v50, %v1837_v30  ;;  %v5657_v40 = vpop.permute.xlu1 %2731 }
 0x1c4   : > { %v3982_v25 = vpop.f32.mrf.mxu1  ;;  %v5645_v56 = vpop.f32.mrf.mxu0 }
 0x1c5   : > { %5919 = vst [vmem:[#allocation21_spill] sm:$0xff] %v5643_v49  ;;  %v1840_v37 = vadd.f32 %v3981_v11, %v5437_v9 }
 0x1c6   : > { %v3983_v47 = vpop.f32.mrf.mxu1  ;;  %v5648_v31 = vpop.f32.mrf.mxu0 }
 0x1c7   : > { %v3984_v53 = vadd.f32 %v3983_v47, %v3982_v25  ;;  %v5653_v14 = vadd.f32 %v5518_v10, %v1840_v37  ;;  %v4036_v10 = vadd.f32 %v5540_v52, %v5537_v55  ;;  %v5668_v25 = vpop.permute.xlu0 %2736 }
 0x1c8   : > { %v3985_v3 = vpop.f32.mrf.mxu1  ;;  %v5655_v16 = vpop.f32.mrf.mxu0 }
 0x1c9   : > { %5920 = vst [vmem:[#allocation22_spill] sm:$0xff] %v5653_v14  ;;  %v5660_v50 = vadd.f32 %v3984_v53, %v5426_v29  ;;  %v4039_v53 = vadd.f32 %v5548_v21, %v5545_v17  ;;  %v5677_v14 = vpop.permute.xlu1 %2741 }
 0x1ca   : > { %v3986_v30 = vpop.f32.mrf.mxu1  ;;  %v5662_v62 = vpop.f32.mrf.mxu0 }
 0x1cb   : > { %5921 = vst [vmem:[#allocation23_spill] sm:$0xff] %v5660_v50  ;;  %v3987_v9 = vadd.f32 %v3986_v30, %v3985_v3 }
 0x1cc   : > { %v5664_v11 = vpop.f32.mrf.mxu0  ;;  %v4262_v49 = vpop.f32.mrf.mxu1 }
 0x1cd   : > { %5922 = vst [vmem:[#allocation24_spill] sm:$0xff] %v5664_v11  ;;  %v5671_v37 = vadd.f32 %v3987_v9, %v5434_v23  ;;  %v2512_v3 = vadd.f32 %v4262_v49, %v4036_v10  ;;  %v4033_v23 = vadd.f32 %v5532_v5, %v5529_v51  ;;  %v4042_v51 = vadd.f32 %v5556_v12, %v5553_v42 }
 0x1ce   : > { %v5673_v47 = vpop.f32.mrf.mxu0  ;;  %v2503_v29 = vpop.f32.mrf.mxu1  ;;  %v4048_v5 = vadd.f32 %v5572_v7, %v5569_v33 }
 0x1cf   : > { %5923 = vst [vmem:[#allocation25_spill] sm:$0xff] %v5671_v37  ;;  %5924 = vst [vmem:[#allocation26_spill] sm:$0xff] %v5673_v47  ;;  %v2504_v30 = vadd.f32 %v5524_v63, %v2503_v29  ;;  %v5688_v47 = vpop.permute.xlu0 %2746  ;;  %v2632_v17 = vadd.f32 %v2512_v3, %v5448_v58 }
 0x1d0   : > { %v5680_v50 = vpop.f32.mrf.mxu0  ;;  %v4263_v11 = vpop.f32.mrf.mxu1 }
 0x1d1   : > { %v2630_v55 = vadd.f32 %v2504_v30, %v5442_v0  ;;  %v2515_v52 = vadd.f32 %v4263_v11, %v4039_v53  ;;  %v5703_v11 = vpop.permute.xlu1 %2751  ;;  %v2856_v12 = vmul.f32 %v5608_v19, %v2632_v17 }
 0x1d2   : > { %v5686_v9 = vpop.f32.mrf.mxu0  ;;  %v2506_v37 = vpop.f32.mrf.mxu1 }
 0x1d3   : > { %v2633_v21 = vadd.f32 %v2515_v52, %v5451_v57  ;;  %v2507_v0 = vadd.f32 %v4033_v23, %v2506_v37  ;;  %v2854_v57 = vmul.f32 %v5603_v2, %v2630_v55  ;;  %v4051_v37 = vadd.f32 %v5580_v59, %v5577_v48  ;;  %v5718_v52 = vpop.permute.xlu0 %2756 }
 0x1d4   : > { %v5697_v63 = vpop.f32.mrf.mxu0  ;;  %v4266_v49 = vpop.f32.mrf.mxu1 }
 0x1d5   : > { %v3653_v58 = vpack.c.bf16 %v2633_v21, %v2632_v17  ;;  %v2631_v10 = vadd.f32 %v2507_v0, %v5445_v34  ;;  %v2528_v3 = vadd.f32 %v4266_v49, %v4048_v5  ;;  %v4045_v34 = vadd.f32 %v5564_v36, %v5561_v1  ;;  %v5725_v5 = vpop.permute.xlu1 %2761 }
 0x1d6   : > { %v5707_v29 = vpop.f32.mrf.mxu0  ;;  %v2519_v53 = vpop.f32.mrf.mxu1  ;;  %v2924_v59 = vmul.f32 %v2854_v57, %v2630_v55  ;;  %v2857_v0 = vmul.f32 %v5625_v44, %v2633_v21 }
 0x1d7   : > { %3725 = vst [vmem:[%s5695_s14 + $0x8] sm:$0xff] %v3653_v58   ;;  %v2520_v42 = vadd.f32 %v4042_v51, %v2519_v53  ;;  %v2855_v33 = vmul.f32 %v5618_v28, %v2631_v10  ;;  %v3648_v7 = vpack.c.bf16 %v2631_v10, %v2630_v55  ;;  %v2636_v58 = vadd.f32 %v2528_v3, %v5464_v32 }
 0x1d8   : > { %v5714_v30 = vpop.f32.mrf.mxu0  ;;  %v4267_v2 = vpop.f32.mrf.mxu1  ;;  %v2926_v53 = vmul.f32 %v2856_v12, %v2632_v17  ;;  %v4063_v32 = vadd.f32 %v5616_v45, %v5613_v24  ;;  %v2927_v3 = vmul.f32 %v2857_v0, %v2633_v21 }
 0x1d9   : > { %v2634_v23 = vadd.f32 %v2520_v42, %v5454_v46  ;;  %v2531_v48 = vadd.f32 %v4267_v2, %v4051_v37  ;;  %v2886_v49 = vadd.f32 %v2855_v33, %v2854_v57  ;;  %v2925_v51 = vmul.f32 %v2855_v33, %v2631_v10  ;;  %3649 = vst [vmem:[%s5695_s14] sm:$0xff] %v3648_v7   ;;  %v5741_v2 = vpop.permute.xlu0 %2766 }
 0x1da   : > { %v5723_v19 = vpop.f32.mrf.mxu0  ;;  %v2522_v28 = vpop.f32.mrf.mxu1  ;;  %v4054_v10 = vadd.f32 %v5588_v61, %v5585_v39  ;;  %v4060_v42 = vadd.f32 %v5606_v15, %v5601_v18 }
 0x1db   : > { %v2858_v1 = vmul.f32 %v5635_v6, %v2634_v23  ;;  %v2637_v36 = vadd.f32 %v2531_v48, %v5471_v26  ;;  %v2887_v46 = vadd.f32 %v2886_v49, %v2856_v12  ;;  %v2956_v37 = vadd.f32 %v2925_v51, %v2924_v59 }
 0x1dc   : > { %v2523_v55 = vadd.f32 %v4045_v34, %v2522_v28  ;;  %v5730_v44 = vpop.f32.mrf.mxu0  ;;  %v4270_v57 = vpop.f32.mrf.mxu1  ;;  %v2860_v34 = vmul.f32 %v5650_v54, %v2636_v58  ;;  %v4057_v59 = vadd.f32 %v5596_v27, %v5593_v38 }
 0x1dd   : > { %v3663_v6 = vpack.c.bf16 %v2637_v36, %v2636_v58  ;;  %v2957_v26 = vadd.f32 %v2956_v37, %v2926_v53  ;;  %v2888_v17 = vadd.f32 %v2887_v46, %v2857_v0  ;;  %v2928_v39 = vmul.f32 %v2858_v1, %v2634_v23  ;;  %v5750_v0 = vpop.permute.xlu1 %2771 }
 0x1de   : > { %v2635_v12 = vadd.f32 %v2523_v55, %v5459_v4  ;;  %v5739_v33 = vpop.f32.mrf.mxu0  ;;  %v2535_v7 = vpop.f32.mrf.mxu1  ;;  %v2544_v61 = vadd.f32 %v4270_v57, %v4060_v42  ;;  %v2861_v28 = vmul.f32 %v5657_v40, %v2637_v36  ;;  %v2930_v27 = vmul.f32 %v2860_v34, %v2636_v58 }
 0x1df   : > { %3727 = vst [vmem:[%s5695_s14 + $0x18] sm:$0xff] %v3663_v6   ;;  %v2536_v18 = vadd.f32 %v4054_v10, %v2535_v7  ;;  %v2889_v15 = vadd.f32 %v2888_v17, %v2858_v1  ;;  %v2958_v45 = vadd.f32 %v2957_v26, %v2927_v3  ;;  %v5762_v42 = vpop.permute.xlu0 %2776 }
 0x1e0   : > { %v2859_v24 = vmul.f32 %v5640_v43, %v2635_v12  ;;  %v3658_v21 = vpack.c.bf16 %v2635_v12, %v2634_v23  ;;  %v5746_v48 = vpop.f32.mrf.mxu0  ;;  %v4271_v4 = vpop.f32.mrf.mxu1  ;;  %v2640_v23 = vadd.f32 %v2544_v61, %v5492_v22  ;;  %v4072_v22 = vadd.f32 %v5648_v31, %v5645_v56  ;;  %v5925_v61 = vld [vmem:[#allocation20_spill] sm:$0xff] }
 0x1e1   : > { %v2638_v54 = vadd.f32 %v2536_v18, %v5478_v8  ;;  %v2547_v49 = vadd.f32 %v4271_v4, %v4063_v32  ;;  %v2959_v51 = vadd.f32 %v2958_v45, %v2928_v39  ;;  %v4066_v32 = vadd.f32 %v5628_v41, %v5623_v35  ;;  %v5773_v7 = vpop.permute.xlu1 %2781 }
 0x1e2   : > { %v2890_v53 = vadd.f32 %v2889_v15, %v2859_v24  ;;  %v2929_v1 = vmul.f32 %v2859_v24, %v2635_v12  ;;  %3726 = vst [vmem:[%s5695_s14 + $0x10] sm:$0xff] %v3658_v21   ;;  %v5755_v46 = vpop.f32.mrf.mxu0  ;;  %v2538_v43 = vpop.f32.mrf.mxu1  ;;  %v2931_v58 = vmul.f32 %v2861_v28, %v2637_v36  ;;  %v4069_v18 = vadd.f32 %v5925_v61, %v5633_v60  ;;  %v5926_v15 = vld [vmem:[#allocation3_spill] sm:$0xff] }
 0x1e3   : > { %v2862_v37 = vmul.f32 %v5668_v25, %v2638_v54  ;;  %v2641_v38 = vadd.f32 %v2547_v49, %v5499_v13  ;;  %v2539_v8 = vadd.f32 %v4057_v59, %v2538_v43  ;;  %v4075_v25 = vadd.f32 %v5662_v62, %v5655_v16 }
 0x1e4   : > { %v2891_v55 = vadd.f32 %v2890_v53, %v2860_v34  ;;  %v2960_v57 = vadd.f32 %v2959_v51, %v2929_v1  ;;  %v5760_v10 = vpop.f32.mrf.mxu0  ;;  %v4274_v40 = vpop.f32.mrf.mxu1  ;;  %v2864_v34 = vmul.f32 %v5688_v47, %v2640_v23  ;;  %v5928_v1 = vld [vmem:[#allocation7_spill] sm:$0xff] }
 0x1e5   : > { %v3673_v13 = vpack.c.bf16 %v2641_v38, %v2640_v23  ;;  %v2639_v26 = vadd.f32 %v2539_v8, %v5485_v20  ;;  %v2932_v35 = vmul.f32 %v2862_v37, %v2638_v54  ;;  %v2560_v41 = vadd.f32 %v4274_v40, %v4072_v22  ;;  %v5794_v8 = vpop.permute.xlu1 %2791  ;;  %v5929_v40 = vld [vmem:[#allocation24_spill] sm:$0xff] }
 0x1e6   : > { %v2961_v6 = vadd.f32 %v2960_v57, %v2930_v27  ;;  %v2892_v3 = vadd.f32 %v2891_v55, %v2861_v28  ;;  %v5771_v17 = vpop.f32.mrf.mxu0  ;;  %v2551_v12 = vpop.f32.mrf.mxu1  ;;  %v2865_v21 = vmul.f32 %v5703_v11, %v2641_v38  ;;  %v2934_v43 = vmul.f32 %v2864_v34, %v2640_v23 }
 0x1e7   : > { %3729 = vst [vmem:[%s5695_s14 + $0x28] sm:$0xff] %v3673_v13   ;;  %v2552_v31 = vadd.f32 %v4066_v32, %v2551_v12  ;;  %v2863_v62 = vmul.f32 %v5677_v14, %v2639_v26  ;;  %v3668_v36 = vpack.c.bf16 %v2639_v26, %v2638_v54  ;;  %v5787_v14 = vpop.permute.xlu0 %2786  ;;  %v5927_v54 = vld [vmem:[#allocation6_spill] sm:$0xff] }
 0x1e8   : > { %v2893_v56 = vadd.f32 %v2892_v3, %v2862_v37  ;;  %v2962_v16 = vadd.f32 %v2961_v6, %v2931_v58  ;;  %v5778_v39 = vpop.f32.mrf.mxu0  ;;  %v4275_v20 = vpop.f32.mrf.mxu1  ;;  %v2644_v28 = vadd.f32 %v2560_v41, %v5927_v54  ;;  %v5930_v32 = vld [vmem:[#allocation26_spill] sm:$0xff]  ;;  %v2935_v23 = vmul.f32 %v2865_v21, %v2641_v38  ;;  %v5931_v3 = vld [vmem:[#allocation4_spill] sm:$0xff]  ;;  %v5934_v54 = vld [vmem:[#allocation11_spill] sm:$0xff] }
 0x1e9   : > { %v2642_v45 = vadd.f32 %v2552_v31, %v5926_v15  ;;  %v2563_v24 = vadd.f32 %v4275_v20, %v4075_v25  ;;  %v2933_v59 = vmul.f32 %v2863_v62, %v2639_v26  ;;  %3728 = vst [vmem:[%s5695_s14 + $0x20] sm:$0xff] %v3668_v36   ;;  %v4078_v22 = vadd.f32 %v5930_v32, %v5929_v40  ;;  %v5932_v20 = vld [vmem:[#allocation8_spill] sm:$0xff] }
 0x1ea   : > { %v2963_v47 = vadd.f32 %v2962_v16, %v2932_v35  ;;  %v2894_v4 = vadd.f32 %v2893_v56, %v2863_v62  ;;  %v5785_v49 = vpop.f32.mrf.mxu0  ;;  %v2554_v51 = vpop.f32.mrf.mxu1  ;;  %v4084_v25 = vadd.f32 %v5707_v29, %v5697_v63  ;;  %v2868_v35 = vmul.f32 %v5741_v2, %v2644_v28 }
 0x1eb   : > { %v2866_v53 = vmul.f32 %v5718_v52, %v2642_v45  ;;  %v2645_v60 = vadd.f32 %v2563_v24, %v5928_v1  ;;  %v2555_v55 = vadd.f32 %v4069_v18, %v2554_v51  ;;  %v4087_v52 = vadd.f32 %v5723_v19, %v5714_v30  ;;  %v2797_v62 = vpop.permute.xlu0 %2796 }
 0x1ec   : > { %v2895_v37 = vadd.f32 %v2894_v4, %v2864_v34  ;;  %v2964_v27 = vadd.f32 %v2963_v47, %v2933_v59  ;;  %v5792_v11 = vpop.f32.mrf.mxu0  ;;  %v4278_v57 = vpop.f32.mrf.mxu1  ;;  %v4081_v2 = vadd.f32 %v5686_v9, %v5680_v50  ;;  %v4096_v4 = vadd.f32 %v5771_v17, %v5760_v10  ;;  %v5933_v59 = vld [vmem:[#allocation10_spill] sm:$0xff]  ;;  %v5935_v17 = vld [vmem:[#allocation9_spill] sm:$0xff] }
 0x1ed   : > { %v3683_v13 = vpack.c.bf16 %v2645_v60, %v2644_v28  ;;  %v2643_v26 = vadd.f32 %v2555_v55, %v5931_v3  ;;  %v2936_v41 = vmul.f32 %v2866_v53, %v2642_v45  ;;  %v2576_v31 = vadd.f32 %v4278_v57, %v4084_v25 }
 0x1ee   : > { %v2965_v58 = vadd.f32 %v2964_v27, %v2934_v43  ;;  %v2896_v6 = vadd.f32 %v2895_v37, %v2865_v21  ;;  %v5803_v12 = vpop.f32.mrf.mxu0  ;;  %v2567_v34 = vpop.f32.mrf.mxu1  ;;  %v2869_v36 = vmul.f32 %v5750_v0, %v2645_v60  ;;  %v2938_v1 = vmul.f32 %v2868_v35, %v2644_v28 }
 0x1ef   : > { %3731 = vst [vmem:[%s5695_s14 + $0x38] sm:$0xff] %v3683_v13   ;;  %v2568_v56 = vadd.f32 %v4078_v22, %v2567_v34  ;;  %v2867_v30 = vmul.f32 %v5725_v5, %v2643_v26  ;;  %v3678_v19 = vpack.c.bf16 %v2643_v26, %v2642_v45  ;;  %v5817_v45 = vpop.permute.xlu1 %2801  ;;  %v2648_v0 = vadd.f32 %v2576_v31, %v5933_v59  ;;  %v2807_v13 = vpop.permute.xlu0 %2806 }
 0x1f0   : > { %v2897_v63 = vadd.f32 %v2896_v6, %v2866_v53  ;;  %v2966_v29 = vadd.f32 %v2965_v58, %v2935_v23  ;;  %v5808_v38 = vpop.f32.mrf.mxu0  ;;  %v4279_v16 = vpop.f32.mrf.mxu1  ;;  %v4090_v55 = vadd.f32 %v5739_v33, %v5730_v44  ;;  %v2939_v57 = vmul.f32 %v2869_v36, %v2645_v60 }
 0x1f1   : > { %v2646_v61 = vadd.f32 %v2568_v56, %v5932_v20  ;;  %v2579_v18 = vadd.f32 %v4279_v16, %v4087_v52  ;;  %v2937_v47 = vmul.f32 %v2867_v30, %v2643_v26  ;;  %3730 = vst [vmem:[%s5695_s14 + $0x30] sm:$0xff] %v3678_v19   ;;  %v4099_v28 = vadd.f32 %v5785_v49, %v5778_v39  ;;  %v5936_v39 = vld [vmem:[#allocation12_spill] sm:$0xff]  ;;  %v5938_v20 = vld [vmem:[#allocation15_spill] sm:$0xff] }
 0x1f2   : > { %v2967_v15 = vadd.f32 %v2966_v29, %v2936_v41  ;;  %v2898_v24 = vadd.f32 %v2897_v63, %v2867_v30  ;;  %v5815_v21 = vpop.f32.mrf.mxu0  ;;  %v2570_v5 = vpop.f32.mrf.mxu1  ;;  %v2872_v23 = vmul.f32 %v5787_v14, %v2648_v0  ;;  %v4093_v41 = vadd.f32 %v5755_v46, %v5746_v48  ;;  %v5937_v30 = vld [vmem:[#allocation14_spill] sm:$0xff] }
 0x1f3   : > { %v2870_v51 = vmul.f32 %v5762_v42, %v2646_v61  ;;  %v2649_v53 = vadd.f32 %v2579_v18, %v5934_v54  ;;  %v2571_v43 = vadd.f32 %v4081_v2, %v2570_v5 }
 0x1f4   : > { %v2899_v50 = vadd.f32 %v2898_v24, %v2868_v35  ;;  %v2968_v9 = vadd.f32 %v2967_v15, %v2937_v47  ;;  %v4106_v37 = vpop.f32.mrf.mxu0  ;;  %v4282_v27 = vpop.f32.mrf.mxu1  ;;  %v2942_v18 = vmul.f32 %v2872_v23, %v2648_v0  ;;  %v4102_v47 = vadd.f32 %v5803_v12, %v5792_v11 }
 0x1f5   : > { %v3693_v40 = vpack.c.bf16 %v2649_v53, %v2648_v0  ;;  %v2647_v22 = vadd.f32 %v2571_v43, %v5935_v17  ;;  %v2592_v25 = vadd.f32 %v4282_v27, %v4096_v4  ;;  %v2940_v58 = vmul.f32 %v2870_v51, %v2646_v61  ;;  %v2812_v35 = vpop.permute.xlu1 %2811  ;;  %v2817_v24 = vpop.permute.xlu0 %2816 }
 0x1f6   : > { %v2969_v32 = vadd.f32 %v2968_v9, %v2938_v1  ;;  %v2900_v10 = vadd.f32 %v2899_v50, %v2869_v36  ;;  %v4107_v42 = vpop.f32.mrf.mxu0  ;;  %v2583_v52 = vpop.f32.mrf.mxu1  ;;  %v2873_v31 = vmul.f32 %v5794_v8, %v2649_v53  ;;  %v4105_v17 = vadd.f32 %v5815_v21, %v5808_v38 }
 0x1f7   : > { %3733 = vst [vmem:[%s5695_s14 + $0x48] sm:$0xff] %v3693_v40   ;;  %v2584_v6 = vadd.f32 %v4090_v55, %v2583_v52  ;;  %v2871_v60 = vmul.f32 %v5773_v7, %v2647_v22  ;;  %v3688_v3 = vpack.c.bf16 %v2647_v22, %v2646_v61  ;;  %v2652_v19 = vadd.f32 %v2592_v25, %v5937_v30  ;;  %v5943_v30 = vld [vmem:[#allocation17_spill] sm:$0xff] }
 0x1f8   : > { %v2901_v44 = vadd.f32 %v2900_v10, %v2870_v51  ;;  %v2970_v33 = vadd.f32 %v2969_v32, %v2939_v57  ;;  %v4109_v26 = vpop.f32.mrf.mxu0  ;;  %v4283_v34 = vpop.f32.mrf.mxu1  ;;  %v2943_v5 = vmul.f32 %v2873_v31, %v2649_v53  ;;  %v4108_v4 = vadd.f32 %v4107_v42, %v4106_v37 }
 0x1f9   : > { %v2650_v49 = vadd.f32 %v2584_v6, %v5936_v39  ;;  %v2595_v14 = vadd.f32 %v4283_v34, %v4099_v28  ;;  %v2941_v29 = vmul.f32 %v2871_v60, %v2647_v22  ;;  %3732 = vst [vmem:[%s5695_s14 + $0x40] sm:$0xff] %v3688_v3   ;;  %v2876_v54 = vmul.f32 %v2807_v13, %v2652_v19  ;;  %v2822_v43 = vpop.permute.xlu1 %2821  ;;  %v5940_v22 = vld [vmem:[#allocation16_spill] sm:$0xff]  ;;  %v5942_v3 = vld [vmem:[#allocation19_spill] sm:$0xff] }
 0x1fa   : > { %v2971_v56 = vadd.f32 %v2970_v33, %v2940_v58  ;;  %v2902_v63 = vadd.f32 %v2901_v44, %v2871_v60  ;;  %v4110_v16 = vpop.f32.mrf.mxu0  ;;  %v2586_v7 = vpop.f32.mrf.mxu1  ;;  %v5941_v33 = vld [vmem:[#allocation18_spill] sm:$0xff] }
 0x1fb   : > { %v2874_v36 = vmul.f32 %v2797_v62, %v2650_v49  ;;  %v2653_v61 = vadd.f32 %v2595_v14, %v5938_v20  ;;  %v2587_v48 = vadd.f32 %v4093_v41, %v2586_v7  ;;  %v5939_v62 = vld [vmem:[#allocation13_spill] sm:$0xff]  ;;  %v4111_v55 = vadd.f32 %v4110_v16, %v4109_v26  ;;  %v2827_v44 = vpop.permute.xlu0 %2826 }
 0x1fc   : > { %v2903_v2 = vadd.f32 %v2902_v63, %v2872_v23  ;;  %v2972_v15 = vadd.f32 %v2971_v56, %v2941_v29  ;;  %v4112_v46 = vpop.f32.mrf.mxu0  ;;  %v4286_v8 = vpop.f32.mrf.mxu1  ;;  %v2946_v34 = vmul.f32 %v2876_v54, %v2652_v19 }
 0x1fd   : > { %v3703_v59 = vpack.c.bf16 %v2653_v61, %v2652_v19  ;;  %v2651_v50 = vadd.f32 %v2587_v48, %v5939_v62  ;;  %v2944_v27 = vmul.f32 %v2874_v36, %v2650_v49  ;;  %v2608_v57 = vadd.f32 %v4286_v8, %v4108_v4 }
 0x1fe   : > { %v2973_v51 = vadd.f32 %v2972_v15, %v2942_v18  ;;  %v2904_v1 = vadd.f32 %v2903_v2, %v2873_v31  ;;  %v4113_v9 = vpop.f32.mrf.mxu0  ;;  %v2599_v0 = vpop.f32.mrf.mxu1  ;;  %v2877_v13 = vmul.f32 %v2812_v35, %v2653_v61 }
 0x1ff   : > { %3735 = vst [vmem:[%s5695_s14 + $0x58] sm:$0xff] %v3703_v59   ;;  %v2600_v40 = vadd.f32 %v4102_v47, %v2599_v0  ;;  %v2875_v11 = vmul.f32 %v5817_v45, %v2651_v50  ;;  %v3698_v12 = vpack.c.bf16 %v2651_v50, %v2650_v49  ;;  %v2656_v60 = vadd.f32 %v2608_v57, %v5941_v33  ;;  %v2832_v49 = vpop.permute.xlu1 %2831  ;;  %v2837_v59 = vpop.permute.xlu0 %2836 }
 0x200   : > { %v2905_v32 = vadd.f32 %v2904_v1, %v2874_v36  ;;  %v2974_v10 = vadd.f32 %v2973_v51, %v2943_v5  ;;  %v4115_v53 = vpop.f32.mrf.mxu0  ;;  %v4287_v37 = vpop.f32.mrf.mxu1  ;;  %v4114_v35 = vadd.f32 %v4113_v9, %v4112_v46  ;;  %v2947_v56 = vmul.f32 %v2877_v13, %v2653_v61  ;;  %v5944_v5 = vld [vmem:[#allocation23_spill] sm:$0xff]  ;;  %v5945_v61 = vld [vmem:[#allocation2_spill] sm:$0xff]  ;;  %v5946_v1 = vld [vmem:[#allocation21_spill] sm:$0xff] }
 0x201   : > { %v2654_v25 = vadd.f32 %v2600_v40, %v5940_v22  ;;  %v2611_v42 = vadd.f32 %v4287_v37, %v4111_v55  ;;  %v2945_v23 = vmul.f32 %v2875_v11, %v2651_v50  ;;  %3734 = vst [vmem:[%s5695_s14 + $0x50] sm:$0xff] %v3698_v12   ;;  %v2880_v20 = vmul.f32 %v2827_v44, %v2656_v60  ;;  %v5947_v22 = vld [vmem:[#allocation25_spill] sm:$0xff] }
 0x202   : > { %v2975_v52 = vadd.f32 %v2974_v10, %v2944_v27  ;;  %v2906_v28 = vadd.f32 %v2905_v32, %v2875_v11  ;;  %v4116_v58 = vpop.f32.mrf.mxu0  ;;  %v2602_v6 = vpop.f32.mrf.mxu1  ;;  %v2006_v4 = vadd.f32 %v5945_v61, %v5944_v5 }
 0x203   : > { %v2878_v45 = vmul.f32 %v2817_v24, %v2654_v25  ;;  %v2657_v26 = vadd.f32 %v2611_v42, %v5942_v3  ;;  %v2603_v21 = vadd.f32 %v4105_v17, %v2602_v6  ;;  %v4117_v51 = vadd.f32 %v4116_v58, %v4115_v53  ;;  %v2842_v40 = vpop.permute.xlu1 %2841  ;;  %v5948_v53 = vld [vmem:[#allocation5_spill] sm:$0xff]  ;;  %v2847_v6 = vpop.permute.xlu0 %2846 }
 0x204   : > { %v2907_v41 = vadd.f32 %v2906_v28, %v2876_v54  ;;  %v2976_v38 = vadd.f32 %v2975_v52, %v2945_v23  ;;  %v4118_v31 = vpop.f32.mrf.mxu0  ;;  %v4290_v39 = vpop.f32.mrf.mxu1  ;;  %v5949_v52 = vld [vmem:[#allocation22_spill] sm:$0xff] }
 0x205   : > { %v3713_v14 = vpack.c.bf16 %v2657_v26, %v2656_v60  ;;  %v2655_v16 = vadd.f32 %v2603_v21, %v5943_v30  ;;  %v2948_v18 = vmul.f32 %v2878_v45, %v2654_v25  ;;  %v2881_v9 = vmul.f32 %v2832_v49, %v2657_v26 }
 0x206   : > { %v2977_v63 = vadd.f32 %v2976_v38, %v2946_v34  ;;  %v2908_v29 = vadd.f32 %v2907_v41, %v2877_v13  ;;  %v4119_v7 = vpop.f32.mrf.mxu0  ;;  %v2615_v36 = vpop.f32.mrf.mxu1 }
 0x207   : > { %3737 = vst [vmem:[%s5695_s14 + $0x68] sm:$0xff] %v3713_v14   ;;  %v4120_v19 = vadd.f32 %v4119_v7, %v4118_v31  ;;  %v2616_v2 = vadd.f32 %v4114_v35, %v2615_v36  ;;  %v2879_v8 = vmul.f32 %v2822_v43, %v2655_v16  ;;  %v3708_v24 = vpack.c.bf16 %v2655_v16, %v2654_v25  ;;  %v2852_v38 = vpop.permute.xlu1 %2851 }
 0x208   : > { %v2909_v15 = vadd.f32 %v2908_v29, %v2878_v45  ;;  %v2978_v48 = vadd.f32 %v2977_v63, %v2947_v56  ;;  %v4121_v47 = vpop.f32.mrf.mxu0  ;;  %v4291_v46 = vpop.f32.mrf.mxu1  ;;  %v2950_v43 = vmul.f32 %v2880_v20, %v2656_v60  ;;  %v2009_v25 = vadd.f32 %v5948_v53, %v5947_v22 }
 0x209   : > { %v2624_v54 = vadd.f32 %v4290_v39, %v4120_v19  ;;  %v2658_v62 = vadd.f32 %v2616_v2, %v5946_v1  ;;  %v2949_v27 = vmul.f32 %v2879_v8, %v2655_v16  ;;  %3736 = vst [vmem:[%s5695_s14 + $0x60] sm:$0xff] %v3708_v24   ;;  %v2951_v28 = vmul.f32 %v2881_v9, %v2657_v26 }
 0x20a   : > { %v2979_v50 = vadd.f32 %v2978_v48, %v2948_v18  ;;  %v2910_v0 = vadd.f32 %v2909_v15, %v2879_v8  ;;  %v4122_v55 = vpop.f32.mrf.mxu0  ;;  %v2618_v57 = vpop.f32.mrf.mxu1 }
 0x20b   : > { %v4123_v32 = vadd.f32 %v4122_v55, %v4121_v47  ;;  %v2619_v10 = vadd.f32 %v4117_v51, %v2618_v57  ;;  %v2660_v37 = vadd.f32 %v2624_v54, %v2006_v4  ;;  %v2882_v17 = vmul.f32 %v2837_v59, %v2658_v62 }
 0x20c   : > { %v2911_v11 = vadd.f32 %v2910_v0, %v2880_v20  ;;  %v2980_v12 = vadd.f32 %v2979_v50, %v2949_v27 }
 0x20d   : > { %v2627_v42 = vadd.f32 %v4291_v46, %v4123_v32  ;;  %v2659_v13 = vadd.f32 %v2619_v10, %v5949_v52  ;;  %v2884_v45 = vmul.f32 %v2847_v6, %v2660_v37  ;;  %v2952_v34 = vmul.f32 %v2882_v17, %v2658_v62 }
 0x20e   : > { %v2981_v23 = vadd.f32 %v2980_v12, %v2950_v43  ;;  %v2912_v58 = vadd.f32 %v2911_v11, %v2881_v9 }
 0x20f   : > { %v2661_v44 = vadd.f32 %v2627_v42, %v2009_v25  ;;  %v2883_v33 = vmul.f32 %v2842_v40, %v2659_v13  ;;  %v3718_v60 = vpack.c.bf16 %v2659_v13, %v2658_v62  ;;  %v2954_v26 = vmul.f32 %v2884_v45, %v2660_v37 }
 0x210   : > { %v2913_v3 = vadd.f32 %v2912_v58, %v2882_v17  ;;  %v2982_v41 = vadd.f32 %v2981_v23, %v2951_v28 }
 0x211   : > { %v3723_v21 = vpack.c.bf16 %v2661_v44, %v2660_v37  ;;  %v2953_v31 = vmul.f32 %v2883_v33, %v2659_v13  ;;  %3738 = vst [vmem:[%s5695_s14 + $0x70] sm:$0xff] %v3718_v60   ;;  %v2885_v49 = vmul.f32 %v2852_v38, %v2661_v44 }
 0x212   : > { %v2983_v39 = vadd.f32 %v2982_v41, %v2952_v34  ;;  %v2914_v35 = vadd.f32 %v2913_v3, %v2883_v33 }
 0x213   : > { %3739 = vst [vmem:[%s5695_s14 + $0x78] sm:$0xff] %v3723_v21   ;;  %v2955_v63 = vmul.f32 %v2885_v49, %v2661_v44 }
 0x214   : > { %v2915_v14 = vadd.f32 %v2914_v35, %v2884_v45  ;;  %v2984_v56 = vadd.f32 %v2983_v39, %v2953_v31 }
 0x216   : > { %v2916_v29 = vadd.f32 %v2915_v14, %v2885_v49  ;;  %v2985_v30 = vadd.f32 %v2984_v56, %v2954_v26 }
 0x218   : > { %v2917_v16 = vrot.slane %v2916_v29, 4  ;;  %v2986_v7 = vadd.f32 %v2985_v30, %v2955_v63 }
 0x21a   : > { %v2918_v36 = vadd.f32 %v2917_v16, %v2916_v29  ;;  %v2987_v20 = vrot.slane %v2986_v7, 4 }
 0x21c   : > { %v2919_v18 = vrot.slane %v2918_v36, 2  ;;  %v2988_v19 = vadd.f32 %v2987_v20, %v2986_v7 }
 0x21e   : > { %v2920_v2 = vadd.f32 %v2919_v18, %v2918_v36  ;;  %v2989_v15 = vrot.slane %v2988_v19, 2 }
 0x220   : > { %v2921_v48 = vrot.slane %v2920_v2, 1  ;;  %v2990_v8 = vadd.f32 %v2989_v15, %v2988_v19 }
 0x222   : > { %v2922_v24 = vadd.f32 %v2921_v48, %v2920_v2  ;;  %v2991_v47 = vrot.slane %v2990_v8, 1 }
 0x224   : > { %2923 = vst [vmem:[%s231_s19] sm:$0x1] %v2922_v24  ;;  %v2992_v46 = vadd.f32 %v2991_v47, %v2990_v8 }
 0x226   : > { %2993 = vst [vmem:[%s231_s19 + $0x1] sm:$0x1] %v2992_v46 }
 0x227 PF: > { %s15_s15 = sadd.s32 1, %s4565_s15  }
 0x228   : > { %p12_p5 = scmp.ge.s32.totalorder %s15_s15, 4  }
 0x22a   :  { %14 = sbr.rel (!%p12_p5) target bundleno = 1 (0x1), region = 79 }

</bundles_post_ra>
